<compile_context>
chip_gen: v7x
topology: tpu7x:2x2x1
jax: 0.10.0
libtpu: 0.0.40
codegen_flags: <defaults>
</compile_context>

<pallas_src>
import jax
import jax.numpy as jnp
from jax.experimental import pallas as pl
from jax.experimental.pallas import tpu as pltpu


_VMEM_LIMIT = 32 * 1024 * 1024   # <= physical VMEM on v5e/v6e/v7x


# ------------------------- Pallas kernels -------------------------

def _conv_pool_kernel(p_ref, w_ref, b_ref, o_ref):
    """Fused 3x3 valid conv (4 patch-slab matmuls) + bias + ReLU + 2x2 maxpool.

    p_ref: [4, TM, K]  bf16  im2col patches, one slab per 2x2 pool position
    w_ref: [K, Cout]   bf16  flattened filters, feature order (kh, kw, cin)
    b_ref: [1, Cout]   f32
    o_ref: [TM, Cout]  bf16  pooled activations, rows ordered (n, ph, pw)
    """
    w = w_ref[...]
    m = jnp.dot(p_ref[0], w, preferred_element_type=jnp.float32)
    for s in range(1, 4):
        m = jnp.maximum(m, jnp.dot(p_ref[s], w,
                                   preferred_element_type=jnp.float32))
    # max_i relu(conv_i + b) == relu(max_i(conv_i) + b)  (shared bias, ReLU monotone)
    o_ref[...] = jnp.maximum(m + b_ref[...], 0.0).astype(o_ref.dtype)


def _fc_chain_kernel(x_ref, w1_ref, b1_ref, w2_ref, b2_ref, w3_ref, b3_ref,
                     o_ref):
    """fc1+ReLU -> fc2+ReLU -> fc3; intermediates stay on-core (no HBM trips)."""
    h = jnp.dot(x_ref[...], w1_ref[...], preferred_element_type=jnp.float32)
    h = jnp.maximum(h + b1_ref[...], 0.0).astype(jnp.bfloat16)
    h = jnp.dot(h, w2_ref[...], preferred_element_type=jnp.float32)
    h = jnp.maximum(h + b2_ref[...], 0.0).astype(jnp.bfloat16)
    h = jnp.dot(h, w3_ref[...], preferred_element_type=jnp.float32)
    o_ref[...] = h + b3_ref[...]


# ------------------------- Pallas wrappers -------------------------

def _pool_patches(x, hp, wp):
    """x: [N,H,W,C] NHWC -> patches [4, N*hp*wp, 9*C].

    Slab s = 2*a + b holds the im2col patch of conv-output pixel
    (2*ph + a, 2*pw + b); per-patch feature order is (kh, kw, cin), matching
    the prepared weight layout.  (Patch extraction stays in XLA; it is a few
    strided slices of a tiny activation and fuses into one XLA op.)
    """
    n = x.shape[0]
    slabs = []
    for a in range(2):
        for b in range(2):
            taps = [x[:, a + kh: a + kh + 2 * hp: 2,
                        b + kw: b + kw + 2 * wp: 2, :]
                    for kh in range(3) for kw in range(3)]
            t = jnp.stack(taps, axis=3)                  # [N, hp, wp, 9, C]
            slabs.append(t.reshape(n * hp * wp, -1))     # [R, 9*C]
    return jnp.stack(slabs, axis=0)                      # [4, R, 9*C]


def conv3_relu_pool(x, w, b):
    """maxpool2x2(relu(conv3x3_valid(x))) on NHWC input, fused in one kernel.

    x: [N,H,W,Cin] bf16; w: [9*Cin, Cout] bf16; b: [1, Cout] f32.
    Returns [N, (H-2)//2, (W-2)//2, Cout] bf16 (NHWC).
    """
    n, h, wd, _ = x.shape
    hp, wp = (h - 2) // 2, (wd - 2) // 2
    k, cout = w.shape
    patches = _pool_patches(x, hp, wp)                   # [4, R, K]
    rows = n * hp * wp
    tm = rows if rows < 512 else 512                     # tile M when it pays off
    out = pl.pallas_call(
        _conv_pool_kernel,
        out_shape=jax.ShapeDtypeStruct((rows, cout), jnp.bfloat16),
        grid=(pl.cdiv(rows, tm),),
        in_specs=[pl.BlockSpec((4, tm, k), lambda i: (0, i, 0)),
                  pl.BlockSpec((k, cout), lambda i: (0, 0)),
                  pl.BlockSpec((1, cout), lambda i: (0, 0))],
        out_specs=pl.BlockSpec((tm, cout), lambda i: (i, 0)),
        compiler_params=pltpu.CompilerParams(
            dimension_semantics=("parallel",),
            vmem_limit_bytes=_VMEM_LIMIT),
    )(patches, w, b)
    return out.reshape(n, hp, wp, cout)


def fc_chain(x, w1, b1, w2, b2, w3, b3):
    """y = fc3(relu(fc2(relu(fc1(x))))) in a single pallas_call."""
    m, k1 = x.shape
    f1, f2, f3 = w1.shape[1], w2.shape[1], w3.shape[1]
    tm = m if m < 256 else 256
    return pl.pallas_call(
        _fc_chain_kernel,
        out_shape=jax.ShapeDtypeStruct((m, f3), jnp.float32),
        grid=(pl.cdiv(m, tm),),
        in_specs=[pl.BlockSpec((tm, k1), lambda i: (i, 0)),
                  pl.BlockSpec((k1, f1), lambda i: (0, 0)),
                  pl.BlockSpec((1, f1), lambda i: (0, 0)),
                  pl.BlockSpec((f1, f2), lambda i: (0, 0)),
                  pl.BlockSpec((1, f2), lambda i: (0, 0)),
                  pl.BlockSpec((f2, f3), lambda i: (0, 0)),
                  pl.BlockSpec((1, f3), lambda i: (0, 0))],
        out_specs=pl.BlockSpec((tm, f3), lambda i: (i, 0)),
        compiler_params=pltpu.CompilerParams(
            dimension_semantics=("parallel",),
            vmem_limit_bytes=_VMEM_LIMIT),
    )(x, w1, b1, w2, b2, w3, b3)


# ------------------------- parameters -------------------------

def init_lenet_params(key, over_factor=5):
    """torch-layout params, init mimicking torch's U(-1/sqrt(fan_in), ...)."""
    c1, c2 = over_factor * 6, over_factor * 16
    f1, f2 = over_factor * 120, over_factor * 84
    shapes = {
        "conv1_w": (c1, 1, 3, 3), "conv1_b": (c1,),
        "conv2_w": (c2, c1, 3, 3), "conv2_b": (c2,),
        "fc1_w": (f1, c2 * 5 * 5), "fc1_b": (f1,),
        "fc2_w": (f2, f1), "fc2_b": (f2,),
        "fc3_w": (10, f2), "fc3_b": (10,),
    }
    fan_in = {"conv1": 9, "conv2": c1 * 9, "fc1": c2 * 25, "fc2": f1, "fc3": f2}
    params = {}
    keys = jax.random.split(key, len(shapes))
    for k, (name, shp) in zip(keys, sorted(shapes.items())):
        bound = 1.0 / jnp.sqrt(jnp.float32(fan_in[name.split("_")[0]]))
        params[name] = jax.random.uniform(k, shp, jnp.float32,
                                          minval=-bound, maxval=bound)
    return params


def prepare_params(tp):
    """One-time conversion of torch-layout params to kernel-ready layout
    (flattened (kh,kw,cin) conv filters, pre-transposed fc weights, bf16)."""
    def conv_prep(w):                      # [Cout,Cin,3,3] -> [9*Cin, Cout]
        return jnp.transpose(w, (2, 3, 1, 0)).reshape(-1, w.shape[0]) \
                  .astype(jnp.bfloat16)

    c2 = tp["conv2_w"].shape[0]
    spatial = int(round((tp["fc1_w"].shape[1] // c2) ** 0.5))
    # fc1 input features: torch order (C,H,W) -> our NHWC flatten order (H,W,C)
    fc1 = tp["fc1_w"].reshape(-1, c2, spatial, spatial)
    fc1 = jnp.transpose(fc1, (2, 3, 1, 0)).reshape(c2 * spatial * spatial, -1)

    return {
        "conv1_w": conv_prep(tp["conv1_w"]),
        "conv1_b": tp["conv1_b"].reshape(1, -1).astype(jnp.float32),
        "conv2_w": conv_prep(tp["conv2_w"]),
        "conv2_b": tp["conv2_b"].reshape(1, -1).astype(jnp.float32),
        "fc1_w": fc1.astype(jnp.bfloat16),
        "fc1_b": tp["fc1_b"].reshape(1, -1).astype(jnp.float32),
        "fc2_w": tp["fc2_w"].T.astype(jnp.bfloat16),
        "fc2_b": tp["fc2_b"].reshape(1, -1).astype(jnp.float32),
        "fc3_w": tp["fc3_w"].T.astype(jnp.bfloat16),
        "fc3_b": tp["fc3_b"].reshape(1, -1).astype(jnp.float32),
    }


# ------------------------- LeNet forward -------------------------

@jax.jit
def lenet_forward(params, x):
    # x: [N, 1, 28, 28] f32 NCHW (torch convention).
    n = x.shape[0]
    xh = jnp.transpose(x, (0, 2, 3, 1)).astype(jnp.bfloat16)       # NHWC
    a1 = conv3_relu_pool(xh, params["conv1_w"], params["conv1_b"])  # [N,13,13,30]
    a2 = conv3_relu_pool(a1, params["conv2_w"], params["conv2_b"])  # [N,5,5,80]
    flat = a2.reshape(n, -1)                                        # [N, 2000] (H,W,C)
    return fc_chain(flat,
                    params["fc1_w"], params["fc1_b"],
                    params["fc2_w"], params["fc2_b"],
                    params["fc3_w"], params["fc3_b"])               # [N, 10] f32


if __name__ == "__main__":
    key = jax.random.PRNGKey(0)
    pkey, xkey = jax.random.split(key)
    torch_layout_params = init_lenet_params(pkey, over_factor=5)
    params = prepare_params(torch_layout_params)     # one-time, outside jit
    # Batch of 2 MNIST-sized images; 28x28 is implied by fc1 (80*5*5 = 2000).
    x = jax.random.normal(xkey, (2, 1, 28, 28), jnp.float32)
    out = lenet_forward(params, x)
    jax.block_until_ready(out)
    assert out.shape == (2, 10) and out.dtype == jnp.float32
    print("KERNEL_OK")
</pallas_src>

<mosaic_0001>
module attributes {stable_mosaic.version = 11 : i64} {
  func.func @_conv_pool_kernel(%arg0: i32, %arg1: memref<4x338x9xbf16, #tpu.memory_space<vmem>>, %arg2: memref<9x30xbf16, #tpu.memory_space<vmem>>, %arg3: memref<1x30xf32, #tpu.memory_space<vmem>>, %arg4: memref<338x30xbf16, #tpu.memory_space<vmem>>) attributes {dimension_semantics = [#tpu.dimension_semantics<parallel>], iteration_bounds = array<i64: 1>, scalar_prefetch = 0 : i64, scratch_operands = 0 : i64, tpu.core_type = #tpu.core_type<tc>, window_params = [{transform_indices = @transform_0, window_bounds = array<i64: 4, 338, 9>}, {pipeline_mode = #tpu.pipeline_mode<synchronous>, transform_indices = @transform_1, window_bounds = array<i64: 9, 30>}, {pipeline_mode = #tpu.pipeline_mode<synchronous>, transform_indices = @transform_2, window_bounds = array<i64: 1, 30>}, {transform_indices = @transform_3, window_bounds = array<i64: 338, 30>}]} {
    %c0 = arith.constant 0 : index
    %c0_0 = arith.constant 0 : index
    %0 = vector.load %arg2[%c0, %c0_0] : memref<9x30xbf16, #tpu.memory_space<vmem>>, vector<9x30xbf16>
    %c0_1 = arith.constant 0 : index
    %c0_2 = arith.constant 0 : index
    %c0_3 = arith.constant 0 : index
    %1 = vector.load %arg1[%c0_1, %c0_2, %c0_3] : memref<4x338x9xbf16, #tpu.memory_space<vmem>>, vector<1x338x9xbf16>
    %2 = vector.shape_cast %1 : vector<1x338x9xbf16> to vector<338x9xbf16>
    %cst = arith.constant dense<0.000000e+00> : vector<338x30xf32>
    %3 = tpu.matmul %2, %0, %cst {dimension_numbers = #tpu.dot_dimension_numbers<[1], [0], [0], [1], [0, 0, 1, 1], [], []>} : vector<338x9xbf16>, vector<9x30xbf16>, vector<338x30xf32> -> vector<338x30xf32>
    %c1 = arith.constant 1 : index
    %c0_4 = arith.constant 0 : index
    %c0_5 = arith.constant 0 : index
    %4 = vector.load %arg1[%c1, %c0_4, %c0_5] : memref<4x338x9xbf16, #tpu.memory_space<vmem>>, vector<1x338x9xbf16>
    %5 = vector.shape_cast %4 : vector<1x338x9xbf16> to vector<338x9xbf16>
    %cst_6 = arith.constant dense<0.000000e+00> : vector<338x30xf32>
    %6 = tpu.matmul %5, %0, %cst_6 {dimension_numbers = #tpu.dot_dimension_numbers<[1], [0], [0], [1], [0, 0, 1, 1], [], []>} : vector<338x9xbf16>, vector<9x30xbf16>, vector<338x30xf32> -> vector<338x30xf32>
    %7 = arith.maximumf %3, %6 : vector<338x30xf32>
    %c2 = arith.constant 2 : index
    %c0_7 = arith.constant 0 : index
    %c0_8 = arith.constant 0 : index
    %8 = vector.load %arg1[%c2, %c0_7, %c0_8] : memref<4x338x9xbf16, #tpu.memory_space<vmem>>, vector<1x338x9xbf16>
    %9 = vector.shape_cast %8 : vector<1x338x9xbf16> to vector<338x9xbf16>
    %cst_9 = arith.constant dense<0.000000e+00> : vector<338x30xf32>
    %10 = tpu.matmul %9, %0, %cst_9 {dimension_numbers = #tpu.dot_dimension_numbers<[1], [0], [0], [1], [0, 0, 1, 1], [], []>} : vector<338x9xbf16>, vector<9x30xbf16>, vector<338x30xf32> -> vector<338x30xf32>
    %11 = arith.maximumf %7, %10 : vector<338x30xf32>
    %c3 = arith.constant 3 : index
    %c0_10 = arith.constant 0 : index
    %c0_11 = arith.constant 0 : index
    %12 = vector.load %arg1[%c3, %c0_10, %c0_11] : memref<4x338x9xbf16, #tpu.memory_space<vmem>>, vector<1x338x9xbf16>
    %13 = vector.shape_cast %12 : vector<1x338x9xbf16> to vector<338x9xbf16>
    %cst_12 = arith.constant dense<0.000000e+00> : vector<338x30xf32>
    %14 = tpu.matmul %13, %0, %cst_12 {dimension_numbers = #tpu.dot_dimension_numbers<[1], [0], [0], [1], [0, 0, 1, 1], [], []>} : vector<338x9xbf16>, vector<9x30xbf16>, vector<338x30xf32> -> vector<338x30xf32>
    %15 = arith.maximumf %11, %14 : vector<338x30xf32>
    %c0_13 = arith.constant 0 : index
    %c0_14 = arith.constant 0 : index
    %16 = vector.load %arg3[%c0_13, %c0_14] : memref<1x30xf32, #tpu.memory_space<vmem>>, vector<1x30xf32>
    %17 = vector.broadcast %16 : vector<1x30xf32> to vector<338x30xf32>
    %18 = arith.addf %15, %17 : vector<338x30xf32>
    %cst_15 = arith.constant 0.000000e+00 : f32
    %19 = vector.broadcast %cst_15 : f32 to vector<338x30xf32>
    %20 = arith.maximumf %18, %19 : vector<338x30xf32>
    %21 = arith.truncf %20 : vector<338x30xf32> to vector<338x30xbf16>
    %c0_16 = arith.constant 0 : index
    %c0_17 = arith.constant 0 : index
    %22 = vector.load %arg4[%c0_16, %c0_17] : memref<338x30xbf16, #tpu.memory_space<vmem>>, vector<338x30xbf16>
    tpu.vector_store %arg4[%c0_16, %c0_17], %21 {strides = array<i32>} : memref<338x30xbf16, #tpu.memory_space<vmem>>, vector<338x30xbf16>,
    return
  }
  func.func @transform_0(%arg0: i32) -> (i32, i32, i32) {
    %c0_i32 = arith.constant 0 : i32
    %c0_i32_0 = arith.constant 0 : i32
    %c0_i32_1 = arith.constant 0 : i32
    return %c0_i32, %arg0, %c0_i32_0 : i32, i32, i32
  }
  func.func @transform_1(%arg0: i32) -> (i32, i32) {
    %c0_i32 = arith.constant 0 : i32
    %c0_i32_0 = arith.constant 0 : i32
    %c0_i32_1 = arith.constant 0 : i32
    return %c0_i32, %c0_i32_0 : i32, i32
  }
  func.func @transform_2(%arg0: i32) -> (i32, i32) {
    %c0_i32 = arith.constant 0 : i32
    %c0_i32_0 = arith.constant 0 : i32
    %c0_i32_1 = arith.constant 0 : i32
    return %c0_i32, %c0_i32_0 : i32, i32
  }
  func.func @transform_3(%arg0: i32) -> (i32, i32) {
    %c0_i32 = arith.constant 0 : i32
    %c0_i32_0 = arith.constant 0 : i32
    return %arg0, %c0_i32 : i32, i32
  }
}

module attributes {stable_mosaic.version = 11 : i64} {
  func.func @_conv_pool_kernel(%arg0: i32, %arg1: memref<4x50x270xbf16, #tpu.memory_space<vmem>>, %arg2: memref<270x80xbf16, #tpu.memory_space<vmem>>, %arg3: memref<1x80xf32, #tpu.memory_space<vmem>>, %arg4: memref<50x80xbf16, #tpu.memory_space<vmem>>) attributes {dimension_semantics = [#tpu.dimension_semantics<parallel>], iteration_bounds = array<i64: 1>, scalar_prefetch = 0 : i64, scratch_operands = 0 : i64, tpu.core_type = #tpu.core_type<tc>, window_params = [{transform_indices = @transform_0, window_bounds = array<i64: 4, 50, 270>}, {pipeline_mode = #tpu.pipeline_mode<synchronous>, transform_indices = @transform_1, window_bounds = array<i64: 270, 80>}, {pipeline_mode = #tpu.pipeline_mode<synchronous>, transform_indices = @transform_2, window_bounds = array<i64: 1, 80>}, {transform_indices = @transform_3, window_bounds = array<i64: 50, 80>}]} {
    %c0 = arith.constant 0 : index
    %c0_0 = arith.constant 0 : index
    %0 = vector.load %arg2[%c0, %c0_0] : memref<270x80xbf16, #tpu.memory_space<vmem>>, vector<270x80xbf16>
    %c0_1 = arith.constant 0 : index
    %c0_2 = arith.constant 0 : index
    %c0_3 = arith.constant 0 : index
    %1 = vector.load %arg1[%c0_1, %c0_2, %c0_3] : memref<4x50x270xbf16, #tpu.memory_space<vmem>>, vector<1x50x270xbf16>
    %2 = vector.shape_cast %1 : vector<1x50x270xbf16> to vector<50x270xbf16>
    %cst = arith.constant dense<0.000000e+00> : vector<50x80xf32>
    %3 = tpu.matmul %2, %0, %cst {dimension_numbers = #tpu.dot_dimension_numbers<[1], [0], [0], [1], [0, 0, 1, 1], [], []>} : vector<50x270xbf16>, vector<270x80xbf16>, vector<50x80xf32> -> vector<50x80xf32>
    %c1 = arith.constant 1 : index
    %c0_4 = arith.constant 0 : index
    %c0_5 = arith.constant 0 : index
    %4 = vector.load %arg1[%c1, %c0_4, %c0_5] : memref<4x50x270xbf16, #tpu.memory_space<vmem>>, vector<1x50x270xbf16>
    %5 = vector.shape_cast %4 : vector<1x50x270xbf16> to vector<50x270xbf16>
    %cst_6 = arith.constant dense<0.000000e+00> : vector<50x80xf32>
    %6 = tpu.matmul %5, %0, %cst_6 {dimension_numbers = #tpu.dot_dimension_numbers<[1], [0], [0], [1], [0, 0, 1, 1], [], []>} : vector<50x270xbf16>, vector<270x80xbf16>, vector<50x80xf32> -> vector<50x80xf32>
    %7 = arith.maximumf %3, %6 : vector<50x80xf32>
    %c2 = arith.constant 2 : index
    %c0_7 = arith.constant 0 : index
    %c0_8 = arith.constant 0 : index
    %8 = vector.load %arg1[%c2, %c0_7, %c0_8] : memref<4x50x270xbf16, #tpu.memory_space<vmem>>, vector<1x50x270xbf16>
    %9 = vector.shape_cast %8 : vector<1x50x270xbf16> to vector<50x270xbf16>
    %cst_9 = arith.constant dense<0.000000e+00> : vector<50x80xf32>
    %10 = tpu.matmul %9, %0, %cst_9 {dimension_numbers = #tpu.dot_dimension_numbers<[1], [0], [0], [1], [0, 0, 1, 1], [], []>} : vector<50x270xbf16>, vector<270x80xbf16>, vector<50x80xf32> -> vector<50x80xf32>
    %11 = arith.maximumf %7, %10 : vector<50x80xf32>
    %c3 = arith.constant 3 : index
    %c0_10 = arith.constant 0 : index
    %c0_11 = arith.constant 0 : index
    %12 = vector.load %arg1[%c3, %c0_10, %c0_11] : memref<4x50x270xbf16, #tpu.memory_space<vmem>>, vector<1x50x270xbf16>
    %13 = vector.shape_cast %12 : vector<1x50x270xbf16> to vector<50x270xbf16>
    %cst_12 = arith.constant dense<0.000000e+00> : vector<50x80xf32>
    %14 = tpu.matmul %13, %0, %cst_12 {dimension_numbers = #tpu.dot_dimension_numbers<[1], [0], [0], [1], [0, 0, 1, 1], [], []>} : vector<50x270xbf16>, vector<270x80xbf16>, vector<50x80xf32> -> vector<50x80xf32>
    %15 = arith.maximumf %11, %14 : vector<50x80xf32>
    %c0_13 = arith.constant 0 : index
    %c0_14 = arith.constant 0 : index
    %16 = vector.load %arg3[%c0_13, %c0_14] : memref<1x80xf32, #tpu.memory_space<vmem>>, vector<1x80xf32>
    %17 = vector.broadcast %16 : vector<1x80xf32> to vector<50x80xf32>
    %18 = arith.addf %15, %17 : vector<50x80xf32>
    %cst_15 = arith.constant 0.000000e+00 : f32
    %19 = vector.broadcast %cst_15 : f32 to vector<50x80xf32>
    %20 = arith.maximumf %18, %19 : vector<50x80xf32>
    %21 = arith.truncf %20 : vector<50x80xf32> to vector<50x80xbf16>
    %c0_16 = arith.constant 0 : index
    %c0_17 = arith.constant 0 : index
    %22 = vector.load %arg4[%c0_16, %c0_17] : memref<50x80xbf16, #tpu.memory_space<vmem>>, vector<50x80xbf16>
    tpu.vector_store %arg4[%c0_16, %c0_17], %21 {strides = array<i32>} : memref<50x80xbf16, #tpu.memory_space<vmem>>, vector<50x80xbf16>,
    return
  }
  func.func @transform_0(%arg0: i32) -> (i32, i32, i32) {
    %c0_i32 = arith.constant 0 : i32
    %c0_i32_0 = arith.constant 0 : i32
    %c0_i32_1 = arith.constant 0 : i32
    return %c0_i32, %arg0, %c0_i32_0 : i32, i32, i32
  }
  func.func @transform_1(%arg0: i32) -> (i32, i32) {
    %c0_i32 = arith.constant 0 : i32
    %c0_i32_0 = arith.constant 0 : i32
    %c0_i32_1 = arith.constant 0 : i32
    return %c0_i32, %c0_i32_0 : i32, i32
  }
  func.func @transform_2(%arg0: i32) -> (i32, i32) {
    %c0_i32 = arith.constant 0 : i32
    %c0_i32_0 = arith.constant 0 : i32
    %c0_i32_1 = arith.constant 0 : i32
    return %c0_i32, %c0_i32_0 : i32, i32
  }
  func.func @transform_3(%arg0: i32) -> (i32, i32) {
    %c0_i32 = arith.constant 0 : i32
    %c0_i32_0 = arith.constant 0 : i32
    return %arg0, %c0_i32 : i32, i32
  }
}

module attributes {stable_mosaic.version = 11 : i64} {
  func.func @_fc_chain_kernel(%arg0: i32, %arg1: memref<2x2000xbf16, #tpu.memory_space<vmem>>, %arg2: memref<2000x600xbf16, #tpu.memory_space<vmem>>, %arg3: memref<1x600xf32, #tpu.memory_space<vmem>>, %arg4: memref<600x420xbf16, #tpu.memory_space<vmem>>, %arg5: memref<1x420xf32, #tpu.memory_space<vmem>>, %arg6: memref<420x10xbf16, #tpu.memory_space<vmem>>, %arg7: memref<1x10xf32, #tpu.memory_space<vmem>>, %arg8: memref<2x10xf32, #tpu.memory_space<vmem>>) attributes {dimension_semantics = [#tpu.dimension_semantics<parallel>], iteration_bounds = array<i64: 1>, scalar_prefetch = 0 : i64, scratch_operands = 0 : i64, tpu.core_type = #tpu.core_type<tc>, window_params = [{transform_indices = @transform_0, window_bounds = array<i64: 2, 2000>}, {pipeline_mode = #tpu.pipeline_mode<synchronous>, transform_indices = @transform_1, window_bounds = array<i64: 2000, 600>}, {pipeline_mode = #tpu.pipeline_mode<synchronous>, transform_indices = @transform_2, window_bounds = array<i64: 1, 600>}, {pipeline_mode = #tpu.pipeline_mode<synchronous>, transform_indices = @transform_3, window_bounds = array<i64: 600, 420>}, {pipeline_mode = #tpu.pipeline_mode<synchronous>, transform_indices = @transform_4, window_bounds = array<i64: 1, 420>}, {pipeline_mode = #tpu.pipeline_mode<synchronous>, transform_indices = @transform_5, window_bounds = array<i64: 420, 10>}, {pipeline_mode = #tpu.pipeline_mode<synchronous>, transform_indices = @transform_6, window_bounds = array<i64: 1, 10>}, {transform_indices = @transform_7, window_bounds = array<i64: 2, 10>}]} {
    %c0 = arith.constant 0 : index
    %c0_0 = arith.constant 0 : index
    %0 = vector.load %arg1[%c0, %c0_0] : memref<2x2000xbf16, #tpu.memory_space<vmem>>, vector<2x2000xbf16>
    %c0_1 = arith.constant 0 : index
    %c0_2 = arith.constant 0 : index
    %1 = vector.load %arg2[%c0_1, %c0_2] : memref<2000x600xbf16, #tpu.memory_space<vmem>>, vector<2000x600xbf16>
    %cst = arith.constant dense<0.000000e+00> : vector<2x600xf32>
    %2 = tpu.matmul %0, %1, %cst {dimension_numbers = #tpu.dot_dimension_numbers<[1], [0], [0], [1], [0, 0, 1, 1], [], []>} : vector<2x2000xbf16>, vector<2000x600xbf16>, vector<2x600xf32> -> vector<2x600xf32>
    %c0_3 = arith.constant 0 : index
    %c0_4 = arith.constant 0 : index
    %3 = vector.load %arg3[%c0_3, %c0_4] : memref<1x600xf32, #tpu.memory_space<vmem>>, vector<1x600xf32>
    %4 = vector.broadcast %3 : vector<1x600xf32> to vector<2x600xf32>
    %5 = arith.addf %2, %4 : vector<2x600xf32>
    %cst_5 = arith.constant 0.000000e+00 : f32
    %6 = vector.broadcast %cst_5 : f32 to vector<2x600xf32>
    %7 = arith.maximumf %5, %6 : vector<2x600xf32>
    %8 = arith.truncf %7 : vector<2x600xf32> to vector<2x600xbf16>
    %c0_6 = arith.constant 0 : index
    %c0_7 = arith.constant 0 : index
    %9 = vector.load %arg4[%c0_6, %c0_7] : memref<600x420xbf16, #tpu.memory_space<vmem>>, vector<600x420xbf16>
    %cst_8 = arith.constant dense<0.000000e+00> : vector<2x420xf32>
    %10 = tpu.matmul %8, %9, %cst_8 {dimension_numbers = #tpu.dot_dimension_numbers<[1], [0], [0], [1], [0, 0, 1, 1], [], []>} : vector<2x600xbf16>, vector<600x420xbf16>, vector<2x420xf32> -> vector<2x420xf32>
    %c0_9 = arith.constant 0 : index
    %c0_10 = arith.constant 0 : index
    %11 = vector.load %arg5[%c0_9, %c0_10] : memref<1x420xf32, #tpu.memory_space<vmem>>, vector<1x420xf32>
    %12 = vector.broadcast %11 : vector<1x420xf32> to vector<2x420xf32>
    %13 = arith.addf %10, %12 : vector<2x420xf32>
    %cst_11 = arith.constant 0.000000e+00 : f32
    %14 = vector.broadcast %cst_11 : f32 to vector<2x420xf32>
    %15 = arith.maximumf %13, %14 : vector<2x420xf32>
    %16 = arith.truncf %15 : vector<2x420xf32> to vector<2x420xbf16>
    %c0_12 = arith.constant 0 : index
    %c0_13 = arith.constant 0 : index
    %17 = vector.load %arg6[%c0_12, %c0_13] : memref<420x10xbf16, #tpu.memory_space<vmem>>, vector<420x10xbf16>
    %cst_14 = arith.constant dense<0.000000e+00> : vector<2x10xf32>
    %18 = tpu.matmul %16, %17, %cst_14 {dimension_numbers = #tpu.dot_dimension_numbers<[1], [0], [0], [1], [0, 0, 1, 1], [], []>} : vector<2x420xbf16>, vector<420x10xbf16>, vector<2x10xf32> -> vector<2x10xf32>
    %c0_15 = arith.constant 0 : index
    %c0_16 = arith.constant 0 : index
    %19 = vector.load %arg7[%c0_15, %c0_16] : memref<1x10xf32, #tpu.memory_space<vmem>>, vector<1x10xf32>
    %20 = vector.broadcast %19 : vector<1x10xf32> to vector<2x10xf32>
    %21 = arith.addf %18, %20 : vector<2x10xf32>
    %c0_17 = arith.constant 0 : index
    %c0_18 = arith.constant 0 : index
    %22 = vector.load %arg8[%c0_17, %c0_18] : memref<2x10xf32, #tpu.memory_space<vmem>>, vector<2x10xf32>
    tpu.vector_store %arg8[%c0_17, %c0_18], %21 {strides = array<i32>} : memref<2x10xf32, #tpu.memory_space<vmem>>, vector<2x10xf32>,
    return
  }
  func.func @transform_0(%arg0: i32) -> (i32, i32) {
    %c0_i32 = arith.constant 0 : i32
    %c0_i32_0 = arith.constant 0 : i32
    return %arg0, %c0_i32 : i32, i32
  }
  func.func @transform_1(%arg0: i32) -> (i32, i32) {
    %c0_i32 = arith.constant 0 : i32
    %c0_i32_0 = arith.constant 0 : i32
    %c0_i32_1 = arith.constant 0 : i32
    return %c0_i32, %c0_i32_0 : i32, i32
  }
  func.func @transform_2(%arg0: i32) -> (i32, i32) {
    %c0_i32 = arith.constant 0 : i32
    %c0_i32_0 = arith.constant 0 : i32
    %c0_i32_1 = arith.constant 0 : i32
    return %c0_i32, %c0_i32_0 : i32, i32
  }
  func.func @transform_3(%arg0: i32) -> (i32, i32) {
    %c0_i32 = arith.constant 0 : i32
    %c0_i32_0 = arith.constant 0 : i32
    %c0_i32_1 = arith.constant 0 : i32
    return %c0_i32, %c0_i32_0 : i32, i32
  }
  func.func @transform_4(%arg0: i32) -> (i32, i32) {
    %c0_i32 = arith.constant 0 : i32
    %c0_i32_0 = arith.constant 0 : i32
    %c0_i32_1 = arith.constant 0 : i32
    return %c0_i32, %c0_i32_0 : i32, i32
  }
  func.func @transform_5(%arg0: i32) -> (i32, i32) {
    %c0_i32 = arith.constant 0 : i32
    %c0_i32_0 = arith.constant 0 : i32
    %c0_i32_1 = arith.constant 0 : i32
    return %c0_i32, %c0_i32_0 : i32, i32
  }
  func.func @transform_6(%arg0: i32) -> (i32, i32) {
    %c0_i32 = arith.constant 0 : i32
    %c0_i32_0 = arith.constant 0 : i32
    %c0_i32_1 = arith.constant 0 : i32
    return %c0_i32, %c0_i32_0 : i32, i32
  }
  func.func @transform_7(%arg0: i32) -> (i32, i32) {
    %c0_i32 = arith.constant 0 : i32
    %c0_i32_0 = arith.constant 0 : i32
    return %arg0, %c0_i32 : i32, i32
  }
}

</mosaic_0001>

<bundles_post_ra>
// kernel: lenet_forward.3
= control target key start
LH: loop header
LB: loop body
LE: loop exit
PB: predicated region body
PF: predicated region fallthrough
CT: control target
= control target key end

     0   :  { %8 = vsyncpa [#allocation3], 0  ;;  %s4020_s0 = inlined_call_operand.vmem [shape: bf16[4,338,9], index: 0, kind: input, shape index: {}]   ;;  %s4021_s1 = inlined_call_operand.hbm [shape: bf16[9,30], index: 1, kind: input, shape index: {}]   ;;  %s4022_s2 = inlined_call_operand.hbm [shape: f32[1,30], index: 2, kind: input, shape index: {}]   ;;  %s4023_s3 = inlined_call_operand.vmem [shape: bf16[338,30], index: 3, kind: output, shape index: {}]  }
   0x1   :  { %9 = vsyncpa [#allocation5], 0  ;;  %s3016_s12 = smov [#allocation2]   ;;  %s2968_s16 = scalar_lea.hbm %s4021_s1, 128 }
   0x2   :  { %s17_s13 = sshll.u32 %s3016_s12, 4  ;;  %p2969_p0 = scmp.ne.s32.totalorder %s4021_s1, %s2968_s16  ;;  %s18_s13 = int_to_ptr.vmem [resolvable:$true] %s17_s13 }
   0x3   :  { %p2972_p1 = scmp.lt.u32.totalorder %s2968_s16, %s4021_s1 }
   0x5   :  { %p2974_p2 = pnand %p2972_p1, %p2969_p0 }
   0x7   :  { %2977 = shalt.err (!%p2974_p2)
}
   0x8   :  { %s2978_s21 = scalar_lea.vmem %s18_s13, 128  ;;  %p2983_p4 = scmp.lt.s32.totalorder %s18_s13, %s18_s13 }
   0x9   :  { %p2979_p3 = scmp.ne.s32.totalorder %s18_s13, %s2978_s21  ;;  %p2984_p5 = scmp.lt.s32.totalorder %s2978_s21, %s2978_s21 }
   0xb   :  { %p2985_p6 = por %p2984_p5, %p2983_p4 }
   0xd   :  { %p2986_p7 = pnand %p2985_p6, %p2979_p3 }
   0xf   :  { %2989 = shalt.err (!%p2986_p7)
}
  0x10   :  { %s3017_s22 = smov 64   ;;  %s3018_s23 = smov 4  }
  0x11   :  { %23 = dma.hbm_to_vmem [thread:$0]  %s4021_s1, 128, %s18_s13, [#allocation3], %s3017_s22, %s3017_s22, %s3018_s23  }
  0x12   :  { %s3019_s26 = smov [#allocation4]   ;;  %s2990_s30 = scalar_lea.hbm %s4022_s2, 16 }
  0x13   :  { %s30_s27 = sshll.u32 %s3019_s26, 4  ;;  %p2991_p8 = scmp.ne.s32.totalorder %s4022_s2, %s2990_s30  ;;  %s31_s27 = int_to_ptr.vmem [resolvable:$true] %s30_s27 }
  0x14   :  { %p2994_p9 = scmp.lt.u32.totalorder %s2990_s30, %s4022_s2 }
  0x16   :  { %p2996_p10 = pnand %p2994_p9, %p2991_p8 }
  0x18   :  { %2999 = shalt.err (!%p2996_p10)
}
  0x19   :  { %s3000_s8 = scalar_lea.vmem %s31_s27, 16  ;;  %s3004_s1 = scalar_lea.vmem %s31_s27, 32 }
  0x1a   :  { %p3001_p11 = scmp.ne.s32.totalorder %s31_s27, %s3000_s8  ;;  %p3005_p12 = scmp.lt.s32.totalorder %s31_s27, %s31_s27 }
  0x1b   :  { %p3006_p13 = scmp.lt.s32.totalorder %s3004_s1, %s3000_s8 }
  0x1d   :  { %p3007_p0 = por %p3006_p13, %p3005_p12 }
  0x1f   :  { %p3008_p1 = pnand %p3007_p0, %p3001_p11 }
  0x21   :  { %3011 = shalt.err (!%p3008_p1)
}
  0x22   :  { %33 = dma.hbm_to_vmem [thread:$0]  %s4022_s2, 16, %s31_s27, [#allocation5]  }
  0x23   :  { %3012 = dma.done.wait [#allocation3], 128  }
  0x24   :  { %3013 = vsyncadd [#allocation3], 4294967168 }
  0x25   :  { %3014 = dma.done.wait [#allocation5], 16  }
  0x26   :  { %3015 = vsyncadd [#allocation5], 4294967280  ;;  %vm266_vm0 = vcmask 1043456   ;;  %vm267_vm1 = vcmask 1044480   ;;  %v3020_v0 = vmov 65535   ;;  %vm199_vm2 = vcmask 72704  }
  0x27   :  { %v268_v1 = vsel %vm266_vm0, 4294967295, %v3020_v0  ;;  %v2879_v3 = vld [vmem:[#allocation2] sm:$0x1f]   ;;  %v2881_v6 = vld [vmem:[%s4020_s0 + $0xac] sm:$0xff]   ;;  %v2883_v8 = vld [vmem:[%s4020_s0 + $0xb4] sm:$0xff]   ;;  %vm2154_vm3 = vcmask 240640  }
  0x28   :  { %v269_v2 = vsel %vm267_vm1, %v268_v1, 0  ;;  %v2880_v4 = vld [vmem:[%s4020_s0] sm:$0xff]   ;;  %v2882_v7 = vld [vmem:[%s4020_s0 + $0x8] sm:$0xff]   ;;  %v2884_v9 = vld [vmem:[%s4020_s0 + $0x10] sm:$0xff]   ;;  %2738 = vmatprep.mubr.msk.bf16.mxu1 %vm199_vm2, %v2881_v6  ;;  %vm2197_vm4 = vcmask 237568  }
  0x29   :  { %v271_v5 = vand.u32 %v2879_v3, %v269_v2  ;;  %2692 = vmatprep.mubr.msk.bf16.mxu0 %vm199_vm2, %v2880_v4  ;;  %v2885_v10 = vld [vmem:[%s4020_s0 + $0xbc] sm:$0xff]   ;;  %v2887_v12 = vld [vmem:[%s4020_s0 + $0xc4] sm:$0xff]   ;;  %v2889_v14 = vld [vmem:[%s4020_s0 + $0xcc] sm:$0xff]  }
  0x2a   :  { %v2886_v11 = vld [vmem:[%s4020_s0 + $0x18] sm:$0xff]   ;;  %v2888_v13 = vld [vmem:[%s4020_s0 + $0x20] sm:$0xff]   ;;  %v2890_v15 = vld [vmem:[%s4020_s0 + $0x28] sm:$0xff]  }
  0x2b   :  { %2690 = vmatprep.subr.bf16.mxu0 %v271_v5  ;;  %2736 = vmatprep.subr.bf16.mxu1 %v271_v5  ;;  %v2891_v16 = vld [vmem:[%s4020_s0 + $0xd4] sm:$0xff]   ;;  %v2893_v18 = vld [vmem:[%s4020_s0 + $0xdc] sm:$0xff]   ;;  %v2895_v20 = vld [vmem:[%s4020_s0 + $0xe4] sm:$0xff]  }
  0x2c   :  { %2691 = vmatpush3.bf16.msra.mxu0 %v271_v5  ;;  %2737 = vmatpush3.bf16.msra.mxu1 %v271_v5  ;;  %v2892_v17 = vld [vmem:[%s4020_s0 + $0x30] sm:$0xff]   ;;  %v2894_v19 = vld [vmem:[%s4020_s0 + $0x38] sm:$0xff]   ;;  %v2896_v21 = vld [vmem:[%s4020_s0 + $0x40] sm:$0xff]  }
  0x2d   :  { %2782 = vmatprep.subr.bf16.mxu0 %v271_v5  ;;  %2828 = vmatprep.subr.bf16.mxu1 %v271_v5  ;;  %v2897_v22 = vld [vmem:[%s4020_s0 + $0xec] sm:$0xff]   ;;  %v2899_v24 = vld [vmem:[%s4020_s0 + $0xf4] sm:$0xff]   ;;  %v2901_v26 = vld [vmem:[%s4020_s0 + $0xfc] sm:$0xff]  }
  0x2e   :  { %v2898_v23 = vld [vmem:[%s4020_s0 + $0x48] sm:$0xff]   ;;  %v2900_v25 = vld [vmem:[%s4020_s0 + $0x50] sm:$0xff]   ;;  %v2902_v27 = vld [vmem:[%s4020_s0 + $0x58] sm:$0xff]  }
  0x2f   :  { %2693 = vmatmul.mubr.msk.bf16.vlgmr.msra.gmra.mrb[0].mxu0 %vm199_vm2, %v2882_v7  ;;  %2739 = vmatmul.mubr.msk.bf16.vlgmr.msra.gmra.mrb[0].mxu1 %vm199_vm2, %v2883_v8  ;;  %v2903_v28 = vld [vmem:[%s4020_s0 + $0x104] sm:$0xff]   ;;  %v2905_v30 = vld [vmem:[%s4020_s0 + $0x10c] sm:$0xff]   ;;  %v2907_v32 = vld [vmem:[%s4020_s0 + $0x114] sm:$0xff]  }
  0x30   :  { %2783 = vmatpush3.bf16.msra.mxu0 %v271_v5  ;;  %2829 = vmatpush3.bf16.msra.mxu1 %v271_v5  ;;  %v2904_v29 = vld [vmem:[%s4020_s0 + $0x60] sm:$0xff]   ;;  %v2906_v31 = vld [vmem:[%s4020_s0 + $0x68] sm:$0xff]   ;;  %v2908_v33 = vld [vmem:[%s4020_s0 + $0x70] sm:$0xff]  }
  0x31   :  { %2696 = vmatprep.mubr.msk.bf16.mxu0 %vm199_vm2, %v2884_v9  ;;  %2742 = vmatprep.mubr.msk.bf16.mxu1 %vm199_vm2, %v2885_v10  ;;  %v2909_v34 = vld [vmem:[%s4020_s0 + $0x11c] sm:$0xff]   ;;  %v2911_v36 = vld [vmem:[%s4020_s0 + $0x124] sm:$0xff]   ;;  %v2913_v38 = vld [vmem:[%s4020_s0 + $0x12c] sm:$0xff]  }
  0x32   :  { %v2910_v35 = vld [vmem:[%s4020_s0 + $0x78] sm:$0xff]   ;;  %v2912_v37 = vld [vmem:[%s4020_s0 + $0x80] sm:$0xff]   ;;  %v2914_v39 = vld [vmem:[%s4020_s0 + $0x88] sm:$0xff]  }
  0x33   :  { %v2915_v40 = vld [vmem:[%s4020_s0 + $0x134] sm:$0xff]   ;;  %v2917_v42 = vld [vmem:[%s4020_s0 + $0x13c] sm:$0xff]   ;;  %v2919_v44 = vld [vmem:[%s4020_s0 + $0x144] sm:$0xff]  }
  0x34   :  { %v2916_v41 = vld [vmem:[%s4020_s0 + $0x90] sm:$0xff]   ;;  %v2918_v43 = vld [vmem:[%s4020_s0 + $0x98] sm:$0xff]   ;;  %v2920_v45 = vld [vmem:[%s4020_s0 + $0xa0] sm:$0xff]  }
  0x35   :  { %v2921_v46 = vld [vmem:[%s4020_s0 + $0x14c] sm:$0xff]   ;;  %v2922_v47 = vld [vmem:[%s4020_s0 + $0xa8] ss:$0 sps:$4 sm:$0x11]   ;;  %v2924_v49 = vld [vmem:[%s4020_s0 + $0x158] sm:$0xff]  }
  0x36   :  { %v2923_v48 = vld [vmem:[%s4020_s0 + $0x154] ss:$0 sps:$4 sm:$0x11]   ;;  %v2925_v50 = vld [vmem:[%s4020_s0 + $0x204] sm:$0xff]   ;;  %v2927_v52 = vld [vmem:[%s4020_s0 + $0x20c] sm:$0xff]  }
  0x37   :  { %2697 = vmatmul.mubr.msk.bf16.gmra.mrb[4].mxu0 %vm199_vm2, %v2886_v11  ;;  %2743 = vmatmul.mubr.msk.bf16.gmra.mrb[4].mxu1 %vm199_vm2, %v2887_v12  ;;  %v2926_v51 = vld [vmem:[%s4020_s0 + $0x160] sm:$0xff]   ;;  %v2928_v53 = vld [vmem:[%s4020_s0 + $0x168] sm:$0xff]   ;;  %v2929_v54 = vld [vmem:[%s4020_s0 + $0x214] sm:$0xff]  }
  0x38   :  { %2700 = vmatprep.mubr.msk.bf16.mxu0 %vm199_vm2, %v2888_v13  ;;  %2746 = vmatprep.mubr.msk.bf16.mxu1 %vm199_vm2, %v2889_v14  ;;  %v2930_v55 = vld [vmem:[%s4020_s0 + $0x170] sm:$0xff]   ;;  %v2931_v56 = vld [vmem:[%s4020_s0 + $0x21c] sm:$0xff]   ;;  %v2933_v58 = vld [vmem:[%s4020_s0 + $0x224] sm:$0xff]  }
  0x39   :  { %v2932_v57 = vld [vmem:[%s4020_s0 + $0x178] sm:$0xff]   ;;  %v2934_v59 = vld [vmem:[%s4020_s0 + $0x180] sm:$0xff]   ;;  %v2935_v60 = vld [vmem:[%s4020_s0 + $0x22c] sm:$0xff]  }
  0x3a   :  { %v2936_v61 = vld [vmem:[%s4020_s0 + $0x188] sm:$0xff]   ;;  %v2937_v62 = vld [vmem:[%s4020_s0 + $0x234] sm:$0xff]   ;;  %v2939_v0 = vld [vmem:[%s4020_s0 + $0x23c] sm:$0xff]  }
  0x3b   :  { %v2938_v63 = vld [vmem:[%s4020_s0 + $0x190] sm:$0xff]   ;;  %v2940_v1 = vld [vmem:[%s4020_s0 + $0x198] sm:$0xff]   ;;  %v2941_v2 = vld [vmem:[%s4020_s0 + $0x244] sm:$0xff]  }
  0x3c   :  { %v2942_v3 = vld [vmem:[%s4020_s0 + $0x1a0] sm:$0xff]   ;;  %v2943_v4 = vld [vmem:[%s4020_s0 + $0x24c] sm:$0xff]   ;;  %v2945_v6 = vld [vmem:[%s4020_s0 + $0x254] sm:$0xff]  }
  0x3d   :  { %v2944_v5 = vld [vmem:[%s4020_s0 + $0x1a8] sm:$0xff]   ;;  %v2946_v7 = vld [vmem:[%s4020_s0 + $0x1b0] sm:$0xff]   ;;  %v2947_v8 = vld [vmem:[%s4020_s0 + $0x25c] sm:$0xff]  }
  0x3e   :  { %v2948_v9 = vld [vmem:[%s4020_s0 + $0x1b8] sm:$0xff]   ;;  %v2949_v10 = vld [vmem:[%s4020_s0 + $0x264] sm:$0xff]   ;;  %v2951_v12 = vld [vmem:[%s4020_s0 + $0x26c] sm:$0xff]  }
  0x3f   :  { %2701 = vmatmul.mubr.msk.bf16.gmra.mrb[8].mxu0 %vm199_vm2, %v2890_v15  ;;  %2747 = vmatmul.mubr.msk.bf16.gmra.mrb[8].mxu1 %vm199_vm2, %v2891_v16  ;;  %v2950_v11 = vld [vmem:[%s4020_s0 + $0x1c0] sm:$0xff]   ;;  %v2952_v13 = vld [vmem:[%s4020_s0 + $0x1c8] sm:$0xff]   ;;  %v2953_v14 = vld [vmem:[%s4020_s0 + $0x274] sm:$0xff]  }
  0x40   :  { %2704 = vmatprep.mubr.msk.bf16.mxu0 %vm199_vm2, %v2892_v17  ;;  %2750 = vmatprep.mubr.msk.bf16.mxu1 %vm199_vm2, %v2893_v18  ;;  %v2954_v15 = vld [vmem:[%s4020_s0 + $0x1d0] sm:$0xff]   ;;  %v2955_v16 = vld [vmem:[%s4020_s0 + $0x27c] sm:$0xff]   ;;  %v2957_v18 = vld [vmem:[%s4020_s0 + $0x284] sm:$0xff]  }
  0x41   :  { %v2956_v17 = vld [vmem:[%s4020_s0 + $0x1d8] sm:$0xff]  }
  0x47   :  { %2705 = vmatmul.mubr.msk.bf16.gmra.mrb[12].mxu0 %vm199_vm2, %v2894_v19  ;;  %2751 = vmatmul.mubr.msk.bf16.gmra.mrb[12].mxu1 %vm199_vm2, %v2895_v20  ;;  %v2958_v19 = vld [vmem:[%s4020_s0 + $0x1e0] sm:$0xff]   ;;  %v2959_v20 = vld [vmem:[%s4020_s0 + $0x28c] sm:$0xff]  }
  0x48   :  { %2708 = vmatprep.mubr.msk.bf16.mxu0 %vm199_vm2, %v2896_v21  ;;  %2754 = vmatprep.mubr.msk.bf16.mxu1 %vm199_vm2, %v2897_v22  ;;  %v2960_v21 = vld [vmem:[%s4020_s0 + $0x1e8] sm:$0xff]   ;;  %v2961_v22 = vld [vmem:[%s4020_s0 + $0x294] sm:$0xff]  }
  0x4f   :  { %2709 = vmatmul.mubr.msk.bf16.gmra.mrb[16].mxu0 %vm199_vm2, %v2898_v23  ;;  %2755 = vmatmul.mubr.msk.bf16.gmra.mrb[16].mxu1 %vm199_vm2, %v2899_v24  ;;  %v2962_v23 = vld [vmem:[%s4020_s0 + $0x1f0] sm:$0xff]   ;;  %v2963_v24 = vld [vmem:[%s4020_s0 + $0x29c] sm:$0xff]  }
  0x50   :  { %2712 = vmatprep.mubr.msk.bf16.mxu0 %vm199_vm2, %v2900_v25  ;;  %2758 = vmatprep.mubr.msk.bf16.mxu1 %vm199_vm2, %v2901_v26  ;;  %v2964_v25 = vld [vmem:[%s4020_s0 + $0x1f8] sm:$0xff]   ;;  %v2965_v26 = vld [vmem:[%s4020_s0 + $0x2a4] sm:$0xff]  }
  0x57   :  { %2713 = vmatmul.mubr.msk.bf16.gmra.mrb[20].mxu0 %vm199_vm2, %v2902_v27  ;;  %2759 = vmatmul.mubr.msk.bf16.gmra.mrb[20].mxu1 %vm199_vm2, %v2903_v28  ;;  %v2966_v27 = vld [vmem:[%s4020_s0 + $0x200] ss:$0 sps:$4 sm:$0x11]   ;;  %v2967_v28 = vld [vmem:[%s4020_s0 + $0x2ac] ss:$0 sps:$4 sm:$0x11]  }
  0x58   :  { %2716 = vmatprep.mubr.msk.bf16.mxu0 %vm199_vm2, %v2904_v29  ;;  %2762 = vmatprep.mubr.msk.bf16.mxu1 %vm199_vm2, %v2905_v30 }
  0x5f   :  { %2717 = vmatmul.mubr.msk.bf16.gmra.mrb[24].mxu0 %vm199_vm2, %v2906_v31  ;;  %2763 = vmatmul.mubr.msk.bf16.gmra.mrb[24].mxu1 %vm199_vm2, %v2907_v32 }
  0x60   :  { %2720 = vmatprep.mubr.msk.bf16.mxu0 %vm199_vm2, %v2908_v33  ;;  %2766 = vmatprep.mubr.msk.bf16.mxu1 %vm199_vm2, %v2909_v34 }
  0x67   :  { %2721 = vmatmul.mubr.msk.bf16.gmra.mrb[28].mxu0 %vm199_vm2, %v2910_v35  ;;  %2767 = vmatmul.mubr.msk.bf16.gmra.mrb[28].mxu1 %vm199_vm2, %v2911_v36 }
  0x68   :  { %2724 = vmatprep.mubr.msk.bf16.mxu0 %vm199_vm2, %v2912_v37  ;;  %2770 = vmatprep.mubr.msk.bf16.mxu1 %vm199_vm2, %v2913_v38 }
  0x6f   :  { %2725 = vmatmul.mubr.msk.bf16.gmra.mrb[32].mxu0 %vm199_vm2, %v2914_v39  ;;  %2771 = vmatmul.mubr.msk.bf16.gmra.mrb[32].mxu1 %vm199_vm2, %v2915_v40 }
  0x70   :  { %2728 = vmatprep.mubr.msk.bf16.mxu0 %vm199_vm2, %v2916_v41  ;;  %2774 = vmatprep.mubr.msk.bf16.mxu1 %vm199_vm2, %v2917_v42 }
  0x77   :  { %2729 = vmatmul.mubr.msk.bf16.gmra.mrb[36].mxu0 %vm199_vm2, %v2918_v43  ;;  %2775 = vmatmul.mubr.msk.bf16.gmra.mrb[36].mxu1 %vm199_vm2, %v2919_v44 }
  0x78   :  { %2732 = vmatprep.mubr.msk.bf16.mxu0 %vm199_vm2, %v2920_v45  ;;  %2778 = vmatprep.mubr.msk.bf16.mxu1 %vm199_vm2, %v2921_v46 }
  0x7f   :  { %2733 = vmatmul.mubr.msk.bf16.gmra.mrb[40].mxu0 %vm199_vm2, %v2922_v47  ;;  %2779 = vmatmul.mubr.msk.bf16.gmra.mrb[40].mxu1 %vm199_vm2, %v2923_v48 }
  0x80   :  { %2784 = vmatprep.mubr.msk.bf16.mxu0 %vm199_vm2, %v2924_v49  ;;  %2830 = vmatprep.mubr.msk.bf16.mxu1 %vm199_vm2, %v2925_v50 }
  0x87   :  { %2785 = vmatmul.mubr.msk.bf16.vlgmr.msra.gmra.mrb[44].mxu0 %vm199_vm2, %v2926_v51  ;;  %2831 = vmatmul.mubr.msk.bf16.vlgmr.msra.gmra.mrb[44].mxu1 %vm199_vm2, %v2927_v52 }
  0x88   :  { %2788 = vmatprep.mubr.msk.bf16.mxu0 %vm199_vm2, %v2928_v53  ;;  %2834 = vmatprep.mubr.msk.bf16.mxu1 %vm199_vm2, %v2929_v54 }
  0x8f   :  { %2789 = vmatmul.mubr.msk.bf16.gmra.mrb[48].mxu0 %vm199_vm2, %v2930_v55  ;;  %2835 = vmatmul.mubr.msk.bf16.gmra.mrb[48].mxu1 %vm199_vm2, %v2931_v56 }
  0x90   :  { %2792 = vmatprep.mubr.msk.bf16.mxu0 %vm199_vm2, %v2932_v57  ;;  %2838 = vmatprep.mubr.msk.bf16.mxu1 %vm199_vm2, %v2933_v58 }
  0x97   :  { %2793 = vmatmul.mubr.msk.bf16.gmra.mrb[52].mxu0 %vm199_vm2, %v2934_v59  ;;  %2839 = vmatmul.mubr.msk.bf16.gmra.mrb[52].mxu1 %vm199_vm2, %v2935_v60 }
  0x98   :  { %2796 = vmatprep.mubr.msk.bf16.mxu0 %vm199_vm2, %v2936_v61  ;;  %2842 = vmatprep.mubr.msk.bf16.mxu1 %vm199_vm2, %v2937_v62 }
  0x9f   :  { %2797 = vmatmul.mubr.msk.bf16.gmra.mrb[56].mxu0 %vm199_vm2, %v2938_v63  ;;  %2843 = vmatmul.mubr.msk.bf16.gmra.mrb[56].mxu1 %vm199_vm2, %v2939_v0 }
  0xa0   :  { %2800 = vmatprep.mubr.msk.bf16.mxu0 %vm199_vm2, %v2940_v1  ;;  %2846 = vmatprep.mubr.msk.bf16.mxu1 %vm199_vm2, %v2941_v2 }
  0xa7   :  { %2801 = vmatmul.mubr.msk.bf16.gmra.mrb[60].mxu0 %vm199_vm2, %v2942_v3  ;;  %2847 = vmatmul.mubr.msk.bf16.gmra.mrb[60].mxu1 %vm199_vm2, %v2943_v4 }
  0xa8   :  { %2804 = vmatprep.mubr.msk.bf16.mxu0 %vm199_vm2, %v2944_v5  ;;  %2850 = vmatprep.mubr.msk.bf16.mxu1 %vm199_vm2, %v2945_v6 }
  0xaf   :  { %2805 = vmatmul.mubr.msk.bf16.gmra.mrb[64].mxu0 %vm199_vm2, %v2946_v7  ;;  %2851 = vmatmul.mubr.msk.bf16.gmra.mrb[64].mxu1 %vm199_vm2, %v2947_v8 }
  0xb0   :  { %2808 = vmatprep.mubr.msk.bf16.mxu0 %vm199_vm2, %v2948_v9  ;;  %2854 = vmatprep.mubr.msk.bf16.mxu1 %vm199_vm2, %v2949_v10 }
  0xb7   :  { %2809 = vmatmul.mubr.msk.bf16.gmra.mrb[68].mxu0 %vm199_vm2, %v2950_v11  ;;  %2855 = vmatmul.mubr.msk.bf16.gmra.mrb[68].mxu1 %vm199_vm2, %v2951_v12 }
  0xb8   :  { %2812 = vmatprep.mubr.msk.bf16.mxu0 %vm199_vm2, %v2952_v13  ;;  %2858 = vmatprep.mubr.msk.bf16.mxu1 %vm199_vm2, %v2953_v14 }
  0xbf   :  { %2813 = vmatmul.mubr.msk.bf16.gmra.mrb[72].mxu0 %vm199_vm2, %v2954_v15  ;;  %2859 = vmatmul.mubr.msk.bf16.gmra.mrb[72].mxu1 %vm199_vm2, %v2955_v16 }
  0xc0   :  { %2816 = vmatprep.mubr.msk.bf16.mxu0 %vm199_vm2, %v2956_v17  ;;  %2862 = vmatprep.mubr.msk.bf16.mxu1 %vm199_vm2, %v2957_v18 }
  0xc7   :  { %2817 = vmatmul.mubr.msk.bf16.gmra.mrb[76].mxu0 %vm199_vm2, %v2958_v19  ;;  %2863 = vmatmul.mubr.msk.bf16.gmra.mrb[76].mxu1 %vm199_vm2, %v2959_v20 }
  0xc8   :  { %2820 = vmatprep.mubr.msk.bf16.mxu0 %vm199_vm2, %v2960_v21  ;;  %2866 = vmatprep.mubr.msk.bf16.mxu1 %vm199_vm2, %v2961_v22 }
  0xcf   :  { %2821 = vmatmul.mubr.msk.bf16.gmra.mrb[80].mxu0 %vm199_vm2, %v2962_v23  ;;  %2867 = vmatmul.mubr.msk.bf16.gmra.mrb[80].mxu1 %vm199_vm2, %v2963_v24 }
  0xd0   :  { %2824 = vmatprep.mubr.msk.bf16.mxu0 %vm199_vm2, %v2964_v25  ;;  %2870 = vmatprep.mubr.msk.bf16.mxu1 %vm199_vm2, %v2965_v26 }
  0xd7   :  { %2825 = vmatmul.mubr.msk.bf16.gmra.mrb[84].mxu0 %vm199_vm2, %v2966_v27  ;;  %2871 = vmatmul.mubr.msk.bf16.gmra.mrb[84].mxu1 %vm199_vm2, %v2967_v28 }
 0x102   :  { %v3417_v29 = vpop.f32.mrb[0].mxu0  ;;  %v3419_v30 = vpop.f32.mrb[0].mxu1 }
 0x103   :  { %v3423_v32 = vpop.f32.mrb[1].mxu0  ;;  %v3425_v33 = vpop.f32.mrb[1].mxu1  ;;  %v4102_v24 = vmax.f32 %v3417_v29, %v3419_v30 }
 0x104   :  { %v3429_v35 = vpop.f32.mrb[2].mxu0  ;;  %v3431_v36 = vpop.f32.mrb[2].mxu1 }
 0x105   :  { %v3435_v38 = vpop.f32.mrb[3].mxu0  ;;  %v3437_v39 = vpop.f32.mrb[3].mxu1  ;;  %v4104_v21 = vmax.f32 %v3429_v35, %v3431_v36 }
 0x106   :  { %v4105_v29 = vmax.f32 %v3435_v38, %v3437_v39 }
 0x10a   :  { %v3441_v41 = vpop.f32.mrb[4].mxu0  ;;  %v3443_v42 = vpop.f32.mrb[4].mxu1 }
 0x10b   :  { %v3447_v44 = vpop.f32.mrb[5].mxu0  ;;  %v3449_v45 = vpop.f32.mrb[5].mxu1  ;;  %v4106_v38 = vmax.f32 %v3441_v41, %v3443_v42 }
 0x10c   :  { %v3453_v47 = vpop.f32.mrb[6].mxu0  ;;  %v3455_v48 = vpop.f32.mrb[6].mxu1 }
 0x10d   :  { %v3459_v50 = vpop.f32.mrb[7].mxu0  ;;  %v3461_v51 = vpop.f32.mrb[7].mxu1  ;;  %v4108_v41 = vmax.f32 %v3453_v47, %v3455_v48 }
 0x112   :  { %v3465_v53 = vpop.f32.mrb[8].mxu0  ;;  %v3467_v54 = vpop.f32.mrb[8].mxu1 }
 0x113   :  { %v3471_v56 = vpop.f32.mrb[9].mxu0  ;;  %v3473_v57 = vpop.f32.mrb[9].mxu1 }
 0x114   :  { %v3477_v59 = vpop.f32.mrb[10].mxu0  ;;  %v3479_v60 = vpop.f32.mrb[10].mxu1 }
 0x115   :  { %v3483_v62 = vpop.f32.mrb[11].mxu0  ;;  %v3485_v63 = vpop.f32.mrb[11].mxu1 }
 0x11a   :  { %v3489_v1 = vpop.f32.mrb[12].mxu0  ;;  %v3491_v2 = vpop.f32.mrb[12].mxu1 }
 0x11b   :  { %v3495_v4 = vpop.f32.mrb[13].mxu0  ;;  %v3497_v5 = vpop.f32.mrb[13].mxu1 }
 0x11c   :  { %v3501_v7 = vpop.f32.mrb[14].mxu0  ;;  %v3503_v8 = vpop.f32.mrb[14].mxu1 }
 0x11d   :  { %v3507_v10 = vpop.f32.mrb[15].mxu0  ;;  %v3509_v11 = vpop.f32.mrb[15].mxu1 }
 0x122   :  { %v3513_v13 = vpop.f32.mrb[16].mxu0  ;;  %v3515_v14 = vpop.f32.mrb[16].mxu1 }
 0x123   :  { %v3519_v16 = vpop.f32.mrb[17].mxu0  ;;  %v3521_v17 = vpop.f32.mrb[17].mxu1 }
 0x124   :  { %v3525_v19 = vpop.f32.mrb[18].mxu0  ;;  %v3527_v20 = vpop.f32.mrb[18].mxu1 }
 0x125   :  { %v3531_v22 = vpop.f32.mrb[19].mxu0  ;;  %v3533_v23 = vpop.f32.mrb[19].mxu1 }
 0x12a   :  { %v3537_v25 = vpop.f32.mrb[20].mxu0  ;;  %v3539_v26 = vpop.f32.mrb[20].mxu1 }
 0x12b   :  { %v3543_v28 = vpop.f32.mrb[21].mxu0  ;;  %v3545_v18 = vpop.f32.mrb[21].mxu1 }
 0x12c   :  { %v3549_v15 = vpop.f32.mrb[22].mxu0  ;;  %v3551_v12 = vpop.f32.mrb[22].mxu1 }
 0x12d   :  { %v3555_v9 = vpop.f32.mrb[23].mxu0  ;;  %v3557_v6 = vpop.f32.mrb[23].mxu1 }
 0x12e   :  { %4063 = vst [vmem:[#allocation8_spill] sm:$0xff] %v3557_v6 }
 0x132   :  { %v3561_v3 = vpop.f32.mrb[24].mxu0  ;;  %v3563_v0 = vpop.f32.mrb[24].mxu1 }
 0x133   :  { %4064 = vst [vmem:[#allocation9_spill] sm:$0xff] %v3561_v3  ;;  %4065 = vst [vmem:[#allocation10_spill] sm:$0xff] %v3563_v0  ;;  %v3567_v61 = vpop.f32.mrb[25].mxu0  ;;  %v3569_v58 = vpop.f32.mrb[25].mxu1  ;;  %v3678_v0 = vld [vmem:[#allocation4] ss:$0 sm:$0xff] }
 0x134   :  { %4066 = vst [vmem:[#allocation11_spill] sm:$0xff] %v3567_v61  ;;  %4067 = vst [vmem:[#allocation12_spill] sm:$0xff] %v3569_v58  ;;  %v3573_v55 = vpop.f32.mrb[26].mxu0  ;;  %v3575_v52 = vpop.f32.mrb[26].mxu1 }
 0x135   :  { %4068 = vst [vmem:[#allocation13_spill] sm:$0xff] %v3573_v55  ;;  %4069 = vst [vmem:[#allocation14_spill] sm:$0xff] %v3575_v52  ;;  %v3579_v49 = vpop.f32.mrb[27].mxu0  ;;  %v3581_v46 = vpop.f32.mrb[27].mxu1 }
 0x136   :  { %4070 = vst [vmem:[#allocation15_spill] sm:$0xff] %v3579_v49  ;;  %4071 = vst [vmem:[#allocation16_spill] sm:$0xff] %v3581_v46 }
 0x13a   :  { %v3585_v43 = vpop.f32.mrb[28].mxu0  ;;  %v3587_v40 = vpop.f32.mrb[28].mxu1 }
 0x13b   :  { %4072 = vst [vmem:[#allocation17_spill] sm:$0xff] %v3585_v43  ;;  %4073 = vst [vmem:[#allocation18_spill] sm:$0xff] %v3587_v40  ;;  %v3591_v37 = vpop.f32.mrb[29].mxu0  ;;  %v3593_v34 = vpop.f32.mrb[29].mxu1 }
 0x13c   :  { %4074 = vst [vmem:[#allocation19_spill] sm:$0xff] %v3591_v37  ;;  %4075 = vst [vmem:[#allocation20_spill] sm:$0xff] %v3593_v34  ;;  %v3597_v31 = vpop.f32.mrb[30].mxu0  ;;  %v3599_v52 = vpop.f32.mrb[30].mxu1 }
 0x13d   :  { %4076 = vst [vmem:[#allocation21_spill] sm:$0xff] %v3597_v31  ;;  %4077 = vst [vmem:[#allocation22_spill] sm:$0xff] %v3599_v52  ;;  %v3603_v46 = vpop.f32.mrb[31].mxu0  ;;  %v3605_v49 = vpop.f32.mrb[31].mxu1 }
 0x13e   :  { %4078 = vst [vmem:[#allocation23_spill] sm:$0xff] %v3603_v46  ;;  %4079 = vst [vmem:[#allocation24_spill] sm:$0xff] %v3605_v49 }
 0x142   :  { %v3609_v40 = vpop.f32.mrb[32].mxu0  ;;  %v3611_v43 = vpop.f32.mrb[32].mxu1 }
 0x143   :  { %4080 = vst [vmem:[#allocation25_spill] sm:$0xff] %v3609_v40  ;;  %4081 = vst [vmem:[#allocation26_spill] sm:$0xff] %v3611_v43  ;;  %v3615_v34 = vpop.f32.mrb[33].mxu0  ;;  %v3617_v37 = vpop.f32.mrb[33].mxu1 }
 0x144   :  { %4082 = vst [vmem:[#allocation27_spill] sm:$0xff] %v3615_v34  ;;  %4083 = vst [vmem:[#allocation28_spill] sm:$0xff] %v3617_v37  ;;  %v3621_v52 = vpop.f32.mrb[34].mxu0  ;;  %v3623_v31 = vpop.f32.mrb[34].mxu1 }
 0x145   :  { %4084 = vst [vmem:[#allocation29_spill] sm:$0xff] %v3621_v52  ;;  %4085 = vst [vmem:[#allocation30_spill] sm:$0xff] %v3623_v31  ;;  %v3627_v49 = vpop.f32.mrb[35].mxu0  ;;  %v3629_v46 = vpop.f32.mrb[35].mxu1 }
 0x146   :  { %4086 = vst [vmem:[#allocation31_spill] sm:$0xff] %v3627_v49  ;;  %4087 = vst [vmem:[#allocation32_spill] sm:$0xff] %v3629_v46 }
 0x14a   :  { %v3633_v43 = vpop.f32.mrb[36].mxu0  ;;  %v3635_v40 = vpop.f32.mrb[36].mxu1 }
 0x14b   :  { %4088 = vst [vmem:[#allocation33_spill] sm:$0xff] %v3633_v43  ;;  %4089 = vst [vmem:[#allocation34_spill] sm:$0xff] %v3635_v40  ;;  %v3639_v37 = vpop.f32.mrb[37].mxu0  ;;  %v3641_v34 = vpop.f32.mrb[37].mxu1 }
 0x14c   :  { %4090 = vst [vmem:[#allocation35_spill] sm:$0xff] %v3639_v37  ;;  %4091 = vst [vmem:[#allocation36_spill] sm:$0xff] %v3641_v34  ;;  %v3645_v31 = vpop.f32.mrb[38].mxu0  ;;  %v3647_v52 = vpop.f32.mrb[38].mxu1 }
 0x14d   :  { %4092 = vst [vmem:[#allocation37_spill] sm:$0xff] %v3645_v31  ;;  %4093 = vst [vmem:[#allocation38_spill] sm:$0xff] %v3647_v52  ;;  %v3651_v46 = vpop.f32.mrb[39].mxu0  ;;  %v3653_v49 = vpop.f32.mrb[39].mxu1 }
 0x14e   :  { %4094 = vst [vmem:[#allocation39_spill] sm:$0xff] %v3651_v46  ;;  %4095 = vst [vmem:[#allocation40_spill] sm:$0xff] %v3653_v49 }
 0x152   :  { %v3657_v40 = vpop.f32.mrb[40].mxu0  ;;  %v3659_v43 = vpop.f32.mrb[40].mxu1 }
 0x153   :  { %4096 = vst [vmem:[#allocation41_spill] sm:$0xff] %v3657_v40  ;;  %4097 = vst [vmem:[#allocation42_spill] sm:$0xff] %v3659_v43  ;;  %v3663_v34 = vpop.f32.mrb[41].mxu0  ;;  %v3665_v37 = vpop.f32.mrb[41].mxu1 }
 0x154   :  { %4098 = vst [vmem:[#allocation43_spill] sm:$0xff] %v3663_v34  ;;  %4099 = vst [vmem:[#allocation44_spill] sm:$0xff] %v3665_v37  ;;  %v2735_v52 = vpop.f32.mrb[42].mxu0  ;;  %v2781_v31 = vpop.f32.mrb[42].mxu1 }
 0x155   :  { %v3669_v55 = vpop.f32.mrb[43].mxu0  ;;  %v3671_v58 = vpop.f32.mrb[43].mxu1  ;;  %v4103_v31 = vmax.f32 %v3423_v32, %v3425_v33 }
 0x156   :  { %4100 = vst [vmem:[#allocation45_spill] sm:$0xff] %v3669_v55  ;;  %4101 = vst [vmem:[#allocation46_spill] sm:$0xff] %v3671_v58 }
 0x15a   :  { %v2786_v49 = vpop.f32.mrb[44].mxu0  ;;  %v2832_v46 = vpop.f32.mrb[44].mxu1 }
 0x15b   :  { %v1378_v43 = vmax.f32 %v4102_v24, %v2786_v49  ;;  %v1202_v40 = vpop.f32.mrb[45].mxu0  ;;  %v1671_v61 = vpop.f32.mrb[45].mxu1 }
 0x15c   :  { %v1376_v52 = vmax.f32 %v4103_v31, %v1202_v40  ;;  %v2787_v27 = vpop.f32.mrb[46].mxu0  ;;  %v2833_v37 = vpop.f32.mrb[46].mxu1 }
 0x15d   :  { %v1847_v34 = vmax.f32 %v1378_v43, %v2832_v46  ;;  %v1379_v58 = vmax.f32 %v4104_v21, %v2787_v27  ;;  %v1205_v55 = vpop.f32.mrb[47].mxu0  ;;  %v1674_v3 = vpop.f32.mrb[47].mxu1 }
 0x15e   :  { %v1845_v6 = vmax.f32 %v1376_v52, %v1671_v61  ;;  %v1377_v30 = vmax.f32 %v4105_v29, %v1205_v55 }
 0x15f   :  { %v1897_v49 = vadd.f32 %v3678_v0, %v1847_v34  ;;  %v1848_v24 = vmax.f32 %v1379_v58, %v2833_v37 }
 0x160   :  { %v1895_v32 = vadd.f32 %v3678_v0, %v1845_v6  ;;  %v1846_v33 = vmax.f32 %v1377_v30, %v1674_v3  ;;  %v4107_v3 = vmax.f32 %v3447_v44, %v3449_v45 }
 0x161   :  { %v1940_v40 = vmax.f32 %v1897_v49, 0.0  ;;  %v1898_v43 = vadd.f32 %v3678_v0, %v1848_v24 }
 0x162   :  { %v1938_v46 = vmax.f32 %v1895_v32, 0.0  ;;  %v1896_v35 = vadd.f32 %v3678_v0, %v1846_v33  ;;  %v2790_v36 = vpop.f32.mrb[48].mxu0  ;;  %v2836_v21 = vpop.f32.mrb[48].mxu1  ;;  %v4109_v32 = vmax.f32 %v3459_v50, %v3461_v51 }
 0x163   :  { %v2557_v61 = vpack.c.bf16 %v1940_v40, %v1940_v40  ;;  %v1941_v27 = vmax.f32 %v1898_v43, 0.0  ;;  %v1382_v39 = vmax.f32 %v4106_v38, %v2790_v36  ;;  %v1218_v34 = vpop.f32.mrb[49].mxu0  ;;  %v1687_v37 = vpop.f32.mrb[49].mxu1  ;;  %v4110_v38 = vmax.f32 %v3465_v53, %v3467_v54 }
 0x164   :  { %v2555_v55 = vpack.c.bf16 %v1938_v46, %v1938_v46  ;;  %v1939_v58 = vmax.f32 %v1896_v35, 0.0  ;;  %v1380_v6 = vmax.f32 %v4107_v3, %v1218_v34  ;;  %v2791_v31 = vpop.f32.mrb[50].mxu0  ;;  %v2837_v52 = vpop.f32.mrb[50].mxu1  ;;  %v4111_v3 = vmax.f32 %v3471_v56, %v3473_v57 }
 0x165   :  { %2157 = vst.msk [vmem:[%s4023_s3 + $0x8] sm:$0xf] %vm2154_vm3, %v2557_v61  ;;  %v2558_v29 = vpack.c.bf16 %v1941_v27, %v1941_v27  ;;  %v1851_v30 = vmax.f32 %v1382_v39, %v2836_v21  ;;  %v1383_v42 = vmax.f32 %v4108_v41, %v2791_v31  ;;  %v1221_v49 = vpop.f32.mrb[51].mxu0  ;;  %v1690_v24 = vpop.f32.mrb[51].mxu1  ;;  %v4112_v53 = vmax.f32 %v3477_v59, %v3479_v60 }
 0x166   :  { %2155 = vst.msk [vmem:[%s4023_s3] sm:$0xf] %vm2154_vm3, %v2555_v55  ;;  %v2556_v44 = vpack.c.bf16 %v1939_v58, %v1939_v58  ;;  %v1849_v45 = vmax.f32 %v1380_v6, %v1687_v37  ;;  %v1381_v33 = vmax.f32 %v4109_v32, %v1221_v49  ;;  %v4113_v49 = vmax.f32 %v3483_v62, %v3485_v63 }
 0x167   :  { %2158 = vst.msk [vmem:[%s4023_s3 + $0xc] sm:$0xf] %vm2154_vm3, %v2558_v29  ;;  %v1901_v47 = vadd.f32 %v3678_v0, %v1851_v30  ;;  %v1852_v48 = vmax.f32 %v1383_v42, %v2837_v52 }
 0x168   :  { %2156 = vst.msk [vmem:[%s4023_s3 + $0x4] sm:$0xf] %vm2154_vm3, %v2556_v44  ;;  %v1899_v40 = vadd.f32 %v3678_v0, %v1849_v45  ;;  %v1850_v43 = vmax.f32 %v1381_v33, %v1690_v24 }
 0x169   :  { %v1944_v46 = vmax.f32 %v1901_v47, 0.0  ;;  %v1902_v50 = vadd.f32 %v3678_v0, %v1852_v48 }
 0x16a   :  { %v1942_v51 = vmax.f32 %v1899_v40, 0.0  ;;  %v1900_v35 = vadd.f32 %v3678_v0, %v1850_v43  ;;  %v2794_v36 = vpop.f32.mrb[52].mxu0  ;;  %v2840_v21 = vpop.f32.mrb[52].mxu1 }
 0x16b   :  { %v2561_v61 = vpack.c.bf16 %v1944_v46, %v1944_v46  ;;  %v1945_v27 = vmax.f32 %v1902_v50, 0.0  ;;  %v1386_v39 = vmax.f32 %v4110_v38, %v2794_v36  ;;  %v1234_v34 = vpop.f32.mrb[53].mxu0  ;;  %v1703_v37 = vpop.f32.mrb[53].mxu1  ;;  %v4114_v46 = vmax.f32 %v3489_v1, %v3491_v2 }
 0x16c   :  { %v2559_v55 = vpack.c.bf16 %v1942_v51, %v1942_v51  ;;  %v1943_v58 = vmax.f32 %v1900_v35, 0.0  ;;  %v1384_v6 = vmax.f32 %v4111_v3, %v1234_v34  ;;  %v2795_v31 = vpop.f32.mrb[54].mxu0  ;;  %v2841_v52 = vpop.f32.mrb[54].mxu1  ;;  %v4116_v1 = vmax.f32 %v3501_v7, %v3503_v8 }
 0x16d   :  { %2161 = vst.msk [vmem:[%s4023_s3 + $0x18] sm:$0xf] %vm2154_vm3, %v2561_v61  ;;  %v2562_v29 = vpack.c.bf16 %v1945_v27, %v1945_v27  ;;  %v1855_v30 = vmax.f32 %v1386_v39, %v2840_v21  ;;  %v1387_v54 = vmax.f32 %v4112_v53, %v2795_v31  ;;  %v1237_v41 = vpop.f32.mrb[55].mxu0  ;;  %v1706_v42 = vpop.f32.mrb[55].mxu1  ;;  %v4115_v61 = vmax.f32 %v3495_v4, %v3497_v5 }
 0x16e   :  { %2159 = vst.msk [vmem:[%s4023_s3 + $0x10] sm:$0xf] %vm2154_vm3, %v2559_v55  ;;  %v2560_v56 = vpack.c.bf16 %v1943_v58, %v1943_v58  ;;  %v1853_v57 = vmax.f32 %v1384_v6, %v1703_v37  ;;  %v1385_v24 = vmax.f32 %v4113_v49, %v1237_v41  ;;  %v4117_v3 = vmax.f32 %v3507_v10, %v3509_v11 }
 0x16f   :  { %2162 = vst.msk [vmem:[%s4023_s3 + $0x1c] sm:$0xf] %vm2154_vm3, %v2562_v29  ;;  %v1905_v59 = vadd.f32 %v3678_v0, %v1855_v30  ;;  %v1856_v60 = vmax.f32 %v1387_v54, %v2841_v52 }
 0x170   :  { %2160 = vst.msk [vmem:[%s4023_s3 + $0x14] sm:$0xf] %vm2154_vm3, %v2560_v56  ;;  %v1903_v44 = vadd.f32 %v3678_v0, %v1853_v57  ;;  %v1854_v45 = vmax.f32 %v1385_v24, %v1706_v42  ;;  %v4118_v56 = vmax.f32 %v3513_v13, %v3515_v14  ;;  %v4120_v13 = vmax.f32 %v3525_v19, %v3527_v20 }
 0x171   :  { %v1948_v32 = vmax.f32 %v1905_v59, 0.0  ;;  %v1906_v62 = vadd.f32 %v3678_v0, %v1856_v60 }
 0x172   :  { %v1946_v63 = vmax.f32 %v1903_v44, 0.0  ;;  %v1904_v33 = vadd.f32 %v3678_v0, %v1854_v45  ;;  %v2798_v47 = vpop.f32.mrb[56].mxu0  ;;  %v2844_v48 = vpop.f32.mrb[56].mxu1  ;;  %v4119_v44 = vmax.f32 %v3519_v16, %v3521_v17 }
 0x173   :  { %v2565_v40 = vpack.c.bf16 %v1948_v32, %v1948_v32  ;;  %v1949_v43 = vmax.f32 %v1906_v62, 0.0  ;;  %v1390_v50 = vmax.f32 %v4114_v46, %v2798_v47  ;;  %v1250_v51 = vpop.f32.mrb[57].mxu0  ;;  %v1719_v35 = vpop.f32.mrb[57].mxu1 }
 0x174   :  { %v2563_v36 = vpack.c.bf16 %v1946_v63, %v1946_v63  ;;  %v1947_v21 = vmax.f32 %v1904_v33, 0.0  ;;  %v1388_v27 = vmax.f32 %v4115_v61, %v1250_v51  ;;  %v2799_v38 = vpop.f32.mrb[58].mxu0  ;;  %v2845_v39 = vpop.f32.mrb[58].mxu1 }
 0x175   :  { %2165 = vst.msk [vmem:[%s4023_s3 + $0x28] sm:$0xf] %vm2154_vm3, %v2565_v40  ;;  %v2566_v34 = vpack.c.bf16 %v1949_v43, %v1949_v43  ;;  %v1859_v37 = vmax.f32 %v1390_v50, %v2844_v48  ;;  %v1391_v2 = vmax.f32 %v4116_v1, %v2799_v38  ;;  %v1253_v55 = vpop.f32.mrb[59].mxu0  ;;  %v1722_v58 = vpop.f32.mrb[59].mxu1  ;;  %v4121_v40 = vmax.f32 %v3531_v22, %v3533_v23 }
 0x176   :  { %2163 = vst.msk [vmem:[%s4023_s3 + $0x20] sm:$0xf] %vm2154_vm3, %v2563_v36  ;;  %v2564_v4 = vpack.c.bf16 %v1947_v21, %v1947_v21  ;;  %v1857_v5 = vmax.f32 %v1388_v27, %v1719_v35  ;;  %v1389_v6 = vmax.f32 %v4117_v3, %v1253_v55  ;;  %v4122_v38 = vmax.f32 %v3537_v25, %v3539_v26 }
 0x177   :  { %2166 = vst.msk [vmem:[%s4023_s3 + $0x2c] sm:$0xf] %vm2154_vm3, %v2566_v34  ;;  %v1909_v7 = vadd.f32 %v3678_v0, %v1859_v37  ;;  %v1860_v8 = vmax.f32 %v1391_v2, %v2845_v39  ;;  %v4123_v55 = vmax.f32 %v3543_v28, %v3545_v18  ;;  %v4124_v25 = vmax.f32 %v3549_v15, %v3551_v12 }
 0x178   :  { %2164 = vst.msk [vmem:[%s4023_s3 + $0x24] sm:$0xf] %vm2154_vm3, %v2564_v4  ;;  %v1907_v31 = vadd.f32 %v3678_v0, %v1857_v5  ;;  %v1858_v52 = vmax.f32 %v1389_v6, %v1722_v58 }
 0x179   :  { %v1952_v29 = vmax.f32 %v1909_v7, 0.0  ;;  %v1910_v10 = vadd.f32 %v3678_v0, %v1860_v8 }
 0x17a   :  { %v1950_v11 = vmax.f32 %v1907_v31, 0.0  ;;  %v1908_v30 = vadd.f32 %v3678_v0, %v1858_v52  ;;  %v2802_v53 = vpop.f32.mrb[60].mxu0  ;;  %v2848_v54 = vpop.f32.mrb[60].mxu1  ;;  %v4125_v31 = vld [vmem:[#allocation8_spill] sm:$0xff] }
 0x17b   :  { %v2569_v41 = vpack.c.bf16 %v1952_v29, %v1952_v29  ;;  %v1953_v42 = vmax.f32 %v1910_v10, 0.0  ;;  %v1394_v57 = vmax.f32 %v4118_v56, %v2802_v53  ;;  %v1266_v49 = vpop.f32.mrb[61].mxu0  ;;  %v1735_v24 = vpop.f32.mrb[61].mxu1  ;;  %v4126_v52 = vmax.f32 %v3555_v9, %v4125_v31  ;;  %v4142_v31 = vld [vmem:[#allocation19_spill] sm:$0xff] }
 0x17c   :  { %v2567_v59 = vpack.c.bf16 %v1950_v11, %v1950_v11  ;;  %v1951_v60 = vmax.f32 %v1908_v30, 0.0  ;;  %v1392_v45 = vmax.f32 %v4119_v44, %v1266_v49  ;;  %v2803_v32 = vpop.f32.mrb[62].mxu0  ;;  %v2849_v62 = vpop.f32.mrb[62].mxu1  ;;  %v4127_v49 = vld [vmem:[#allocation9_spill] sm:$0xff] }
 0x17d   :  { %2169 = vst.msk [vmem:[%s4023_s3 + $0x38] sm:$0xf] %vm2154_vm3, %v2569_v41  ;;  %v2570_v63 = vpack.c.bf16 %v1953_v42, %v1953_v42  ;;  %v1863_v33 = vmax.f32 %v1394_v57, %v2848_v54  ;;  %v1395_v14 = vmax.f32 %v4120_v13, %v2803_v32  ;;  %v1269_v47 = vpop.f32.mrb[63].mxu0  ;;  %v1738_v48 = vpop.f32.mrb[63].mxu1 }
 0x17e   :  { %2167 = vst.msk [vmem:[%s4023_s3 + $0x30] sm:$0xf] %vm2154_vm3, %v2567_v59  ;;  %v2568_v16 = vpack.c.bf16 %v1951_v60, %v1951_v60  ;;  %v1861_v17 = vmax.f32 %v1392_v45, %v1735_v24  ;;  %v1393_v43 = vmax.f32 %v4121_v40, %v1269_v47  ;;  %v4128_v24 = vld [vmem:[#allocation10_spill] sm:$0xff]  ;;  %v4133_v40 = vld [vmem:[#allocation13_spill] sm:$0xff] }
 0x17f   :  { %2170 = vst.msk [vmem:[%s4023_s3 + $0x3c] sm:$0xf] %vm2154_vm3, %v2570_v63  ;;  %v1913_v19 = vadd.f32 %v3678_v0, %v1863_v33  ;;  %v1864_v20 = vmax.f32 %v1395_v14, %v2849_v62  ;;  %v4129_v59 = vmax.f32 %v4127_v49, %v4128_v24  ;;  %v4130_v63 = vld [vmem:[#allocation11_spill] sm:$0xff]  ;;  %v4131_v33 = vld [vmem:[#allocation12_spill] sm:$0xff] }
 0x180   :  { %2168 = vst.msk [vmem:[%s4023_s3 + $0x34] sm:$0xf] %vm2154_vm3, %v2568_v16  ;;  %v1911_v46 = vadd.f32 %v3678_v0, %v1861_v17  ;;  %v1862_v50 = vmax.f32 %v1393_v43, %v1738_v48  ;;  %v4132_v13 = vmax.f32 %v4130_v63, %v4131_v33  ;;  %v4134_v43 = vld [vmem:[#allocation14_spill] sm:$0xff]  ;;  %v4148_v24 = vld [vmem:[#allocation23_spill] sm:$0xff] }
 0x181   :  { %v1956_v51 = vmax.f32 %v1913_v19, 0.0  ;;  %v1914_v22 = vadd.f32 %v3678_v0, %v1864_v20  ;;  %v4135_v19 = vmax.f32 %v4133_v40, %v4134_v43  ;;  %v4151_v43 = vld [vmem:[#allocation25_spill] sm:$0xff] }
 0x182   :  { %v1954_v23 = vmax.f32 %v1911_v46, 0.0  ;;  %v1912_v35 = vadd.f32 %v3678_v0, %v1862_v50  ;;  %v2806_v36 = vpop.f32.mrb[64].mxu0  ;;  %v2852_v21 = vpop.f32.mrb[64].mxu1 }
 0x183   :  { %v2573_v61 = vpack.c.bf16 %v1956_v51, %v1956_v51  ;;  %v1957_v27 = vmax.f32 %v1914_v22, 0.0  ;;  %v1398_v39 = vmax.f32 %v4122_v38, %v2806_v36  ;;  %v1282_v34 = vpop.f32.mrb[65].mxu0  ;;  %v1751_v37 = vpop.f32.mrb[65].mxu1 }
 0x184   :  { %v2571_v1 = vpack.c.bf16 %v1954_v23, %v1954_v23  ;;  %v1955_v2 = vmax.f32 %v1912_v35, 0.0  ;;  %v1396_v58 = vmax.f32 %v4123_v55, %v1282_v34  ;;  %v2807_v4 = vpop.f32.mrb[66].mxu0  ;;  %v2853_v5 = vpop.f32.mrb[66].mxu1  ;;  %v4136_v23 = vld [vmem:[#allocation15_spill] sm:$0xff]  ;;  %v4137_v35 = vld [vmem:[#allocation16_spill] sm:$0xff] }
 0x185   :  { %2173 = vst.msk [vmem:[%s4023_s3 + $0x48] sm:$0xf] %vm2154_vm3, %v2573_v61  ;;  %v2574_v3 = vpack.c.bf16 %v1957_v27, %v1957_v27  ;;  %v1867_v6 = vmax.f32 %v1398_v39, %v2852_v21  ;;  %v1399_v26 = vmax.f32 %v4124_v25, %v2807_v4  ;;  %v1285_v7 = vpop.f32.mrb[67].mxu0  ;;  %v1754_v8 = vpop.f32.mrb[67].mxu1  ;;  %v4138_v36 = vmax.f32 %v4136_v23, %v4137_v35  ;;  %v4154_v35 = vld [vmem:[#allocation27_spill] sm:$0xff] }
 0x186   :  { %2171 = vst.msk [vmem:[%s4023_s3 + $0x40] sm:$0xf] %vm2154_vm3, %v2571_v1  ;;  %v2572_v18 = vpack.c.bf16 %v1955_v2, %v1955_v2  ;;  %v1865_v28 = vmax.f32 %v1396_v58, %v1751_v37  ;;  %v1397_v29 = vmax.f32 %v4126_v52, %v1285_v7  ;;  %v4143_v52 = vld [vmem:[#allocation20_spill] sm:$0xff] }
 0x187   :  { %2174 = vst.msk [vmem:[%s4023_s3 + $0x4c] sm:$0xf] %vm2154_vm3, %v2574_v3  ;;  %v1917_v12 = vadd.f32 %v3678_v0, %v1867_v6  ;;  %v1868_v15 = vmax.f32 %v1399_v26, %v2853_v5  ;;  %v4139_v3 = vld [vmem:[#allocation17_spill] sm:$0xff]  ;;  %v4140_v6 = vld [vmem:[#allocation18_spill] sm:$0xff] }
 0x188   :  { %2172 = vst.msk [vmem:[%s4023_s3 + $0x44] sm:$0xf] %vm2154_vm3, %v2572_v18  ;;  %v1915_v10 = vadd.f32 %v3678_v0, %v1865_v28  ;;  %v1866_v11 = vmax.f32 %v1397_v29, %v1754_v8  ;;  %v4141_v25 = vmax.f32 %v4139_v3, %v4140_v6  ;;  %v4144_v29 = vmax.f32 %v4142_v31, %v4143_v52  ;;  %v4160_v6 = vld [vmem:[#allocation31_spill] sm:$0xff] }
 0x189   :  { %v1960_v30 = vmax.f32 %v1917_v12, 0.0  ;;  %v1918_v9 = vadd.f32 %v3678_v0, %v1868_v15 }
 0x18a   :  { %v1958_v53 = vmax.f32 %v1915_v10, 0.0  ;;  %v1916_v54 = vadd.f32 %v3678_v0, %v1866_v11  ;;  %v2810_v41 = vpop.f32.mrb[68].mxu0  ;;  %v2856_v42 = vpop.f32.mrb[68].mxu1 }
 0x18b   :  { %v2577_v56 = vpack.c.bf16 %v1960_v30, %v1960_v30  ;;  %v1961_v57 = vmax.f32 %v1918_v9, 0.0  ;;  %v1402_v60 = vmax.f32 %v4129_v59, %v2810_v41  ;;  %v1298_v44 = vpop.f32.mrb[69].mxu0  ;;  %v1767_v45 = vpop.f32.mrb[69].mxu1  ;;  %v4145_v9 = vld [vmem:[#allocation21_spill] sm:$0xff]  ;;  %v4149_v59 = vld [vmem:[#allocation24_spill] sm:$0xff] }
 0x18c   :  { %v2575_v32 = vpack.c.bf16 %v1958_v53, %v1958_v53  ;;  %v1959_v62 = vmax.f32 %v1916_v54, 0.0  ;;  %v1400_v14 = vmax.f32 %v4132_v13, %v1298_v44  ;;  %v2811_v47 = vpop.f32.mrb[70].mxu0  ;;  %v2857_v48 = vpop.f32.mrb[70].mxu1  ;;  %v4146_v53 = vld [vmem:[#allocation22_spill] sm:$0xff] }
 0x18d   :  { %2177 = vst.msk [vmem:[%s4023_s3 + $0x58] sm:$0xf] %vm2154_vm3, %v2577_v56  ;;  %v2578_v16 = vpack.c.bf16 %v1961_v57, %v1961_v57  ;;  %v1871_v17 = vmax.f32 %v1402_v60, %v2856_v42  ;;  %v1403_v20 = vmax.f32 %v4135_v19, %v2811_v47  ;;  %v1301_v46 = vpop.f32.mrb[71].mxu0  ;;  %v1770_v50 = vpop.f32.mrb[71].mxu1  ;;  %v4147_v54 = vmax.f32 %v4145_v9, %v4146_v53  ;;  %v4152_v19 = vld [vmem:[#allocation26_spill] sm:$0xff]  ;;  %v4163_v53 = vld [vmem:[#allocation33_spill] sm:$0xff] }
 0x18e   :  { %2175 = vst.msk [vmem:[%s4023_s3 + $0x50] sm:$0xf] %vm2154_vm3, %v2575_v32  ;;  %v2576_v51 = vpack.c.bf16 %v1959_v62, %v1959_v62  ;;  %v1869_v22 = vmax.f32 %v1400_v14, %v1767_v45  ;;  %v1401_v21 = vmax.f32 %v4138_v36, %v1301_v46  ;;  %v4150_v60 = vmax.f32 %v4148_v24, %v4149_v59  ;;  %v4155_v36 = vld [vmem:[#allocation28_spill] sm:$0xff]  ;;  %v4166_v59 = vld [vmem:[#allocation35_spill] sm:$0xff] }
 0x18f   :  { %2178 = vst.msk [vmem:[%s4023_s3 + $0x5c] sm:$0xf] %vm2154_vm3, %v2578_v16  ;;  %v1921_v61 = vadd.f32 %v3678_v0, %v1871_v17  ;;  %v1872_v27 = vmax.f32 %v1403_v20, %v2857_v48  ;;  %v4153_v20 = vmax.f32 %v4151_v43, %v4152_v19  ;;  %v4172_v19 = vld [vmem:[#allocation39_spill] sm:$0xff] }
 0x190   :  { %2176 = vst.msk [vmem:[%s4023_s3 + $0x54] sm:$0xf] %vm2154_vm3, %v2576_v51  ;;  %v1919_v38 = vadd.f32 %v3678_v0, %v1869_v22  ;;  %v1870_v39 = vmax.f32 %v1401_v21, %v1770_v50  ;;  %v4156_v21 = vmax.f32 %v4154_v35, %v4155_v36 }
 0x191   :  { %v1964_v34 = vmax.f32 %v1921_v61, 0.0  ;;  %v1922_v37 = vadd.f32 %v3678_v0, %v1872_v27 }
 0x192   :  { %v1962_v1 = vmax.f32 %v1919_v38, 0.0  ;;  %v1920_v2 = vadd.f32 %v3678_v0, %v1870_v39  ;;  %v2814_v55 = vpop.f32.mrb[72].mxu0  ;;  %v2860_v58 = vpop.f32.mrb[72].mxu1 }
 0x193   :  { %v2581_v4 = vpack.c.bf16 %v1964_v34, %v1964_v34  ;;  %v1965_v5 = vmax.f32 %v1922_v37, 0.0  ;;  %v1406_v26 = vmax.f32 %v4141_v25, %v2814_v55  ;;  %v1314_v7 = vpop.f32.mrb[73].mxu0  ;;  %v1783_v8 = vpop.f32.mrb[73].mxu1  ;;  %v4157_v37 = vld [vmem:[#allocation29_spill] sm:$0xff]  ;;  %v4161_v25 = vld [vmem:[#allocation32_spill] sm:$0xff] }
 0x194   :  { %v2579_v18 = vpack.c.bf16 %v1962_v1, %v1962_v1  ;;  %v1963_v28 = vmax.f32 %v1920_v2, 0.0  ;;  %v1404_v12 = vmax.f32 %v4144_v29, %v1314_v7  ;;  %v2815_v15 = vpop.f32.mrb[74].mxu0  ;;  %v2861_v10 = vpop.f32.mrb[74].mxu1  ;;  %v4158_v1 = vld [vmem:[#allocation30_spill] sm:$0xff] }
 0x195   :  { %2181 = vst.msk [vmem:[%s4023_s3 + $0x68] sm:$0xf] %vm2154_vm3, %v2581_v4  ;;  %v2582_v11 = vpack.c.bf16 %v1965_v5, %v1965_v5  ;;  %v1875_v30 = vmax.f32 %v1406_v26, %v2860_v58  ;;  %v1407_v41 = vmax.f32 %v4147_v54, %v2815_v15  ;;  %v1317_v42 = vpop.f32.mrb[75].mxu0  ;;  %v1786_v56 = vpop.f32.mrb[75].mxu1  ;;  %v4159_v2 = vmax.f32 %v4157_v37, %v4158_v1  ;;  %v4164_v54 = vld [vmem:[#allocation34_spill] sm:$0xff]  ;;  %v4175_v1 = vld [vmem:[#allocation41_spill] sm:$0xff] }
 0x196   :  { %2179 = vst.msk [vmem:[%s4023_s3 + $0x60] sm:$0xf] %vm2154_vm3, %v2579_v18  ;;  %v2580_v57 = vpack.c.bf16 %v1963_v28, %v1963_v28  ;;  %v1873_v49 = vmax.f32 %v1404_v12, %v1783_v8  ;;  %v1405_v44 = vmax.f32 %v4150_v60, %v1317_v42  ;;  %v4162_v26 = vmax.f32 %v4160_v6, %v4161_v25  ;;  %v4167_v60 = vld [vmem:[#allocation36_spill] sm:$0xff]  ;;  %v4178_v25 = vld [vmem:[#allocation43_spill] sm:$0xff] }
 0x197   :  { %2182 = vst.msk [vmem:[%s4023_s3 + $0x6c] sm:$0xf] %vm2154_vm3, %v2582_v11  ;;  %v1925_v45 = vadd.f32 %v3678_v0, %v1875_v30  ;;  %v1876_v32 = vmax.f32 %v1407_v41, %v2861_v10  ;;  %v4165_v41 = vmax.f32 %v4163_v53, %v4164_v54 }
 0x198   :  { %2180 = vst.msk [vmem:[%s4023_s3 + $0x64] sm:$0xf] %vm2154_vm3, %v2580_v57  ;;  %v1923_v62 = vadd.f32 %v3678_v0, %v1873_v49  ;;  %v1874_v63 = vmax.f32 %v1405_v44, %v1786_v56  ;;  %v4168_v44 = vmax.f32 %v4166_v59, %v4167_v60 }
 0x199   :  { %v1968_v33 = vmax.f32 %v1925_v45, 0.0  ;;  %v1926_v13 = vadd.f32 %v3678_v0, %v1876_v32 }
 0x19a   :  { %v1966_v14 = vmax.f32 %v1923_v62, 0.0  ;;  %v1924_v47 = vadd.f32 %v3678_v0, %v1874_v63  ;;  %v2818_v48 = vpop.f32.mrb[76].mxu0  ;;  %v2864_v16 = vpop.f32.mrb[76].mxu1 }
 0x19b   :  { %v2585_v17 = vpack.c.bf16 %v1968_v33, %v1968_v33  ;;  %v1969_v40 = vmax.f32 %v1926_v13, 0.0  ;;  %v1410_v46 = vmax.f32 %v4153_v20, %v2818_v48  ;;  %v1330_v50 = vpop.f32.mrb[77].mxu0  ;;  %v1799_v51 = vpop.f32.mrb[77].mxu1  ;;  %v4169_v13 = vld [vmem:[#allocation37_spill] sm:$0xff]  ;;  %v4173_v20 = vld [vmem:[#allocation40_spill] sm:$0xff] }
 0x19c   :  { %v2583_v22 = vpack.c.bf16 %v1966_v14, %v1966_v14  ;;  %v1967_v23 = vmax.f32 %v1924_v47, 0.0  ;;  %v1408_v61 = vmax.f32 %v4156_v21, %v1330_v50  ;;  %v2819_v27 = vpop.f32.mrb[78].mxu0  ;;  %v2865_v38 = vpop.f32.mrb[78].mxu1  ;;  %v4170_v14 = vld [vmem:[#allocation38_spill] sm:$0xff] }
 0x19d   :  { %2185 = vst.msk [vmem:[%s4023_s3 + $0x78] sm:$0xf] %vm2154_vm3, %v2585_v17  ;;  %v2586_v39 = vpack.c.bf16 %v1969_v40, %v1969_v40  ;;  %v1879_v34 = vmax.f32 %v1410_v46, %v2864_v16  ;;  %v1411_v55 = vmax.f32 %v4159_v2, %v2819_v27  ;;  %v1333_v58 = vpop.f32.mrb[79].mxu0  ;;  %v1802_v4 = vpop.f32.mrb[79].mxu1  ;;  %v4171_v47 = vmax.f32 %v4169_v13, %v4170_v14  ;;  %v4176_v2 = vld [vmem:[#allocation42_spill] sm:$0xff] }
 0x19e   :  { %2183 = vst.msk [vmem:[%s4023_s3 + $0x70] sm:$0xf] %vm2154_vm3, %v2583_v22  ;;  %v2584_v5 = vpack.c.bf16 %v1967_v23, %v1967_v23  ;;  %v1877_v3 = vmax.f32 %v1408_v61, %v1799_v51  ;;  %v1409_v7 = vmax.f32 %v4162_v26, %v1333_v58  ;;  %v4174_v46 = vmax.f32 %v4172_v19, %v4173_v20  ;;  %v4179_v26 = vld [vmem:[#allocation44_spill] sm:$0xff] }
 0x19f   :  { %2186 = vst.msk [vmem:[%s4023_s3 + $0x7c] sm:$0xf] %vm2154_vm3, %v2586_v39  ;;  %v1929_v8 = vadd.f32 %v3678_v0, %v1879_v34  ;;  %v1880_v18 = vmax.f32 %v1411_v55, %v2865_v38  ;;  %v4177_v55 = vmax.f32 %v4175_v1, %v4176_v2 }
 0x1a0   :  { %2184 = vst.msk [vmem:[%s4023_s3 + $0x74] sm:$0xf] %vm2154_vm3, %v2584_v5  ;;  %v1927_v28 = vadd.f32 %v3678_v0, %v1877_v3  ;;  %v1878_v31 = vmax.f32 %v1409_v7, %v1802_v4  ;;  %v4180_v7 = vmax.f32 %v4178_v25, %v4179_v26 }
 0x1a1   :  { %v1972_v52 = vmax.f32 %v1929_v8, 0.0  ;;  %v1930_v29 = vadd.f32 %v3678_v0, %v1880_v18 }
 0x1a2   :  { %v1970_v12 = vmax.f32 %v1927_v28, 0.0  ;;  %v1928_v15 = vadd.f32 %v3678_v0, %v1878_v31  ;;  %v2822_v10 = vpop.f32.mrb[80].mxu0  ;;  %v2868_v11 = vpop.f32.mrb[80].mxu1 }
 0x1a3   :  { %v2589_v30 = vpack.c.bf16 %v1972_v52, %v1972_v52  ;;  %v1973_v9 = vmax.f32 %v1930_v29, 0.0  ;;  %v1414_v42 = vmax.f32 %v4165_v41, %v2822_v10  ;;  %v1346_v56 = vpop.f32.mrb[81].mxu0  ;;  %v1815_v57 = vpop.f32.mrb[81].mxu1 }
 0x1a4   :  { %v2587_v49 = vpack.c.bf16 %v1970_v12, %v1970_v12  ;;  %v1971_v24 = vmax.f32 %v1928_v15, 0.0  ;;  %v1412_v45 = vmax.f32 %v4168_v44, %v1346_v56  ;;  %v2823_v32 = vpop.f32.mrb[82].mxu0  ;;  %v2869_v62 = vpop.f32.mrb[82].mxu1 }
 0x1a5   :  { %2189 = vst.msk [vmem:[%s4023_s3 + $0x88] sm:$0xf] %vm2154_vm3, %v2589_v30  ;;  %v2590_v63 = vpack.c.bf16 %v1973_v9, %v1973_v9  ;;  %v1883_v33 = vmax.f32 %v1414_v42, %v2868_v11  ;;  %v1415_v48 = vmax.f32 %v4171_v47, %v2823_v32  ;;  %v1349_v16 = vpop.f32.mrb[83].mxu0  ;;  %v1818_v17 = vpop.f32.mrb[83].mxu1  ;;  %v4181_v11 = vld [vmem:[#allocation45_spill] sm:$0xff]  ;;  %v4182_v30 = vld [vmem:[#allocation46_spill] sm:$0xff] }
 0x1a6   :  { %2187 = vst.msk [vmem:[%s4023_s3 + $0x80] sm:$0xf] %vm2154_vm3, %v2587_v49  ;;  %v2588_v40 = vpack.c.bf16 %v1971_v24, %v1971_v24  ;;  %v1881_v43 = vmax.f32 %v1412_v45, %v1815_v57  ;;  %v1413_v50 = vmax.f32 %v4174_v46, %v1349_v16  ;;  %v4183_v9 = vmax.f32 %v4181_v11, %v4182_v30 }
 0x1a7   :  { %2190 = vst.msk [vmem:[%s4023_s3 + $0x8c] sm:$0xf] %vm2154_vm3, %v2590_v63  ;;  %v1933_v51 = vadd.f32 %v3678_v0, %v1883_v33  ;;  %v1884_v22 = vmax.f32 %v1415_v48, %v2869_v62 }
 0x1a8   :  { %2188 = vst.msk [vmem:[%s4023_s3 + $0x84] sm:$0xf] %vm2154_vm3, %v2588_v40  ;;  %v1931_v23 = vadd.f32 %v3678_v0, %v1881_v43  ;;  %v1882_v35 = vmax.f32 %v1413_v50, %v1818_v17 }
 0x1a9   :  { %v1976_v36 = vmax.f32 %v1933_v51, 0.0  ;;  %v1934_v21 = vadd.f32 %v3678_v0, %v1884_v22 }
 0x1aa   :  { %v1974_v61 = vmax.f32 %v1931_v23, 0.0  ;;  %v1932_v27 = vadd.f32 %v3678_v0, %v1882_v35  ;;  %v2826_v38 = vpop.f32.mrb[84].mxu0  ;;  %v2872_v39 = vpop.f32.mrb[84].mxu1 }
 0x1ab   :  { %v2593_v34 = vpack.c.bf16 %v1976_v36, %v1976_v36  ;;  %v1977_v37 = vmax.f32 %v1934_v21, 0.0  ;;  %v1418_v58 = vmax.f32 %v4177_v55, %v2826_v38  ;;  %v1362_v4 = vpop.f32.mrb[85].mxu0  ;;  %v1831_v5 = vpop.f32.mrb[85].mxu1 }
 0x1ac   :  { %v2591_v3 = vpack.c.bf16 %v1974_v61, %v1974_v61  ;;  %v1975_v6 = vmax.f32 %v1932_v27, 0.0  ;;  %v1416_v8 = vmax.f32 %v4180_v7, %v1362_v4  ;;  %v2827_v18 = vpop.f32.mrb[86].mxu0  ;;  %v2873_v28 = vpop.f32.mrb[86].mxu1 }
 0x1ad   :  { %2193 = vst.msk [vmem:[%s4023_s3 + $0x98] sm:$0xf] %vm2154_vm3, %v2593_v34  ;;  %v2594_v31 = vpack.c.bf16 %v1977_v37, %v1977_v37  ;;  %v1887_v52 = vmax.f32 %v1418_v58, %v2872_v39  ;;  %v1365_v29 = vpop.f32.mrb[87].mxu0  ;;  %v1834_v12 = vpop.f32.mrb[87].mxu1 }
 0x1ae   :  { %2191 = vst.msk [vmem:[%s4023_s3 + $0x90] sm:$0xf] %vm2154_vm3, %v2591_v3  ;;  %v2592_v15 = vpack.c.bf16 %v1975_v6, %v1975_v6  ;;  %v1885_v10 = vmax.f32 %v1416_v8, %v1831_v5  ;;  %v1417_v53 = vmax.f32 %v4183_v9, %v1365_v29 }
 0x1af   :  { %2194 = vst.msk [vmem:[%s4023_s3 + $0x9c] sm:$0xf] %vm2154_vm3, %v2594_v31  ;;  %v1937_v54 = vadd.f32 %v3678_v0, %v1887_v52 }
 0x1b0   :  { %2192 = vst.msk [vmem:[%s4023_s3 + $0x94] sm:$0xf] %vm2154_vm3, %v2592_v15  ;;  %v1935_v41 = vadd.f32 %v3678_v0, %v1885_v10  ;;  %v1886_v42 = vmax.f32 %v1417_v53, %v1834_v12 }
 0x1b1   :  { %v1980_v56 = vmax.f32 %v1937_v54, 0.0 }
 0x1b2   :  { %v1978_v57 = vmax.f32 %v1935_v41, 0.0  ;;  %v1936_v49 = vadd.f32 %v3678_v0, %v1886_v42 }
 0x1b3   :  { %v2597_v24 = vpack.c.bf16 %v1980_v56, %v1980_v56 }
 0x1b4   :  { %v2595_v59 = vpack.c.bf16 %v1978_v57, %v1978_v57  ;;  %v1979_v60 = vmax.f32 %v1936_v49, 0.0 }
 0x1b5   :  { %2198 = vst.msk [vmem:[%s4023_s3 + $0xa8] sm:$0x1] %vm2197_vm4, %v2597_v24 }
 0x1b6   :  { %2195 = vst.msk [vmem:[%s4023_s3 + $0xa0] sm:$0xf] %vm2154_vm3, %v2595_v59  ;;  %v2596_v44 = vpack.c.bf16 %v1979_v60, %v1979_v60 }
 0x1b8   :  { %2196 = vst.msk [vmem:[%s4023_s3 + $0xa4] sm:$0xf] %vm2154_vm3, %v2596_v44 }
 0x1b9   :  { %2203 = vsyncpa [#allocation3], 1 }
 0x1ba   :  { %2204 = vsyncpa [#allocation5], 1 }

// kernel: lenet_forward.4
= control target key start
LH: loop header
LB: loop body
LE: loop exit
PB: predicated region body
PF: predicated region fallthrough
CT: control target
= control target key end

     0   :  { %vm232_vm0 = vcmask 1046528   ;;  %vm219_vm1 = vcmask 113664   ;;  %vm1065_vm2 = vcmask 650240   ;;  %vm1072_vm3 = vcmask 647168   ;;  %s1913_s1 = inlined_call_operand.vmem [shape: bf16[270,80], index: 1, kind: input, shape index: {}]   ;;  %s1914_s0 = inlined_call_operand.vmem [shape: bf16[4,50,270], index: 0, kind: input, shape index: {}]   ;;  %s1915_s2 = inlined_call_operand.vmem [shape: f32[1,80], index: 2, kind: input, shape index: {}]   ;;  %s1916_s3 = inlined_call_operand.vmem [shape: bf16[50,80], index: 3, kind: output, shape index: {}]  }
   0x1   :  { %v1540_v0 = vld [vmem:[%s1913_s1 + $0x40] sm:$0xff]   ;;  %v1552_v2 = vld [vmem:[%s1913_s1 + $0x48] sm:$0xff]   ;;  %v1566_v4 = vld [vmem:[%s1913_s1 + $0x50] sm:$0xff]  }
   0x2   :  { %v1545_v1 = vld [vmem:[%s1913_s1] sm:$0xff]   ;;  %1216 = vmatprep.subr.bf16.mxu0 %v1540_v0  ;;  %1261 = vmatprep.subr.bf16.mxu1 %v1540_v0  ;;  %v1559_v3 = vld [vmem:[%s1913_s1 + $0x8] sm:$0xff]   ;;  %v1573_v5 = vld [vmem:[%s1913_s1 + $0x10] sm:$0xff]  }
   0x3   :  { %1217 = vmatpush3.bf16.msra.mxu0 %v1545_v1  ;;  %1262 = vmatpush3.bf16.msra.mxu1 %v1545_v1  ;;  %v1580_v6 = vld [vmem:[%s1913_s1 + $0x58] sm:$0xff]   ;;  %v1594_v8 = vld [vmem:[%s1913_s1 + $0x60] sm:$0xff]   ;;  %v1608_v10 = vld [vmem:[%s1913_s1 + $0x68] sm:$0xff]  }
   0x4   :  { %1218 = vmatprep.subr.bf16.mxu0 %v1552_v2  ;;  %1263 = vmatprep.subr.bf16.mxu1 %v1552_v2  ;;  %v1587_v7 = vld [vmem:[%s1913_s1 + $0x18] sm:$0xff]   ;;  %v1601_v9 = vld [vmem:[%s1913_s1 + $0x20] sm:$0xff]   ;;  %v1621_v13 = vld [vmem:[%s1913_s1 + $0x28] sm:$0xff]  }
   0x5   :  { %v1458_v11 = vld [vmem:[%s1914_s0 + $0x4] ss:$12 sps:$4 sm:$0xff]   ;;  %v1642_v16 = vld [vmem:[%s1913_s1 + $0x78] sm:$0xff]   ;;  %v1456_v19 = vld [vmem:[%s1914_s0] ss:$12 sps:$4 sm:$0xff]  }
   0x6   :  { %v1461_v12 = vld [vmem:[%s1914_s0 + $0x58] ss:$12 sps:$4 sm:$0xff]   ;;  %v1628_v14 = vld [vmem:[%s1913_s1 + $0x70] sm:$0xff]   ;;  %268 = vmatprep.mubr.bf16.mxu0 %v1458_v11  ;;  %v1463_v21 = vld [vmem:[%s1914_s0 + $0x1c] ss:$12 sps:$4 sm:$0xff]  }
   0x7   :  { %1219 = vmatpush3.bf16.msra.mxu0 %v1559_v3  ;;  %1264 = vmatpush3.bf16.msra.mxu1 %v1559_v3  ;;  %v1635_v15 = vld [vmem:[%s1913_s1 + $0x30] sm:$0xff]   ;;  %v1649_v17 = vld [vmem:[%s1913_s1 + $0x38] sm:$0xff]   ;;  %v1656_v18 = vld [vmem:[%s1913_s1 + $0x80] sm:$0x7f]  }
   0x8   :  { %1220 = vmatprep.subr.bf16.mxu0 %v1566_v4  ;;  %1265 = vmatprep.subr.bf16.mxu1 %v1566_v4  ;;  %v1459_v20 = vld [vmem:[%s1914_s0 + $0x54] ss:$12 sps:$4 sm:$0xff]   ;;  %v1674_v22 = vsel %vm232_vm0, %v1656_v18, 0  ;;  %v1465_v23 = vld [vmem:[%s1914_s0 + $0x70] ss:$12 sps:$4 sm:$0xff]  }
   0x9   :  { %478 = vmatprep.mubr.bf16.mxu1 %v1461_v12  ;;  %v1467_v24 = vld [vmem:[%s1914_s0 + $0x18] ss:$12 sps:$4 sm:$0xff]   ;;  %v1469_v26 = vld [vmem:[%s1914_s0 + $0x34] ss:$12 sps:$4 sm:$0xff]   ;;  %v61_v28 = vld [vmem:[%s1914_s0 + $0x48] sm:$0x11] }
   0xa   :  { %v1468_v25 = vld [vmem:[%s1914_s0 + $0x6c] ss:$12 sps:$4 sm:$0xff]   ;;  %v1471_v27 = vld [vmem:[%s1914_s0 + $0x88] ss:$12 sps:$4 sm:$0xff]   ;;  %v1473_v29 = vld [vmem:[%s1914_s0 + $0x30] ss:$12 sps:$4 sm:$0xff]   ;;  %v1088_v32 = vcombine.high %v61_v28, %v61_v28  ;;  %v1087_v34 = vcombine.low %v61_v28, %v61_v28 }
   0xb   :  { %1221 = vmatpush3.bf16.msra.mxu0 %v1573_v5  ;;  %1266 = vmatpush3.bf16.msra.mxu1 %v1573_v5  ;;  %v1123_v30 = vld [vmem:[%s1914_s0 + $0x9c] sm:$0x11]  ;;  %v1474_v31 = vld [vmem:[%s1914_s0 + $0x84] ss:$12 sps:$4 sm:$0xff]   ;;  %v1479_v36 = vld [vmem:[%s1914_s0 + $0x8] ss:$12 sps:$4 sm:$0xff]  }
   0xc   :  { %1222 = vmatprep.subr.bf16.mxu0 %v1580_v6  ;;  %1267 = vmatprep.subr.bf16.mxu1 %v1580_v6  ;;  %v1135_v33 = vcombine.high %v1123_v30, %v1123_v30  ;;  %v1134_v35 = vcombine.low %v1123_v30, %v1123_v30  ;;  %v1482_v37 = vld [vmem:[%s1914_s0 + $0xac] ss:$12 sps:$4 sm:$0xff]   ;;  %v1480_v38 = vld [vmem:[%s1914_s0 + $0xa8] ss:$12 sps:$4 sm:$0xff]   ;;  %v1485_v41 = vld [vmem:[%s1914_s0 + $0xc4] ss:$12 sps:$4 sm:$0xff]  }
   0xd   :  { %v1483_v39 = vld [vmem:[%s1914_s0 + $0x20] ss:$12 sps:$4 sm:$0xff]   ;;  %v1484_v40 = vld [vmem:[%s1914_s0 + $0x38] ss:$12 sps:$4 sm:$0xff]   ;;  %v1489_v44 = vld [vmem:[%s1914_s0 + $0x5c] ss:$12 sps:$4 sm:$0xff]  }
   0xe   :  { %v1487_v42 = vld [vmem:[%s1914_s0 + $0x50] ss:$0 sps:$4 sm:$0x11]   ;;  %v1488_v43 = vld [vmem:[%s1914_s0 + $0xc0] ss:$12 sps:$4 sm:$0xff]  }
   0xf   :  { %1223 = vmatpush3.bf16.msra.mxu0 %v1587_v7  ;;  %1268 = vmatpush3.bf16.msra.mxu1 %v1587_v7  ;;  %v1490_v45 = vld [vmem:[%s1914_s0 + $0xdc] ss:$12 sps:$4 sm:$0xff]   ;;  %v1492_v46 = vld [vmem:[%s1914_s0 + $0x74] ss:$12 sps:$4 sm:$0xff]   ;;  %v1493_v47 = vld [vmem:[%s1914_s0 + $0xd8] ss:$12 sps:$4 sm:$0xff]  }
  0x10   :  { %1224 = vmatprep.subr.bf16.mxu0 %v1594_v8  ;;  %1269 = vmatprep.subr.bf16.mxu1 %v1594_v8  ;;  %v1153_v48 = vld [vmem:[%s1914_s0 + $0xf0] sm:$0x11]  ;;  %v1494_v49 = vld [vmem:[%s1914_s0 + $0x8c] ss:$12 sps:$4 sm:$0xff]   ;;  %v1499_v55 = vld [vmem:[%s1914_s0 + $0xfc] ss:$12 sps:$4 sm:$0xff]  }
  0x11   :  { %v1165_v50 = vcombine.high %v1153_v48, %v1153_v48  ;;  %v1496_v51 = vld [vmem:[%s1914_s0 + $0xa4] ss:$0 sps:$4 sm:$0x11]   ;;  %v1164_v52 = vcombine.low %v1153_v48, %v1153_v48  ;;  %v1498_v53 = vld [vmem:[%s1914_s0 + $0xb0] ss:$12 sps:$4 sm:$0xff]  }
  0x12   :  { %v1501_v54 = vld [vmem:[%s1914_s0 + $0x100] ss:$12 sps:$4 sm:$0xff]   ;;  %v1502_v56 = vld [vmem:[%s1914_s0 + $0xc8] ss:$12 sps:$4 sm:$0xff]   ;;  %v1504_v58 = vld [vmem:[%s1914_s0 + $0x118] ss:$12 sps:$4 sm:$0xff]  }
  0x13   :  { %1225 = vmatpush3.bf16.msra.mxu0 %v1601_v9  ;;  %1270 = vmatpush3.bf16.msra.mxu1 %v1601_v9  ;;  %v1503_v57 = vld [vmem:[%s1914_s0 + $0xe0] ss:$12 sps:$4 sm:$0xff]   ;;  %v1506_v59 = vld [vmem:[%s1914_s0 + $0xf8] ss:$0 sps:$4 sm:$0x11]  }
  0x14   :  { %1226 = vmatprep.subr.bf16.mxu0 %v1608_v10  ;;  %1271 = vmatprep.subr.bf16.mxu1 %v1608_v10  ;;  %v1507_v60 = vld [vmem:[%s1914_s0 + $0x114] ss:$12 sps:$4 sm:$0xff]   ;;  %v1508_v61 = vld [vmem:[%s1914_s0 + $0x130] ss:$12 sps:$4 sm:$0xff]   ;;  %v1183_v63 = vld [vmem:[%s1914_s0 + $0x144] sm:$0x11] }
  0x15   :  { %v1510_v62 = vld [vmem:[%s1914_s0 + $0x104] ss:$12 sps:$4 sm:$0xff]  }
  0x17   :  { %1227 = vmatpush3.bf16.msra.mxu0 %v1621_v13  ;;  %1272 = vmatpush3.bf16.msra.mxu1 %v1621_v13 }
  0x18   :  { %1228 = vmatprep.subr.bf16.mxu0 %v1628_v14  ;;  %1273 = vmatprep.subr.bf16.mxu1 %v1628_v14 }
  0x1b   :  { %1229 = vmatpush3.bf16.msra.mxu0 %v1635_v15  ;;  %1274 = vmatpush3.bf16.msra.mxu1 %v1635_v15 }
  0x1c   :  { %1230 = vmatprep.subr.bf16.mxu0 %v1642_v16  ;;  %1275 = vmatprep.subr.bf16.mxu1 %v1642_v16 }
  0x1f   :  { %1231 = vmatpush3.bf16.msra.mxu0 %v1649_v17  ;;  %1276 = vmatpush3.bf16.msra.mxu1 %v1649_v17 }
  0x20   :  { %1436 = vmatprep.subr.msk.bf16.mxu0 %vm232_vm0, %v1656_v18  ;;  %1306 = vmatprep.subr.bf16.mxu1 %v1540_v0 }
  0x22   :  { %269 = vmatmul.mubr.bf16.vlgmr.msra.gmra.mrb[0].mxu0 %v1456_v19  ;;  %479 = vmatmul.mubr.bf16.vlgmr.msra.gmra.mrb[0].mxu1 %v1459_v20 }
  0x23   :  { %1397 = vmatpush3.bf16.msra.mxu0 %v1674_v22  ;;  %1307 = vmatpush3.bf16.msra.mxu1 %v1545_v1 }
  0x24   :  { %1308 = vmatprep.subr.bf16.mxu1 %v1552_v2  ;;  %276 = vmatprep.mubr.bf16.mxu0 %v1463_v21 }
  0x25   :  { %486 = vmatprep.mubr.bf16.mxu1 %v1465_v23  ;;  %1437 = vmatprep.subr.msk.bf16.mxu0 %vm232_vm0, %v1656_v18 }
  0x27   :  { %1309 = vmatpush3.bf16.msra.mxu1 %v1559_v3 }
  0x28   :  { %1310 = vmatprep.subr.bf16.mxu1 %v1566_v4 }
  0x2a   :  { %277 = vmatmul.mubr.bf16.gmra.mrb[4].mxu0 %v1467_v24  ;;  %487 = vmatmul.mubr.bf16.gmra.mrb[4].mxu1 %v1468_v25 }
  0x2b   :  { %1311 = vmatpush3.bf16.msra.mxu1 %v1573_v5  ;;  %284 = vmatprep.mubr.bf16.mxu0 %v1469_v26 }
  0x2c   :  { %1312 = vmatprep.subr.bf16.mxu1 %v1580_v6  ;;  %494 = vmatprep.mubr.bf16.mxu1 %v1471_v27 }
  0x2f   :  { %1313 = vmatpush3.bf16.msra.mxu1 %v1587_v7 }
  0x30   :  { %1314 = vmatprep.subr.bf16.mxu1 %v1594_v8 }
  0x32   :  { %285 = vmatmul.mubr.bf16.gmra.mrb[8].mxu0 %v1473_v29  ;;  %495 = vmatmul.mubr.bf16.gmra.mrb[8].mxu1 %v1474_v31 }
  0x33   :  { %1315 = vmatpush3.bf16.msra.mxu1 %v1601_v9  ;;  %292 = vmatprep.mubr.bf16.mxu0 %v1088_v32 }
  0x34   :  { %1316 = vmatprep.subr.bf16.mxu1 %v1608_v10  ;;  %502 = vmatprep.mubr.bf16.mxu1 %v1135_v33 }
  0x37   :  { %1317 = vmatpush3.bf16.msra.mxu1 %v1621_v13 }
  0x38   :  { %1318 = vmatprep.subr.bf16.mxu1 %v1628_v14 }
  0x3a   :  { %293 = vmatmul.mubr.bf16.gmra.mrb[12].mxu0 %v1087_v34  ;;  %503 = vmatmul.mubr.bf16.gmra.mrb[12].mxu1 %v1134_v35 }
  0x3b   :  { %1319 = vmatpush3.bf16.msra.mxu1 %v1635_v15  ;;  %1398 = vmatprep.mubr.msk.bf16.mxu0 %vm219_vm1, %v1479_v36 }
  0x3c   :  { %1320 = vmatprep.subr.bf16.mxu1 %v1642_v16  ;;  %695 = vmatprep.mubr.bf16.mxu1 %v1482_v37 }
  0x3f   :  { %1321 = vmatpush3.bf16.msra.mxu1 %v1649_v17 }
  0x40   :  { %1351 = vmatprep.subr.bf16.mxu1 %v1540_v0  ;;  %v1511_v0 = vld [vmem:[%s1914_s0 + $0x12c] ss:$12 sps:$4 sm:$0xff]  }
  0x42   :  { %1399 = vmatmul.mubr.msk.bf16.vlgmr.msra.gmra.mrb[16].mxu0 %vm219_vm1, %v1483_v39  ;;  %696 = vmatmul.mubr.bf16.vlgmr.msra.gmra.mrb[16].mxu1 %v1480_v38 }
  0x43   :  { %1407 = vmatpush3.bf16.msra.mxu0 %v1674_v22  ;;  %1352 = vmatpush3.bf16.msra.mxu1 %v1545_v1  ;;  %v1512_v1 = vld [vmem:[%s1914_s0 + $0x11c] ss:$12 sps:$4 sm:$0xff]  }
  0x44   :  { %1353 = vmatprep.subr.bf16.mxu1 %v1552_v2  ;;  %1402 = vmatprep.mubr.msk.bf16.mxu0 %vm219_vm1, %v1484_v40  ;;  %v1195_v2 = vcombine.high %v1183_v63, %v1183_v63 }
  0x45   :  { %703 = vmatprep.mubr.bf16.mxu1 %v1485_v41  ;;  %1438 = vmatprep.subr.msk.bf16.mxu0 %vm232_vm0, %v1656_v18 }
  0x47   :  { %1354 = vmatpush3.bf16.msra.mxu1 %v1559_v3  ;;  %v1514_v3 = vld [vmem:[%s1914_s0 + $0x134] ss:$12 sps:$4 sm:$0xff]  }
  0x48   :  { %1355 = vmatprep.subr.bf16.mxu1 %v1566_v4  ;;  %v1194_v4 = vcombine.low %v1183_v63, %v1183_v63 }
  0x4a   :  { %1403 = vmatmul.mubr.msk.bf16.gmra.mrb[20].mxu0 %vm219_vm1, %v1487_v42  ;;  %704 = vmatmul.mubr.bf16.gmra.mrb[20].mxu1 %v1488_v43 }
  0x4b   :  { %1356 = vmatpush3.bf16.msra.mxu1 %v1573_v5  ;;  %1408 = vmatprep.mubr.msk.bf16.mxu0 %vm219_vm1, %v1489_v44  ;;  %v1516_v5 = vld [vmem:[%s1914_s0 + $0x14c] ss:$0 sps:$4 sm:$0x11]  }
  0x4c   :  { %1357 = vmatprep.subr.bf16.mxu1 %v1580_v6  ;;  %711 = vmatprep.mubr.bf16.mxu1 %v1490_v45 }
  0x4f   :  { %1358 = vmatpush3.bf16.msra.mxu1 %v1587_v7 }
  0x50   :  { %1359 = vmatprep.subr.bf16.mxu1 %v1594_v8 }
  0x52   :  { %1409 = vmatmul.mubr.msk.bf16.vlgmr.msra.gmra.mrb[24].mxu0 %vm219_vm1, %v1492_v46  ;;  %712 = vmatmul.mubr.bf16.gmra.mrb[24].mxu1 %v1493_v47 }
  0x53   :  { %1417 = vmatpush3.bf16.msra.mxu0 %v1674_v22  ;;  %1360 = vmatpush3.bf16.msra.mxu1 %v1601_v9 }
  0x54   :  { %1361 = vmatprep.subr.bf16.mxu1 %v1608_v10  ;;  %1412 = vmatprep.mubr.msk.bf16.mxu0 %vm219_vm1, %v1494_v49 }
  0x55   :  { %719 = vmatprep.mubr.bf16.mxu1 %v1165_v50  ;;  %1439 = vmatprep.subr.msk.bf16.mxu0 %vm232_vm0, %v1656_v18 }
  0x57   :  { %1362 = vmatpush3.bf16.msra.mxu1 %v1621_v13 }
  0x58   :  { %1363 = vmatprep.subr.bf16.mxu1 %v1628_v14 }
  0x5a   :  { %1413 = vmatmul.mubr.msk.bf16.gmra.mrb[28].mxu0 %vm219_vm1, %v1496_v51  ;;  %720 = vmatmul.mubr.bf16.gmra.mrb[28].mxu1 %v1164_v52 }
  0x5b   :  { %1364 = vmatpush3.bf16.msra.mxu1 %v1635_v15  ;;  %1418 = vmatprep.mubr.msk.bf16.mxu0 %vm219_vm1, %v1498_v53 }
  0x5c   :  { %1365 = vmatprep.subr.bf16.mxu1 %v1642_v16  ;;  %912 = vmatprep.mubr.bf16.mxu1 %v1501_v54 }
  0x5f   :  { %1366 = vmatpush3.bf16.msra.mxu1 %v1649_v17 }
  0x62   :  { %1419 = vmatmul.mubr.msk.bf16.vlgmr.msra.gmra.mrb[32].mxu0 %vm219_vm1, %v1502_v56  ;;  %913 = vmatmul.mubr.bf16.vlgmr.msra.gmra.mrb[32].mxu1 %v1499_v55 }
  0x63   :  { %1427 = vmatpush3.bf16.msra.mxu0 %v1674_v22  ;;  %1422 = vmatprep.mubr.msk.bf16.mxu0 %vm219_vm1, %v1503_v57 }
  0x64   :  { %920 = vmatprep.mubr.bf16.mxu1 %v1504_v58 }
  0x6a   :  { %1423 = vmatmul.mubr.msk.bf16.gmra.mrb[36].mxu0 %vm219_vm1, %v1506_v59  ;;  %921 = vmatmul.mubr.bf16.gmra.mrb[36].mxu1 %v1507_v60 }
  0x6b   :  { %928 = vmatprep.mubr.bf16.mxu1 %v1508_v61  ;;  %1428 = vmatprep.mubr.msk.bf16.mxu0 %vm219_vm1, %v1510_v62 }
  0x72   :  { %929 = vmatmul.mubr.bf16.gmra.mrb[40].mxu1 %v1511_v0  ;;  %1429 = vmatmul.mubr.msk.bf16.vlgmr.msra.gmra.mrb[40].mxu0 %vm219_vm1, %v1512_v1 }
  0x73   :  { %936 = vmatprep.mubr.bf16.mxu1 %v1195_v2  ;;  %1432 = vmatprep.mubr.msk.bf16.mxu0 %vm219_vm1, %v1514_v3 }
  0x7a   :  { %937 = vmatmul.mubr.bf16.gmra.mrb[44].mxu1 %v1194_v4  ;;  %1433 = vmatmul.mubr.msk.bf16.gmra.mrb[44].mxu0 %vm219_vm1, %v1516_v5 }
  0xf5   :  { %v1232_v6 = vpop.f32.mrb[0].mxu0  ;;  %v1277_v7 = vpop.f32.mrb[0].mxu1 }
  0xf6   :  { %v1233_v8 = vpop.f32.mrb[1].mxu0  ;;  %v1278_v9 = vpop.f32.mrb[1].mxu1 }
  0xf7   :  { %v1234_v10 = vadd.f32 %v1233_v8, %v1232_v6  ;;  %v1850_v11 = vadd.f32 %v1278_v9, %v1277_v7  ;;  %v1235_v12 = vpop.f32.mrb[2].mxu0  ;;  %v1280_v13 = vpop.f32.mrb[2].mxu1 }
  0xf8   :  { %v1236_v14 = vpop.f32.mrb[3].mxu0  ;;  %v1281_v15 = vpop.f32.mrb[3].mxu1 }
  0xf9   :  { %v1237_v16 = vadd.f32 %v1236_v14, %v1235_v12  ;;  %v1852_v17 = vadd.f32 %v1281_v15, %v1280_v13 }
  0xfd   :  { %v1238_v18 = vpop.f32.mrb[4].mxu0  ;;  %v1283_v19 = vpop.f32.mrb[4].mxu1 }
  0xfe   :  { %v1239_v20 = vpop.f32.mrb[5].mxu0  ;;  %v1284_v21 = vpop.f32.mrb[5].mxu1 }
  0xff   :  { %v1240_v22 = vadd.f32 %v1239_v20, %v1238_v18  ;;  %v1285_v23 = vadd.f32 %v1284_v21, %v1283_v19  ;;  %v1241_v24 = vpop.f32.mrb[6].mxu0  ;;  %v1286_v25 = vpop.f32.mrb[6].mxu1 }
 0x100   :  { %v1242_v26 = vpop.f32.mrb[7].mxu0  ;;  %v1287_v27 = vpop.f32.mrb[7].mxu1 }
 0x101   :  { %v1243_v28 = vadd.f32 %v1242_v26, %v1241_v24  ;;  %v1288_v29 = vadd.f32 %v1287_v27, %v1286_v25 }
 0x105   :  { %v1244_v30 = vpop.f32.mrb[8].mxu0  ;;  %v1289_v31 = vpop.f32.mrb[8].mxu1 }
 0x106   :  { %v1245_v32 = vpop.f32.mrb[9].mxu0  ;;  %v1290_v33 = vpop.f32.mrb[9].mxu1 }
 0x107   :  { %v1246_v34 = vadd.f32 %v1245_v32, %v1244_v30  ;;  %v1854_v35 = vadd.f32 %v1290_v33, %v1289_v31  ;;  %v1247_v36 = vpop.f32.mrb[10].mxu0  ;;  %v1292_v37 = vpop.f32.mrb[10].mxu1 }
 0x108   :  { %v1248_v38 = vpop.f32.mrb[11].mxu0  ;;  %v1293_v39 = vpop.f32.mrb[11].mxu1 }
 0x109   :  { %v1249_v40 = vadd.f32 %v1248_v38, %v1247_v36  ;;  %v1856_v41 = vadd.f32 %v1293_v39, %v1292_v37 }
 0x10d   :  { %v1250_v42 = vpop.f32.mrb[12].mxu0  ;;  %v1295_v43 = vpop.f32.mrb[12].mxu1 }
 0x10e   :  { %v1251_v44 = vpop.f32.mrb[13].mxu0  ;;  %v1296_v45 = vpop.f32.mrb[13].mxu1 }
 0x10f   :  { %v1252_v46 = vadd.f32 %v1251_v44, %v1250_v42  ;;  %v1297_v47 = vadd.f32 %v1296_v45, %v1295_v43  ;;  %v1253_v48 = vpop.f32.mrb[14].mxu0  ;;  %v1298_v49 = vpop.f32.mrb[14].mxu1 }
 0x110   :  { %v1254_v50 = vpop.f32.mrb[15].mxu0  ;;  %v1299_v51 = vpop.f32.mrb[15].mxu1 }
 0x115   :  { %v1400_v52 = vpop.f32.mrb[16].mxu0  ;;  %v1322_v53 = vpop.f32.mrb[16].mxu1 }
 0x116   :  { %v1858_v54 = vadd.f32 %v1400_v52, %v1240_v22  ;;  %v334_v55 = vpop.f32.mrb[17].mxu0  ;;  %v1323_v56 = vpop.f32.mrb[17].mxu1 }
 0x117   :  { %v1860_v57 = vadd.f32 %v1234_v10, %v334_v55  ;;  %v1324_v58 = vadd.f32 %v1323_v56, %v1322_v53  ;;  %v1401_v59 = vpop.f32.mrb[18].mxu0  ;;  %v1325_v60 = vpop.f32.mrb[18].mxu1 }
 0x118   :  { %v1862_v61 = vadd.f32 %v1401_v59, %v1243_v28  ;;  %v337_v62 = vpop.f32.mrb[19].mxu0  ;;  %v1326_v63 = vpop.f32.mrb[19].mxu1 }
 0x119   :  { %v1864_v0 = vadd.f32 %v1237_v16, %v337_v62  ;;  %v1327_v1 = vadd.f32 %v1326_v63, %v1325_v60 }
 0x11d   :  { %v1404_v2 = vpop.f32.mrb[20].mxu0  ;;  %v1328_v3 = vpop.f32.mrb[20].mxu1 }
 0x11e   :  { %v1866_v4 = vadd.f32 %v1404_v2, %v1252_v46  ;;  %v350_v5 = vpop.f32.mrb[21].mxu0  ;;  %v1329_v6 = vpop.f32.mrb[21].mxu1 }
 0x11f   :  { %v1868_v7 = vadd.f32 %v1246_v34, %v350_v5  ;;  %v1330_v8 = vadd.f32 %v1329_v6, %v1328_v3  ;;  %v1405_v9 = vpop.f32.mrb[22].mxu0  ;;  %v1331_v10 = vpop.f32.mrb[22].mxu1 }
 0x120   :  { %v353_v12 = vpop.f32.mrb[23].mxu0  ;;  %v1332_v13 = vpop.f32.mrb[23].mxu1 }
 0x121   :  { %v1870_v14 = vadd.f32 %v1249_v40, %v353_v12  ;;  %v1333_v15 = vadd.f32 %v1332_v13, %v1331_v10 }
 0x125   :  { %v1410_v18 = vpop.f32.mrb[24].mxu0  ;;  %v1334_v16 = vpop.f32.mrb[24].mxu1 }
 0x126   :  { %v553_v19 = vadd.f32 %v1410_v18, %v1285_v23  ;;  %v544_v20 = vpop.f32.mrb[25].mxu0  ;;  %v1335_v21 = vpop.f32.mrb[25].mxu1 }
 0x127   :  { %v545_v22 = vadd.f32 %v1850_v11, %v544_v20  ;;  %v1336_v24 = vadd.f32 %v1335_v21, %v1334_v16  ;;  %v1411_v25 = vpop.f32.mrb[26].mxu0  ;;  %v1337_v26 = vpop.f32.mrb[26].mxu1 }
 0x128   :  { %v576_v27 = vmax.f32 %v1858_v54, %v553_v19  ;;  %v556_v28 = vadd.f32 %v1411_v25, %v1288_v29  ;;  %v547_v30 = vpop.f32.mrb[27].mxu0  ;;  %v1338_v31 = vpop.f32.mrb[27].mxu1 }
 0x129   :  { %v574_v32 = vmax.f32 %v1860_v57, %v545_v22  ;;  %v548_v33 = vadd.f32 %v1852_v17, %v547_v30  ;;  %v1339_v34 = vadd.f32 %v1338_v31, %v1337_v26 }
 0x12a   :  { %v577_v36 = vmax.f32 %v1862_v61, %v556_v28 }
 0x12b   :  { %v575_v23 = vmax.f32 %v1864_v0, %v548_v33 }
 0x12d   :  { %v1414_v37 = vpop.f32.mrb[28].mxu0  ;;  %v1340_v38 = vpop.f32.mrb[28].mxu1 }
 0x12e   :  { %v569_v11 = vadd.f32 %v1414_v37, %v1297_v47  ;;  %v560_v39 = vpop.f32.mrb[29].mxu0  ;;  %v1341_v40 = vpop.f32.mrb[29].mxu1 }
 0x12f   :  { %v561_v42 = vadd.f32 %v1854_v35, %v560_v39  ;;  %v1342_v43 = vadd.f32 %v1341_v40, %v1340_v38  ;;  %v1415_v29 = vpop.f32.mrb[30].mxu0  ;;  %v1343_v44 = vpop.f32.mrb[30].mxu1 }
 0x130   :  { %v580_v45 = vmax.f32 %v1866_v4, %v569_v11  ;;  %v563_v46 = vpop.f32.mrb[31].mxu0  ;;  %v1344_v48 = vpop.f32.mrb[31].mxu1 }
 0x131   :  { %v578_v17 = vmax.f32 %v1868_v7, %v561_v42  ;;  %v564_v49 = vadd.f32 %v1856_v41, %v563_v46 }
 0x133   :  { %v579_v50 = vmax.f32 %v1870_v14, %v564_v49 }
 0x135   :  { %v1420_v51 = vpop.f32.mrb[32].mxu0  ;;  %v1367_v52 = vpop.f32.mrb[32].mxu1 }
 0x136   :  { %v770_v47 = vadd.f32 %v1420_v51, %v1330_v8  ;;  %v761_v53 = vpop.f32.mrb[33].mxu0  ;;  %v1368_v54 = vpop.f32.mrb[33].mxu1 }
 0x137   :  { %v762_v55 = vadd.f32 %v1324_v58, %v761_v53  ;;  %v1369_v35 = vadd.f32 %v1368_v54, %v1367_v52  ;;  %v1421_v56 = vpop.f32.mrb[34].mxu0  ;;  %v1370_v57 = vpop.f32.mrb[34].mxu1 }
 0x138   :  { %v793_v59 = vmax.f32 %v576_v27, %v770_v47  ;;  %v773_v60 = vadd.f32 %v1421_v56, %v1333_v15  ;;  %v764_v61 = vpop.f32.mrb[35].mxu0  ;;  %v1371_v62 = vpop.f32.mrb[35].mxu1  ;;  %v1201_v27 = vld [vmem:[%s1915_s2] ss:$0 sm:$0xff] }
 0x139   :  { %v791_v63 = vmax.f32 %v574_v32, %v762_v55  ;;  %v765_v0 = vadd.f32 %v1327_v1, %v764_v61  ;;  %v1372_v2 = vadd.f32 %v1371_v62, %v1370_v57 }
 0x13a   :  { %v794_v3 = vmax.f32 %v577_v36, %v773_v60 }
 0x13b   :  { %v792_v41 = vmax.f32 %v575_v23, %v765_v0 }
 0x13d   :  { %v1424_v4 = vpop.f32.mrb[36].mxu0  ;;  %v1373_v5 = vpop.f32.mrb[36].mxu1 }
 0x13e   :  { %v786_v6 = vadd.f32 %v1424_v4, %v1342_v43  ;;  %v777_v7 = vpop.f32.mrb[37].mxu0  ;;  %v1374_v8 = vpop.f32.mrb[37].mxu1 }
 0x13f   :  { %v778_v9 = vadd.f32 %v1336_v24, %v777_v7  ;;  %v1375_v10 = vadd.f32 %v1374_v8, %v1373_v5  ;;  %v1425_v58 = vpop.f32.mrb[38].mxu0  ;;  %v1376_v12 = vpop.f32.mrb[38].mxu1 }
 0x140   :  { %v797_v13 = vmax.f32 %v580_v45, %v786_v6  ;;  %v780_v14 = vpop.f32.mrb[39].mxu0  ;;  %v1377_v18 = vpop.f32.mrb[39].mxu1 }
 0x141   :  { %v795_v15 = vmax.f32 %v578_v17, %v778_v9  ;;  %v781_v16 = vadd.f32 %v1339_v34, %v780_v14  ;;  %v1378_v19 = vadd.f32 %v1377_v18, %v1376_v12 }
 0x143   :  { %v796_v20 = vmax.f32 %v579_v50, %v781_v16 }
 0x145   :  { %v1379_v1 = vpop.f32.mrb[40].mxu1  ;;  %v1430_v21 = vpop.f32.mrb[40].mxu0 }
 0x146   :  { %v987_v22 = vadd.f32 %v1430_v21, %v1375_v10  ;;  %v1380_v25 = vpop.f32.mrb[41].mxu1  ;;  %v978_v26 = vpop.f32.mrb[41].mxu0 }
 0x147   :  { %v1381_v24 = vadd.f32 %v1380_v25, %v1379_v1  ;;  %v979_v28 = vadd.f32 %v1369_v35, %v978_v26  ;;  %v1382_v30 = vpop.f32.mrb[42].mxu1  ;;  %v1431_v31 = vpop.f32.mrb[42].mxu0 }
 0x148   :  { %v1010_v32 = vmax.f32 %v793_v59, %v987_v22  ;;  %v990_v33 = vadd.f32 %v1431_v31, %v1378_v19  ;;  %v1383_v36 = vpop.f32.mrb[43].mxu1  ;;  %v981_v23 = vpop.f32.mrb[43].mxu0 }
 0x149   :  { %v1008_v34 = vmax.f32 %v791_v63, %v979_v28  ;;  %v1384_v37 = vadd.f32 %v1383_v36, %v1382_v30  ;;  %v982_v38 = vadd.f32 %v1372_v2, %v981_v23 }
 0x14a   :  { %v1024_v11 = vadd.f32 %v1201_v27, %v1010_v32  ;;  %v1011_v39 = vmax.f32 %v794_v3, %v990_v33 }
 0x14b   :  { %v1022_v40 = vadd.f32 %v1201_v27, %v1008_v34  ;;  %v1009_v42 = vmax.f32 %v792_v41, %v982_v38 }
 0x14c   :  { %v1031_v43 = vmax.f32 %v1024_v11, 0.0  ;;  %v1025_v29 = vadd.f32 %v1201_v27, %v1011_v39 }
 0x14d   :  { %v1029_v44 = vmax.f32 %v1022_v40, 0.0  ;;  %v1023_v45 = vadd.f32 %v1201_v27, %v1009_v42  ;;  %v1385_v46 = vpop.f32.mrb[44].mxu1  ;;  %v1434_v48 = vpop.f32.mrb[44].mxu0 }
 0x14e   :  { %v1211_v17 = vpack.c.bf16 %v1031_v43, %v1031_v43  ;;  %v1032_v49 = vmax.f32 %v1025_v29, 0.0  ;;  %v1386_v50 = vpop.f32.mrb[45].mxu1  ;;  %v994_v51 = vpop.f32.mrb[45].mxu0 }
 0x14f   :  { %v1209_v52 = vpack.c.bf16 %v1029_v44, %v1029_v44  ;;  %v1030_v47 = vmax.f32 %v1023_v45, 0.0  ;;  %v1387_v53 = vadd.f32 %v1386_v50, %v1385_v46  ;;  %v995_v54 = vadd.f32 %v1381_v24, %v994_v51  ;;  %v1388_v55 = vpop.f32.mrb[46].mxu1  ;;  %v1435_v35 = vpop.f32.mrb[46].mxu0 }
 0x150   :  { %1068 = vst.msk [vmem:[%s1916_s3 + $0x8] sm:$0xf] %vm1065_vm2, %v1211_v17  ;;  %v1212_v56 = vpack.c.bf16 %v1032_v49, %v1032_v49  ;;  %v1389_v57 = vpop.f32.mrb[47].mxu1  ;;  %v997_v59 = vpop.f32.mrb[47].mxu0 }
 0x151   :  { %1066 = vst.msk [vmem:[%s1916_s3] sm:$0xf] %vm1065_vm2, %v1209_v52  ;;  %v1210_v60 = vpack.c.bf16 %v1030_v47, %v1030_v47  ;;  %v1003_v61 = vadd.f32 %v1434_v48, %v1387_v53  ;;  %v1012_v62 = vmax.f32 %v795_v15, %v995_v54  ;;  %v998_v63 = vadd.f32 %v1384_v37, %v997_v59 }
 0x152   :  { %1069 = vst.msk [vmem:[%s1916_s3 + $0xc] sm:$0xf] %vm1065_vm2, %v1212_v56 }
 0x153   :  { %1067 = vst.msk [vmem:[%s1916_s3 + $0x4] sm:$0xf] %vm1065_vm2, %v1210_v60  ;;  %v1014_v0 = vmax.f32 %v797_v13, %v1003_v61  ;;  %v1026_v2 = vadd.f32 %v1201_v27, %v1012_v62  ;;  %v1013_v3 = vmax.f32 %v796_v20, %v998_v63 }
 0x155   :  { %v1028_v41 = vadd.f32 %v1201_v27, %v1014_v0  ;;  %v1033_v4 = vmax.f32 %v1026_v2, 0.0  ;;  %v1027_v5 = vadd.f32 %v1201_v27, %v1013_v3 }
 0x157   :  { %v1035_v6 = vmax.f32 %v1028_v41, 0.0  ;;  %v1213_v7 = vpack.c.bf16 %v1033_v4, %v1033_v4  ;;  %v1034_v8 = vmax.f32 %v1027_v5, 0.0 }
 0x159   :  { %v1215_v9 = vpack.c.bf16 %v1035_v6, %v1035_v6  ;;  %1070 = vst.msk [vmem:[%s1916_s3 + $0x10] sm:$0xf] %vm1065_vm2, %v1213_v7  ;;  %v1214_v10 = vpack.c.bf16 %v1034_v8, %v1034_v8 }
 0x15b   :  { %1073 = vst.msk [vmem:[%s1916_s3 + $0x18] sm:$0x1] %vm1072_vm3, %v1215_v9 }
 0x15c   :  { %1071 = vst.msk [vmem:[%s1916_s3 + $0x14] sm:$0xf] %vm1065_vm2, %v1214_v10 }

// kernel: lenet_forward.5
= control target key start
LH: loop header
LB: loop body
LE: loop exit
PB: predicated region body
PF: predicated region fallthrough
CT: control target
= control target key end

     0   :  { %v782_v36 = vlaneseq  ;;  %v8904_v37 = vmov 1966171168   ;;  %vm4172_vm0 = vcmask 654336   ;;  %s11584_s0 = inlined_call_operand.vmem [shape: bf16[2,2000], index: 0, kind: input, shape index: {}]   ;;  %s11585_s1 = inlined_call_operand.vmem [shape: bf16[2000,600], index: 1, kind: input, shape index: {}]   ;;  %s11586_s2 = inlined_call_operand.vmem [shape: f32[1,600], index: 2, kind: input, shape index: {}]   ;;  %s11587_s3 = inlined_call_operand.vmem [shape: bf16[600,420], index: 3, kind: input, shape index: {}]   ;;  %s11588_s4 = inlined_call_operand.vmem [shape: f32[1,420], index: 4, kind: input, shape index: {}]   ;;  %s11589_s5 = inlined_call_operand.vmem [shape: bf16[420,10], index: 5, kind: input, shape index: {}]   ;;  %s11590_s6 = inlined_call_operand.vmem [shape: f32[1,10], index: 6, kind: input, shape index: {}]   ;;  %s11591_s7 = inlined_call_operand.hbm [shape: f32[2,10], index: 7, kind: output, shape index: {}]  }
   0x1   :  { %v7748_v0 = vld [vmem:[%s11585_s1 + $0x4] ss:$20 sps:$4 sm:$0xff]   ;;  %v7750_v1 = vld [vmem:[%s11585_s1 + $0xc] ss:$20 sps:$4 sm:$0xff]   ;;  %v7753_v3 = vld [vmem:[%s11585_s1 + $0x8] ss:$20 sps:$4 sm:$0xff]   ;;  %v811_v38 = vunpack.c.l.s4 %v8904_v37 }
   0x2   :  { %4176 = vmatprep.subr.bf16.mxu0 %v7748_v0  ;;  %v7752_v2 = vld [vmem:[%s11585_s1] ss:$20 sps:$4 sm:$0xff]   ;;  %4504 = vmatprep.subr.bf16.mxu1 %v7750_v1  ;;  %v7758_v6 = vld [vmem:[%s11585_s1 + $0x28] ss:$20 sps:$4 sm:$0xff]   ;;  %v7759_v7 = vld [vmem:[%s11585_s1 + $0x30] ss:$20 sps:$4 sm:$0xff]  }
   0x3   :  { %v7754_v4 = vld [vmem:[%s11585_s1 + $0x2c] ss:$20 sps:$4 sm:$0xff]   ;;  %4177 = vmatpush1.bf16.msra.mxu0 %v7752_v2  ;;  %4505 = vmatpush1.bf16.msra.mxu1 %v7753_v3  ;;  %v7756_v5 = vld [vmem:[%s11585_s1 + $0x34] ss:$20 sps:$4 sm:$0xff]   ;;  %v7762_v9 = vld [vmem:[%s11585_s1 + $0x5c] ss:$20 sps:$4 sm:$0xff]   ;;  %v812_v43 = vunpack.c.0.s8 %v811_v38 }
   0x4   :  { %4178 = vmatprep.subr.bf16.mxu0 %v7754_v4  ;;  %4506 = vmatprep.subr.bf16.mxu1 %v7756_v5  ;;  %v7760_v8 = vld [vmem:[%s11585_s1 + $0x54] ss:$20 sps:$4 sm:$0xff]   ;;  %v7764_v10 = vld [vmem:[%s11585_s1 + $0x50] ss:$20 sps:$4 sm:$0xff]   ;;  %v7765_v11 = vld [vmem:[%s11585_s1 + $0x58] ss:$20 sps:$4 sm:$0xff]  }
   0x5   :  { %v7766_v12 = vld [vmem:[%s11585_s1 + $0x7c] ss:$20 sps:$4 sm:$0xff]   ;;  %v7768_v13 = vld [vmem:[%s11585_s1 + $0x84] ss:$20 sps:$4 sm:$0xff]   ;;  %v7771_v15 = vld [vmem:[%s11585_s1 + $0x80] ss:$20 sps:$4 sm:$0xff]  }
   0x6   :  { %v7770_v14 = vld [vmem:[%s11585_s1 + $0x78] ss:$20 sps:$4 sm:$0xff]   ;;  %v7776_v18 = vld [vmem:[%s11585_s1 + $0xa0] ss:$20 sps:$4 sm:$0xff]   ;;  %v7777_v19 = vld [vmem:[%s11585_s1 + $0xa8] ss:$20 sps:$4 sm:$0xff]  }
   0x7   :  { %4179 = vmatpush1.bf16.msra.mxu0 %v7758_v6  ;;  %4507 = vmatpush1.bf16.msra.mxu1 %v7759_v7  ;;  %v7772_v16 = vld [vmem:[%s11585_s1 + $0xa4] ss:$20 sps:$4 sm:$0xff]   ;;  %v7774_v17 = vld [vmem:[%s11585_s1 + $0xac] ss:$20 sps:$4 sm:$0xff]   ;;  %v7780_v21 = vld [vmem:[%s11585_s1 + $0xd4] ss:$20 sps:$4 sm:$0xff]  }
   0x8   :  { %4180 = vmatprep.subr.bf16.mxu0 %v7760_v8  ;;  %4508 = vmatprep.subr.bf16.mxu1 %v7762_v9  ;;  %v7778_v20 = vld [vmem:[%s11585_s1 + $0xcc] ss:$20 sps:$4 sm:$0xff]   ;;  %v7782_v22 = vld [vmem:[%s11585_s1 + $0xc8] ss:$20 sps:$4 sm:$0xff]   ;;  %v7783_v23 = vld [vmem:[%s11585_s1 + $0xd0] ss:$20 sps:$4 sm:$0xff]  }
   0x9   :  { %v7784_v24 = vld [vmem:[%s11585_s1 + $0xf4] ss:$20 sps:$4 sm:$0xff]   ;;  %v7786_v25 = vld [vmem:[%s11585_s1 + $0xfc] ss:$20 sps:$4 sm:$0xff]   ;;  %v7789_v27 = vld [vmem:[%s11585_s1 + $0xf8] ss:$20 sps:$4 sm:$0xff]  }
   0xa   :  { %v7788_v26 = vld [vmem:[%s11585_s1 + $0xf0] ss:$20 sps:$4 sm:$0xff]   ;;  %v7794_v30 = vld [vmem:[%s11585_s1 + $0x118] ss:$20 sps:$4 sm:$0xff]   ;;  %v7795_v31 = vld [vmem:[%s11585_s1 + $0x120] ss:$20 sps:$4 sm:$0xff]  }
   0xb   :  { %4181 = vmatpush1.bf16.msra.mxu0 %v7764_v10  ;;  %4509 = vmatpush1.bf16.msra.mxu1 %v7765_v11  ;;  %v7790_v28 = vld [vmem:[%s11585_s1 + $0x11c] ss:$20 sps:$4 sm:$0xff]   ;;  %v7792_v29 = vld [vmem:[%s11585_s1 + $0x124] ss:$20 sps:$4 sm:$0xff]   ;;  %v7798_v33 = vld [vmem:[%s11585_s1 + $0x14c] ss:$20 sps:$4 sm:$0xff]  }
   0xc   :  { %4182 = vmatprep.subr.bf16.mxu0 %v7766_v12  ;;  %4510 = vmatprep.subr.bf16.mxu1 %v7768_v13  ;;  %v7796_v32 = vld [vmem:[%s11585_s1 + $0x144] ss:$20 sps:$4 sm:$0xff]   ;;  %v7800_v34 = vld [vmem:[%s11585_s1 + $0x140] ss:$20 sps:$4 sm:$0xff]   ;;  %v7801_v35 = vld [vmem:[%s11585_s1 + $0x148] ss:$20 sps:$4 sm:$0xff]  }
   0xd   :  { %v7802_v39 = vld [vmem:[%s11585_s1 + $0x16c] ss:$20 sps:$4 sm:$0xff]   ;;  %v7804_v40 = vld [vmem:[%s11585_s1 + $0x174] ss:$20 sps:$4 sm:$0xff]   ;;  %v9064_v42 = vshrl.u32 %v782_v36, 7 }
   0xe   :  { %v7806_v41 = vld [vmem:[%s11585_s1 + $0x168] ss:$20 sps:$4 sm:$0xff]   ;;  %v7807_v44 = vld [vmem:[%s11585_s1 + $0x170] ss:$20 sps:$4 sm:$0xff]   ;;  %v7813_v48 = vld [vmem:[%s11585_s1 + $0x198] ss:$20 sps:$4 sm:$0xff]  }
   0xf   :  { %4183 = vmatpush1.bf16.msra.mxu0 %v7770_v14  ;;  %4511 = vmatpush1.bf16.msra.mxu1 %v7771_v15  ;;  %v7808_v45 = vld [vmem:[%s11585_s1 + $0x194] ss:$20 sps:$4 sm:$0xff]   ;;  %v7810_v46 = vld [vmem:[%s11585_s1 + $0x19c] ss:$20 sps:$4 sm:$0xff]   ;;  %v9082_v49 = vsub.s32 %v812_v43, %v9064_v42  ;;  %v7816_v51 = vld [vmem:[%s11585_s1 + $0x1c4] ss:$20 sps:$4 sm:$0xff]  }
  0x10   :  { %4184 = vmatprep.subr.bf16.mxu0 %v7772_v16  ;;  %4512 = vmatprep.subr.bf16.mxu1 %v7774_v17  ;;  %v7812_v47 = vld [vmem:[%s11585_s1 + $0x190] ss:$20 sps:$4 sm:$0xff]   ;;  %v7818_v53 = vld [vmem:[%s11585_s1 + $0x1b8] ss:$20 sps:$4 sm:$0xff]   ;;  %v7819_v55 = vld [vmem:[%s11585_s1 + $0x1c0] ss:$20 sps:$4 sm:$0xff]  }
  0x11   :  { %v7814_v50 = vld [vmem:[%s11585_s1 + $0x1bc] ss:$20 sps:$4 sm:$0xff]   ;;  %v9093_v52 = vld [vmem:[%s11584_s0] sm:$0xff]  ;;  %v7828_v63 = vld [vmem:[%s11585_s1 + $0x214] ss:$20 sps:$4 sm:$0xff]  }
  0x12   :  { %v816_v54 = vrot.slane %v9093_v52, %v9082_v49  ;;  %v7820_v56 = vld [vmem:[%s11585_s1 + $0x1e4] ss:$20 sps:$4 sm:$0xff]   ;;  %v7822_v57 = vld [vmem:[%s11585_s1 + $0x1ec] ss:$20 sps:$4 sm:$0xff]   ;;  %v7825_v61 = vld [vmem:[%s11585_s1 + $0x1e8] ss:$20 sps:$4 sm:$0xff]  }
  0x13   :  { %4185 = vmatpush1.bf16.msra.mxu0 %v7776_v18  ;;  %4513 = vmatpush1.bf16.msra.mxu1 %v7777_v19  ;;  %v7824_v59 = vld [vmem:[%s11585_s1 + $0x1e0] ss:$20 sps:$4 sm:$0xff]   ;;  %v7830_v0 = vld [vmem:[%s11585_s1 + $0x208] ss:$20 sps:$4 sm:$0xff]   ;;  %v7831_v1 = vld [vmem:[%s11585_s1 + $0x210] ss:$20 sps:$4 sm:$0xff]  }
  0x14   :  { %4186 = vmatprep.subr.bf16.mxu0 %v7778_v20  ;;  %4514 = vmatprep.subr.bf16.mxu1 %v7780_v21  ;;  %v824_v58 = vcombine.high %v816_v54, %v816_v54  ;;  %v7826_v62 = vld [vmem:[%s11585_s1 + $0x20c] ss:$20 sps:$4 sm:$0xff]   ;;  %v7832_v2 = vld [vmem:[%s11585_s1 + $0x234] ss:$20 sps:$4 sm:$0xff]   ;;  %v7834_v3 = vld [vmem:[%s11585_s1 + $0x23c] ss:$20 sps:$4 sm:$0xff]   ;;  %v9166_v13 = vrot.slane %v816_v54, %v9082_v49 }
  0x15   :  { %v7836_v4 = vld [vmem:[%s11585_s1 + $0x230] ss:$20 sps:$4 sm:$0xff]   ;;  %v7837_v5 = vld [vmem:[%s11585_s1 + $0x238] ss:$20 sps:$4 sm:$0xff]   ;;  %v7843_v9 = vld [vmem:[%s11585_s1 + $0x260] ss:$20 sps:$4 sm:$0xff]  }
  0x16   :  { %v9113_v60 = vrot.slane %v824_v58, %v9082_v49  ;;  %v7838_v6 = vld [vmem:[%s11585_s1 + $0x25c] ss:$20 sps:$4 sm:$0xff]   ;;  %v7840_v7 = vld [vmem:[%s11585_s1 + $0x264] ss:$20 sps:$4 sm:$0xff]   ;;  %v7849_v11 = vld [vmem:[%s11585_s1 + $0x28c] ss:$20 sps:$4 sm:$0xff]  }
  0x17   :  { %4187 = vmatpush1.bf16.msra.mxu0 %v7782_v22  ;;  %4515 = vmatpush1.bf16.msra.mxu1 %v7783_v23  ;;  %v7842_v8 = vld [vmem:[%s11585_s1 + $0x258] ss:$20 sps:$4 sm:$0xff]   ;;  %v7844_v12 = vld [vmem:[%s11585_s1 + $0x280] ss:$20 sps:$4 sm:$0xff]   ;;  %v7847_v14 = vld [vmem:[%s11585_s1 + $0x288] ss:$20 sps:$4 sm:$0xff]  }
  0x18   :  { %4188 = vmatprep.subr.bf16.mxu0 %v7784_v24  ;;  %4516 = vmatprep.subr.bf16.mxu1 %v7786_v25  ;;  %v7846_v10 = vld [vmem:[%s11585_s1 + $0x284] ss:$20 sps:$4 sm:$0xff]   ;;  %v7852_v15 = vld [vmem:[%s11585_s1 + $0x2ac] ss:$20 sps:$4 sm:$0xff]   ;;  %v7855_v16 = vld [vmem:[%s11585_s1 + $0x2b4] ss:$20 sps:$4 sm:$0xff]   ;;  %v9179_v17 = vcombine.high %v9113_v60, %v9113_v60 }
  0x19   :  { %4208 = vmatprep.mubr.bf16.mxu0 %v9113_v60  ;;  %4536 = vmatprep.mubr.bf16.mxu1 %v9113_v60  ;;  %v7850_v18 = vld [vmem:[%s11585_s1 + $0x2a8] ss:$20 sps:$4 sm:$0xff]   ;;  %v7853_v19 = vld [vmem:[%s11585_s1 + $0x2b0] ss:$20 sps:$4 sm:$0xff]   ;;  %v7859_v23 = vld [vmem:[%s11585_s1 + $0x2d8] ss:$20 sps:$4 sm:$0xff]  }
  0x1a   :  { %v7858_v20 = vld [vmem:[%s11585_s1 + $0x2d4] ss:$20 sps:$4 sm:$0xff]   ;;  %v7861_v21 = vld [vmem:[%s11585_s1 + $0x2dc] ss:$20 sps:$4 sm:$0xff]   ;;  %v7867_v25 = vld [vmem:[%s11585_s1 + $0x304] ss:$20 sps:$4 sm:$0xff]  }
  0x1b   :  { %4189 = vmatpush1.bf16.msra.mxu0 %v7788_v26  ;;  %4517 = vmatpush1.bf16.msra.mxu1 %v7789_v27  ;;  %v7856_v22 = vld [vmem:[%s11585_s1 + $0x2d0] ss:$20 sps:$4 sm:$0xff]   ;;  %v7862_v26 = vld [vmem:[%s11585_s1 + $0x2f8] ss:$20 sps:$4 sm:$0xff]   ;;  %v7865_v27 = vld [vmem:[%s11585_s1 + $0x300] ss:$20 sps:$4 sm:$0xff]  }
  0x1c   :  { %4190 = vmatprep.subr.bf16.mxu0 %v7790_v28  ;;  %4518 = vmatprep.subr.bf16.mxu1 %v7792_v29  ;;  %v7864_v24 = vld [vmem:[%s11585_s1 + $0x2fc] ss:$20 sps:$4 sm:$0xff]   ;;  %v7870_v28 = vld [vmem:[%s11585_s1 + $0x324] ss:$20 sps:$4 sm:$0xff]   ;;  %v7873_v29 = vld [vmem:[%s11585_s1 + $0x32c] ss:$20 sps:$4 sm:$0xff]  }
  0x1d   :  { %v7882_v36 = vld [vmem:[%s11585_s1 + $0x374] ss:$20 sps:$4 sm:$0xff]   ;;  %v7885_v37 = vld [vmem:[%s11585_s1 + $0x37c] ss:$20 sps:$4 sm:$0xff]   ;;  %v7886_v43 = vld [vmem:[%s11585_s1 + $0x398] ss:$20 sps:$4 sm:$0xff]  }
  0x1e   :  { %v7880_v38 = vld [vmem:[%s11585_s1 + $0x370] ss:$20 sps:$4 sm:$0xff]   ;;  %v7907_v58 = vld [vmem:[%s11585_s1 + $0x418] ss:$20 sps:$4 sm:$0xff]  }
  0x1f   :  { %4191 = vmatpush1.bf16.msra.mxu0 %v7794_v30  ;;  %4519 = vmatpush1.bf16.msra.mxu1 %v7795_v31  ;;  %v7868_v30 = vld [vmem:[%s11585_s1 + $0x320] ss:$20 sps:$4 sm:$0xff]   ;;  %v7871_v31 = vld [vmem:[%s11585_s1 + $0x328] ss:$20 sps:$4 sm:$0xff]   ;;  %v7901_v54 = vld [vmem:[%s11585_s1 + $0x3f0] ss:$20 sps:$4 sm:$0xff]  }
  0x20   :  { %4192 = vmatprep.subr.bf16.mxu0 %v7796_v32  ;;  %4520 = vmatprep.subr.bf16.mxu1 %v7798_v33  ;;  %v7876_v32 = vld [vmem:[%s11585_s1 + $0x34c] ss:$20 sps:$4 sm:$0xff]   ;;  %v7879_v33 = vld [vmem:[%s11585_s1 + $0x354] ss:$20 sps:$4 sm:$0xff]  }
  0x23   :  { %4193 = vmatpush1.bf16.msra.mxu0 %v7800_v34  ;;  %4521 = vmatpush1.bf16.msra.mxu1 %v7801_v35  ;;  %v7874_v34 = vld [vmem:[%s11585_s1 + $0x348] ss:$20 sps:$4 sm:$0xff]   ;;  %v7877_v35 = vld [vmem:[%s11585_s1 + $0x350] ss:$20 sps:$4 sm:$0xff]  }
  0x24   :  { %4194 = vmatprep.subr.bf16.mxu0 %v7802_v39  ;;  %4522 = vmatprep.subr.bf16.mxu1 %v7804_v40  ;;  %v7883_v39 = vld [vmem:[%s11585_s1 + $0x378] ss:$20 sps:$4 sm:$0xff]   ;;  %v7888_v40 = vld [vmem:[%s11585_s1 + $0x39c] ss:$20 sps:$4 sm:$0xff]  }
  0x27   :  { %4195 = vmatpush1.bf16.msra.mxu0 %v7806_v41  ;;  %4523 = vmatpush1.bf16.msra.mxu1 %v7807_v44  ;;  %v7891_v41 = vld [vmem:[%s11585_s1 + $0x3a4] ss:$20 sps:$4 sm:$0xff]   ;;  %v7889_v44 = vld [vmem:[%s11585_s1 + $0x3a0] ss:$20 sps:$4 sm:$0xff]  }
  0x28   :  { %4196 = vmatprep.subr.bf16.mxu0 %v7808_v45  ;;  %4524 = vmatprep.subr.bf16.mxu1 %v7810_v46  ;;  %v7894_v45 = vld [vmem:[%s11585_s1 + $0x3c4] ss:$20 sps:$4 sm:$0xff]   ;;  %v7897_v46 = vld [vmem:[%s11585_s1 + $0x3cc] ss:$20 sps:$4 sm:$0xff]  }
  0x2b   :  { %4197 = vmatpush1.bf16.msra.mxu0 %v7812_v47  ;;  %4525 = vmatpush1.bf16.msra.mxu1 %v7813_v48  ;;  %v7892_v47 = vld [vmem:[%s11585_s1 + $0x3c0] ss:$20 sps:$4 sm:$0xff]   ;;  %v7895_v48 = vld [vmem:[%s11585_s1 + $0x3c8] ss:$20 sps:$4 sm:$0xff]  }
  0x2c   :  { %4198 = vmatprep.subr.bf16.mxu0 %v7814_v50  ;;  %4526 = vmatprep.subr.bf16.mxu1 %v7816_v51  ;;  %v7900_v50 = vld [vmem:[%s11585_s1 + $0x3ec] ss:$20 sps:$4 sm:$0xff]   ;;  %v7903_v51 = vld [vmem:[%s11585_s1 + $0x3f4] ss:$20 sps:$4 sm:$0xff]  }
  0x2f   :  { %4199 = vmatpush1.bf16.msra.mxu0 %v7818_v53  ;;  %4527 = vmatpush1.bf16.msra.mxu1 %v7819_v55  ;;  %v7898_v53 = vld [vmem:[%s11585_s1 + $0x3e8] ss:$20 sps:$4 sm:$0xff]  }
  0x30   :  { %4200 = vmatprep.subr.bf16.mxu0 %v7820_v56  ;;  %4528 = vmatprep.subr.bf16.mxu1 %v7822_v57  ;;  %v7906_v55 = vld [vmem:[%s11585_s1 + $0x414] ss:$20 sps:$4 sm:$0xff]   ;;  %v7909_v56 = vld [vmem:[%s11585_s1 + $0x41c] ss:$20 sps:$4 sm:$0xff]  }
  0x31   :  { %v7904_v57 = vld [vmem:[%s11585_s1 + $0x410] ss:$20 sps:$4 sm:$0xff]  }
  0x33   :  { %4201 = vmatpush1.bf16.msra.mxu0 %v7824_v59  ;;  %4529 = vmatpush1.bf16.msra.mxu1 %v7825_v61  ;;  %v7912_v59 = vld [vmem:[%s11585_s1 + $0x43c] ss:$20 sps:$4 sm:$0xff]   ;;  %v7915_v61 = vld [vmem:[%s11585_s1 + $0x444] ss:$20 sps:$4 sm:$0xff]  }
  0x34   :  { %4202 = vmatprep.subr.bf16.mxu0 %v7826_v62  ;;  %4530 = vmatprep.subr.bf16.mxu1 %v7828_v63  ;;  %v7910_v62 = vld [vmem:[%s11585_s1 + $0x438] ss:$20 sps:$4 sm:$0xff]   ;;  %v7913_v63 = vld [vmem:[%s11585_s1 + $0x440] ss:$20 sps:$4 sm:$0xff]  }
  0x37   :  { %4203 = vmatpush1.bf16.msra.mxu0 %v7830_v0  ;;  %4531 = vmatpush1.bf16.msra.mxu1 %v7831_v1  ;;  %v7918_v0 = vld [vmem:[%s11585_s1 + $0x464] ss:$20 sps:$4 sm:$0xff]   ;;  %v7921_v1 = vld [vmem:[%s11585_s1 + $0x46c] ss:$20 sps:$4 sm:$0xff]  }
  0x38   :  { %4204 = vmatprep.subr.bf16.mxu0 %v7832_v2  ;;  %4532 = vmatprep.subr.bf16.mxu1 %v7834_v3  ;;  %v7916_v2 = vld [vmem:[%s11585_s1 + $0x460] ss:$20 sps:$4 sm:$0xff]   ;;  %v7919_v3 = vld [vmem:[%s11585_s1 + $0x468] ss:$20 sps:$4 sm:$0xff]  }
  0x3b   :  { %4205 = vmatpush1.bf16.msra.mxu0 %v7836_v4  ;;  %4533 = vmatpush1.bf16.msra.mxu1 %v7837_v5  ;;  %v7924_v4 = vld [vmem:[%s11585_s1 + $0x48c] ss:$20 sps:$4 sm:$0xff]   ;;  %v7927_v5 = vld [vmem:[%s11585_s1 + $0x494] ss:$20 sps:$4 sm:$0xff]  }
  0x3c   :  { %4206 = vmatprep.subr.bf16.mxu0 %v7838_v6  ;;  %4534 = vmatprep.subr.bf16.mxu1 %v7840_v7  ;;  %v7922_v6 = vld [vmem:[%s11585_s1 + $0x488] ss:$20 sps:$4 sm:$0xff]   ;;  %v7925_v7 = vld [vmem:[%s11585_s1 + $0x490] ss:$20 sps:$4 sm:$0xff]  }
  0x3f   :  { %4207 = vmatpush1.bf16.msra.mxu0 %v7842_v8  ;;  %4535 = vmatpush1.bf16.msra.mxu1 %v7843_v9  ;;  %v7930_v8 = vld [vmem:[%s11585_s1 + $0x4b4] ss:$20 sps:$4 sm:$0xff]   ;;  %v7933_v9 = vld [vmem:[%s11585_s1 + $0x4bc] ss:$20 sps:$4 sm:$0xff]  }
  0x40   :  { %4217 = vmatprep.subr.bf16.mxu0 %v7846_v10  ;;  %4545 = vmatprep.subr.bf16.mxu1 %v7849_v11  ;;  %v809_v10 = vcombine.high %v9093_v52, %v9093_v52  ;;  %v7928_v11 = vld [vmem:[%s11585_s1 + $0x4b0] ss:$20 sps:$4 sm:$0xff]  }
  0x41   :  { %v7939_v52 = vld [vmem:[%s11585_s1 + $0x4e4] ss:$20 sps:$4 sm:$0xff]  }
  0x42   :  { %4209 = vmatmul.mubr.bf16.vlgmr.msra.gmra.mrb[0].mxu0 %v9166_v13  ;;  %4537 = vmatmul.mubr.bf16.vlgmr.msra.gmra.mrb[0].mxu1 %v9166_v13 }
  0x43   :  { %4218 = vmatpush1.bf16.msra.mxu0 %v7844_v12  ;;  %4546 = vmatpush1.bf16.msra.mxu1 %v7847_v14  ;;  %v7931_v12 = vld [vmem:[%s11585_s1 + $0x4b8] ss:$20 sps:$4 sm:$0xff]   ;;  %v7936_v14 = vld [vmem:[%s11585_s1 + $0x4dc] ss:$20 sps:$4 sm:$0xff]  }
  0x44   :  { %4219 = vmatprep.subr.bf16.mxu0 %v7852_v15  ;;  %4547 = vmatprep.subr.bf16.mxu1 %v7855_v16  ;;  %v9356_v15 = vrot.slane %v809_v10, %v9082_v49  ;;  %v7934_v16 = vld [vmem:[%s11585_s1 + $0x4d8] ss:$20 sps:$4 sm:$0xff]  }
  0x45   :  { %4249 = vmatprep.mubr.bf16.mxu0 %v9179_v17  ;;  %4577 = vmatprep.mubr.bf16.mxu1 %v9179_v17  ;;  %v8014_v10 = vld [vmem:[%s11585_s1 + $0x6e4] ss:$20 sps:$4 sm:$0xff]  }
  0x47   :  { %4220 = vmatpush1.bf16.msra.mxu0 %v7850_v18  ;;  %4548 = vmatpush1.bf16.msra.mxu1 %v7853_v19  ;;  %v7937_v18 = vld [vmem:[%s11585_s1 + $0x4e0] ss:$20 sps:$4 sm:$0xff]   ;;  %v7942_v19 = vld [vmem:[%s11585_s1 + $0x504] ss:$20 sps:$4 sm:$0xff]  }
  0x48   :  { %4221 = vmatprep.subr.bf16.mxu0 %v7858_v20  ;;  %4549 = vmatprep.subr.bf16.mxu1 %v7861_v21  ;;  %v7945_v20 = vld [vmem:[%s11585_s1 + $0x50c] ss:$20 sps:$4 sm:$0xff]   ;;  %v825_v21 = vcombine.high %v9356_v15, %v9356_v15 }
  0x4b   :  { %4222 = vmatpush1.bf16.msra.mxu0 %v7856_v22  ;;  %4550 = vmatpush1.bf16.msra.mxu1 %v7859_v23  ;;  %v7940_v22 = vld [vmem:[%s11585_s1 + $0x500] ss:$20 sps:$4 sm:$0xff]   ;;  %v9377_v23 = vcombine.high %v9166_v13, %v9166_v13 }
  0x4c   :  { %4223 = vmatprep.subr.bf16.mxu0 %v7864_v24  ;;  %4551 = vmatprep.subr.bf16.mxu1 %v7867_v25  ;;  %v7943_v24 = vld [vmem:[%s11585_s1 + $0x508] ss:$20 sps:$4 sm:$0xff]   ;;  %v7948_v25 = vld [vmem:[%s11585_s1 + $0x52c] ss:$20 sps:$4 sm:$0xff]  }
  0x4f   :  { %4224 = vmatpush1.bf16.msra.mxu0 %v7862_v26  ;;  %4552 = vmatpush1.bf16.msra.mxu1 %v7865_v27  ;;  %v7951_v26 = vld [vmem:[%s11585_s1 + $0x534] ss:$20 sps:$4 sm:$0xff]   ;;  %v9389_v27 = vrot.slane %v825_v21, %v9082_v49  ;;  %v8029_v21 = vld [vmem:[%s11585_s1 + $0x73c] ss:$20 sps:$4 sm:$0xff]  }
  0x50   :  { %4225 = vmatprep.subr.bf16.mxu0 %v7870_v28  ;;  %4553 = vmatprep.subr.bf16.mxu1 %v7873_v29  ;;  %v7946_v28 = vld [vmem:[%s11585_s1 + $0x528] ss:$20 sps:$4 sm:$0xff]   ;;  %v7949_v29 = vld [vmem:[%s11585_s1 + $0x530] ss:$20 sps:$4 sm:$0xff]  }
  0x53   :  { %4226 = vmatpush1.bf16.msra.mxu0 %v7868_v30  ;;  %4554 = vmatpush1.bf16.msra.mxu1 %v7871_v31  ;;  %v7954_v30 = vld [vmem:[%s11585_s1 + $0x554] ss:$20 sps:$4 sm:$0xff]   ;;  %v7957_v31 = vld [vmem:[%s11585_s1 + $0x55c] ss:$20 sps:$4 sm:$0xff]  }
  0x54   :  { %4227 = vmatprep.subr.bf16.mxu0 %v7876_v32  ;;  %4555 = vmatprep.subr.bf16.mxu1 %v7879_v33  ;;  %v7952_v32 = vld [vmem:[%s11585_s1 + $0x550] ss:$20 sps:$4 sm:$0xff]   ;;  %v7955_v33 = vld [vmem:[%s11585_s1 + $0x558] ss:$20 sps:$4 sm:$0xff]  }
  0x57   :  { %4228 = vmatpush1.bf16.msra.mxu0 %v7874_v34  ;;  %4556 = vmatpush1.bf16.msra.mxu1 %v7877_v35  ;;  %v7960_v34 = vld [vmem:[%s11585_s1 + $0x57c] ss:$20 sps:$4 sm:$0xff]   ;;  %v7963_v35 = vld [vmem:[%s11585_s1 + $0x584] ss:$20 sps:$4 sm:$0xff]  }
  0x58   :  { %4229 = vmatprep.subr.bf16.mxu0 %v7882_v36  ;;  %4557 = vmatprep.subr.bf16.mxu1 %v7885_v37  ;;  %v7958_v36 = vld [vmem:[%s11585_s1 + $0x578] ss:$20 sps:$4 sm:$0xff]   ;;  %v7961_v37 = vld [vmem:[%s11585_s1 + $0x580] ss:$20 sps:$4 sm:$0xff]  }
  0x5b   :  { %4230 = vmatpush1.bf16.msra.mxu0 %v7880_v38  ;;  %4558 = vmatpush1.bf16.msra.mxu1 %v7883_v39  ;;  %v7966_v38 = vld [vmem:[%s11585_s1 + $0x5a4] ss:$20 sps:$4 sm:$0xff]   ;;  %v7969_v39 = vld [vmem:[%s11585_s1 + $0x5ac] ss:$20 sps:$4 sm:$0xff]  }
  0x5c   :  { %4231 = vmatprep.subr.bf16.mxu0 %v7888_v40  ;;  %4559 = vmatprep.subr.bf16.mxu1 %v7891_v41  ;;  %v7964_v40 = vld [vmem:[%s11585_s1 + $0x5a0] ss:$20 sps:$4 sm:$0xff]   ;;  %v7967_v41 = vld [vmem:[%s11585_s1 + $0x5a8] ss:$20 sps:$4 sm:$0xff]  }
  0x5f   :  { %4232 = vmatpush1.bf16.msra.mxu0 %v7886_v43  ;;  %4560 = vmatpush1.bf16.msra.mxu1 %v7889_v44  ;;  %v7972_v43 = vld [vmem:[%s11585_s1 + $0x5cc] ss:$20 sps:$4 sm:$0xff]   ;;  %v7975_v44 = vld [vmem:[%s11585_s1 + $0x5d4] ss:$20 sps:$4 sm:$0xff]  }
  0x60   :  { %4233 = vmatprep.subr.bf16.mxu0 %v7894_v45  ;;  %4561 = vmatprep.subr.bf16.mxu1 %v7897_v46  ;;  %v7970_v45 = vld [vmem:[%s11585_s1 + $0x5c8] ss:$20 sps:$4 sm:$0xff]   ;;  %v7973_v46 = vld [vmem:[%s11585_s1 + $0x5d0] ss:$20 sps:$4 sm:$0xff]  }
  0x63   :  { %4234 = vmatpush1.bf16.msra.mxu0 %v7892_v47  ;;  %4562 = vmatpush1.bf16.msra.mxu1 %v7895_v48  ;;  %v7978_v47 = vld [vmem:[%s11585_s1 + $0x5f4] ss:$20 sps:$4 sm:$0xff]   ;;  %v7981_v48 = vld [vmem:[%s11585_s1 + $0x5fc] ss:$20 sps:$4 sm:$0xff]  }
  0x64   :  { %4235 = vmatprep.subr.bf16.mxu0 %v7900_v50  ;;  %4563 = vmatprep.subr.bf16.mxu1 %v7903_v51  ;;  %v7976_v50 = vld [vmem:[%s11585_s1 + $0x5f0] ss:$20 sps:$4 sm:$0xff]   ;;  %v7979_v51 = vld [vmem:[%s11585_s1 + $0x5f8] ss:$20 sps:$4 sm:$0xff]  }
  0x67   :  { %4236 = vmatpush1.bf16.msra.mxu0 %v7898_v53  ;;  %4564 = vmatpush1.bf16.msra.mxu1 %v7901_v54  ;;  %v7984_v53 = vld [vmem:[%s11585_s1 + $0x61c] ss:$20 sps:$4 sm:$0xff]   ;;  %v7987_v54 = vld [vmem:[%s11585_s1 + $0x624] ss:$20 sps:$4 sm:$0xff]  }
  0x68   :  { %4237 = vmatprep.subr.bf16.mxu0 %v7906_v55  ;;  %4565 = vmatprep.subr.bf16.mxu1 %v7909_v56  ;;  %v7982_v55 = vld [vmem:[%s11585_s1 + $0x618] ss:$20 sps:$4 sm:$0xff]   ;;  %v7985_v56 = vld [vmem:[%s11585_s1 + $0x620] ss:$20 sps:$4 sm:$0xff]  }
  0x6b   :  { %4238 = vmatpush1.bf16.msra.mxu0 %v7904_v57  ;;  %4566 = vmatpush1.bf16.msra.mxu1 %v7907_v58  ;;  %v7990_v57 = vld [vmem:[%s11585_s1 + $0x644] ss:$20 sps:$4 sm:$0xff]   ;;  %v7993_v58 = vld [vmem:[%s11585_s1 + $0x64c] ss:$20 sps:$4 sm:$0xff]  }
  0x6c   :  { %4239 = vmatprep.subr.bf16.mxu0 %v7912_v59  ;;  %4567 = vmatprep.subr.bf16.mxu1 %v7915_v61  ;;  %v7988_v59 = vld [vmem:[%s11585_s1 + $0x640] ss:$20 sps:$4 sm:$0xff]   ;;  %v7991_v61 = vld [vmem:[%s11585_s1 + $0x648] ss:$20 sps:$4 sm:$0xff]  }
  0x6f   :  { %4240 = vmatpush1.bf16.msra.mxu0 %v7910_v62  ;;  %4568 = vmatpush1.bf16.msra.mxu1 %v7913_v63  ;;  %v7996_v62 = vld [vmem:[%s11585_s1 + $0x66c] ss:$20 sps:$4 sm:$0xff]   ;;  %v7999_v63 = vld [vmem:[%s11585_s1 + $0x674] ss:$20 sps:$4 sm:$0xff]  }
  0x70   :  { %4241 = vmatprep.subr.bf16.mxu0 %v7918_v0  ;;  %4569 = vmatprep.subr.bf16.mxu1 %v7921_v1  ;;  %v7994_v0 = vld [vmem:[%s11585_s1 + $0x668] ss:$20 sps:$4 sm:$0xff]   ;;  %v7997_v1 = vld [vmem:[%s11585_s1 + $0x670] ss:$20 sps:$4 sm:$0xff]  }
  0x73   :  { %4242 = vmatpush1.bf16.msra.mxu0 %v7916_v2  ;;  %4570 = vmatpush1.bf16.msra.mxu1 %v7919_v3  ;;  %v8002_v2 = vld [vmem:[%s11585_s1 + $0x694] ss:$20 sps:$4 sm:$0xff]   ;;  %v8005_v3 = vld [vmem:[%s11585_s1 + $0x69c] ss:$20 sps:$4 sm:$0xff]  }
  0x74   :  { %4243 = vmatprep.subr.bf16.mxu0 %v7924_v4  ;;  %4571 = vmatprep.subr.bf16.mxu1 %v7927_v5  ;;  %v8000_v4 = vld [vmem:[%s11585_s1 + $0x690] ss:$20 sps:$4 sm:$0xff]   ;;  %v8003_v5 = vld [vmem:[%s11585_s1 + $0x698] ss:$20 sps:$4 sm:$0xff]  }
  0x77   :  { %4244 = vmatpush1.bf16.msra.mxu0 %v7922_v6  ;;  %4572 = vmatpush1.bf16.msra.mxu1 %v7925_v7  ;;  %v8008_v6 = vld [vmem:[%s11585_s1 + $0x6bc] ss:$20 sps:$4 sm:$0xff]   ;;  %v8011_v7 = vld [vmem:[%s11585_s1 + $0x6c4] ss:$20 sps:$4 sm:$0xff]  }
  0x78   :  { %4245 = vmatprep.subr.bf16.mxu0 %v7930_v8  ;;  %4573 = vmatprep.subr.bf16.mxu1 %v7933_v9  ;;  %v8006_v8 = vld [vmem:[%s11585_s1 + $0x6b8] ss:$20 sps:$4 sm:$0xff]   ;;  %v8009_v9 = vld [vmem:[%s11585_s1 + $0x6c0] ss:$20 sps:$4 sm:$0xff]  }
  0x7b   :  { %4246 = vmatpush1.bf16.msra.mxu0 %v7928_v11  ;;  %4574 = vmatpush1.bf16.msra.mxu1 %v7931_v12  ;;  %v8017_v11 = vld [vmem:[%s11585_s1 + $0x6ec] ss:$20 sps:$4 sm:$0xff]  }
  0x7c   :  { %4247 = vmatprep.subr.bf16.mxu0 %v7936_v14  ;;  %4575 = vmatprep.subr.bf16.mxu1 %v7939_v52  ;;  %v8012_v12 = vld [vmem:[%s11585_s1 + $0x6e0] ss:$20 sps:$4 sm:$0xff]   ;;  %v8015_v14 = vld [vmem:[%s11585_s1 + $0x6e8] ss:$20 sps:$4 sm:$0xff]  }
  0x7d   :  { %v8020_v52 = vld [vmem:[%s11585_s1 + $0x70c] ss:$20 sps:$4 sm:$0xff]  }
  0x7f   :  { %4248 = vmatpush1.bf16.msra.mxu0 %v7934_v16  ;;  %4576 = vmatpush1.bf16.msra.mxu1 %v7937_v18  ;;  %v8023_v16 = vld [vmem:[%s11585_s1 + $0x714] ss:$20 sps:$4 sm:$0xff]  }
  0x80   :  { %4258 = vmatprep.subr.bf16.mxu0 %v7942_v19  ;;  %4586 = vmatprep.subr.bf16.mxu1 %v7945_v20  ;;  %v8018_v18 = vld [vmem:[%s11585_s1 + $0x708] ss:$20 sps:$4 sm:$0xff]   ;;  %v8021_v19 = vld [vmem:[%s11585_s1 + $0x710] ss:$20 sps:$4 sm:$0xff]  }
  0x81   :  { %v8026_v20 = vld [vmem:[%s11585_s1 + $0x734] ss:$20 sps:$4 sm:$0xff]  }
  0x82   :  { %4250 = vmatmul.mubr.bf16.vlgmr.msra.gmra.mrb[0].mxu0 %v9377_v23  ;;  %4578 = vmatmul.mubr.bf16.vlgmr.msra.gmra.mrb[0].mxu1 %v9377_v23 }
  0x83   :  { %4259 = vmatpush1.bf16.msra.mxu0 %v7940_v22  ;;  %4587 = vmatpush1.bf16.msra.mxu1 %v7943_v24  ;;  %v8024_v22 = vld [vmem:[%s11585_s1 + $0x730] ss:$20 sps:$4 sm:$0xff]   ;;  %v8027_v24 = vld [vmem:[%s11585_s1 + $0x738] ss:$20 sps:$4 sm:$0xff]  }
  0x84   :  { %4260 = vmatprep.subr.bf16.mxu0 %v7948_v25  ;;  %4588 = vmatprep.subr.bf16.mxu1 %v7951_v26  ;;  %v8032_v25 = vld [vmem:[%s11585_s1 + $0x75c] ss:$20 sps:$4 sm:$0xff]   ;;  %v8035_v26 = vld [vmem:[%s11585_s1 + $0x764] ss:$20 sps:$4 sm:$0xff]  }
  0x85   :  { %4290 = vmatprep.mubr.bf16.mxu0 %v9389_v27  ;;  %4618 = vmatprep.mubr.bf16.mxu1 %v9389_v27 }
  0x87   :  { %4261 = vmatpush1.bf16.msra.mxu0 %v7946_v28  ;;  %4589 = vmatpush1.bf16.msra.mxu1 %v7949_v29  ;;  %v8030_v28 = vld [vmem:[%s11585_s1 + $0x758] ss:$20 sps:$4 sm:$0xff]   ;;  %v8033_v29 = vld [vmem:[%s11585_s1 + $0x760] ss:$20 sps:$4 sm:$0xff]  }
  0x88   :  { %4262 = vmatprep.subr.bf16.mxu0 %v7954_v30  ;;  %4590 = vmatprep.subr.bf16.mxu1 %v7957_v31  ;;  %v8039_v30 = vld [vmem:[%s11585_s1 + $0x784] ss:$20 sps:$4 sm:$0xff]   ;;  %v8042_v31 = vld [vmem:[%s11585_s1 + $0x78c] ss:$20 sps:$4 sm:$0xff]  }
  0x8b   :  { %4263 = vmatpush1.bf16.msra.mxu0 %v7952_v32  ;;  %4591 = vmatpush1.bf16.msra.mxu1 %v7955_v33  ;;  %v8037_v32 = vld [vmem:[%s11585_s1 + $0x780] ss:$20 sps:$4 sm:$0xff]   ;;  %v9580_v33 = vrot.slane %v9356_v15, %v9082_v49  ;;  %v9593_v15 = vcombine.high %v9389_v27, %v9389_v27 }
  0x8c   :  { %4264 = vmatprep.subr.bf16.mxu0 %v7960_v34  ;;  %4592 = vmatprep.subr.bf16.mxu1 %v7963_v35  ;;  %v8040_v34 = vld [vmem:[%s11585_s1 + $0x788] ss:$20 sps:$4 sm:$0xff]   ;;  %v8045_v35 = vld [vmem:[%s11585_s1 + $0x7ac] ss:$20 sps:$4 sm:$0xff]  }
  0x8f   :  { %4265 = vmatpush1.bf16.msra.mxu0 %v7958_v36  ;;  %4593 = vmatpush1.bf16.msra.mxu1 %v7961_v37  ;;  %v8048_v36 = vld [vmem:[%s11585_s1 + $0x7b4] ss:$20 sps:$4 sm:$0xff]  }
  0x90   :  { %4266 = vmatprep.subr.bf16.mxu0 %v7966_v38  ;;  %4594 = vmatprep.subr.bf16.mxu1 %v7969_v39  ;;  %v8043_v37 = vld [vmem:[%s11585_s1 + $0x7a8] ss:$20 sps:$4 sm:$0xff]   ;;  %v8046_v38 = vld [vmem:[%s11585_s1 + $0x7b0] ss:$20 sps:$4 sm:$0xff]  }
  0x91   :  { %v8051_v39 = vld [vmem:[%s11585_s1 + $0x7d4] ss:$20 sps:$4 sm:$0xff]  }
  0x93   :  { %4267 = vmatpush1.bf16.msra.mxu0 %v7964_v40  ;;  %4595 = vmatpush1.bf16.msra.mxu1 %v7967_v41  ;;  %v8054_v40 = vld [vmem:[%s11585_s1 + $0x7dc] ss:$20 sps:$4 sm:$0xff]  }
  0x94   :  { %4268 = vmatprep.subr.bf16.mxu0 %v7972_v43  ;;  %4596 = vmatprep.subr.bf16.mxu1 %v7975_v44  ;;  %v8049_v41 = vld [vmem:[%s11585_s1 + $0x7d0] ss:$20 sps:$4 sm:$0xff]   ;;  %v8052_v43 = vld [vmem:[%s11585_s1 + $0x7d8] ss:$20 sps:$4 sm:$0xff]  }
  0x95   :  { %v8057_v44 = vld [vmem:[%s11585_s1 + $0x7fc] ss:$20 sps:$4 sm:$0xff]  }
  0x97   :  { %4269 = vmatpush1.bf16.msra.mxu0 %v7970_v45  ;;  %4597 = vmatpush1.bf16.msra.mxu1 %v7973_v46  ;;  %v8060_v45 = vld [vmem:[%s11585_s1 + $0x804] ss:$20 sps:$4 sm:$0xff]  }
  0x98   :  { %4270 = vmatprep.subr.bf16.mxu0 %v7978_v47  ;;  %4598 = vmatprep.subr.bf16.mxu1 %v7981_v48  ;;  %v8055_v46 = vld [vmem:[%s11585_s1 + $0x7f8] ss:$20 sps:$4 sm:$0xff]   ;;  %v8058_v47 = vld [vmem:[%s11585_s1 + $0x800] ss:$20 sps:$4 sm:$0xff]  }
  0x99   :  { %v8063_v48 = vld [vmem:[%s11585_s1 + $0x824] ss:$20 sps:$4 sm:$0xff]  }
  0x9b   :  { %4271 = vmatpush1.bf16.msra.mxu0 %v7976_v50  ;;  %4599 = vmatpush1.bf16.msra.mxu1 %v7979_v51  ;;  %v8066_v50 = vld [vmem:[%s11585_s1 + $0x82c] ss:$20 sps:$4 sm:$0xff]  }
  0x9c   :  { %4272 = vmatprep.subr.bf16.mxu0 %v7984_v53  ;;  %4600 = vmatprep.subr.bf16.mxu1 %v7987_v54  ;;  %v8061_v51 = vld [vmem:[%s11585_s1 + $0x820] ss:$20 sps:$4 sm:$0xff]   ;;  %v8064_v53 = vld [vmem:[%s11585_s1 + $0x828] ss:$20 sps:$4 sm:$0xff]  }
  0x9d   :  { %v8069_v54 = vld [vmem:[%s11585_s1 + $0x84c] ss:$20 sps:$4 sm:$0xff]  }
  0x9f   :  { %4273 = vmatpush1.bf16.msra.mxu0 %v7982_v55  ;;  %4601 = vmatpush1.bf16.msra.mxu1 %v7985_v56  ;;  %v8072_v55 = vld [vmem:[%s11585_s1 + $0x854] ss:$20 sps:$4 sm:$0xff]  }
  0xa0   :  { %4274 = vmatprep.subr.bf16.mxu0 %v7990_v57  ;;  %4602 = vmatprep.subr.bf16.mxu1 %v7993_v58  ;;  %v8067_v56 = vld [vmem:[%s11585_s1 + $0x848] ss:$20 sps:$4 sm:$0xff]   ;;  %v8070_v57 = vld [vmem:[%s11585_s1 + $0x850] ss:$20 sps:$4 sm:$0xff]  }
  0xa1   :  { %v8075_v58 = vld [vmem:[%s11585_s1 + $0x874] ss:$20 sps:$4 sm:$0xff]  }
  0xa3   :  { %4275 = vmatpush1.bf16.msra.mxu0 %v7988_v59  ;;  %4603 = vmatpush1.bf16.msra.mxu1 %v7991_v61  ;;  %v8078_v59 = vld [vmem:[%s11585_s1 + $0x87c] ss:$20 sps:$4 sm:$0xff]  }
  0xa4   :  { %4276 = vmatprep.subr.bf16.mxu0 %v7996_v62  ;;  %4604 = vmatprep.subr.bf16.mxu1 %v7999_v63  ;;  %v8073_v61 = vld [vmem:[%s11585_s1 + $0x870] ss:$20 sps:$4 sm:$0xff]   ;;  %v8076_v62 = vld [vmem:[%s11585_s1 + $0x878] ss:$20 sps:$4 sm:$0xff]  }
  0xa5   :  { %v8081_v63 = vld [vmem:[%s11585_s1 + $0x89c] ss:$20 sps:$4 sm:$0xff]  }
  0xa7   :  { %4277 = vmatpush1.bf16.msra.mxu0 %v7994_v0  ;;  %4605 = vmatpush1.bf16.msra.mxu1 %v7997_v1  ;;  %v8084_v0 = vld [vmem:[%s11585_s1 + $0x8a4] ss:$20 sps:$4 sm:$0xff]  }
  0xa8   :  { %4278 = vmatprep.subr.bf16.mxu0 %v8002_v2  ;;  %4606 = vmatprep.subr.bf16.mxu1 %v8005_v3  ;;  %v8079_v1 = vld [vmem:[%s11585_s1 + $0x898] ss:$20 sps:$4 sm:$0xff]   ;;  %v8082_v2 = vld [vmem:[%s11585_s1 + $0x8a0] ss:$20 sps:$4 sm:$0xff]  }
  0xa9   :  { %v8087_v3 = vld [vmem:[%s11585_s1 + $0x8c4] ss:$20 sps:$4 sm:$0xff]  }
  0xab   :  { %4279 = vmatpush1.bf16.msra.mxu0 %v8000_v4  ;;  %4607 = vmatpush1.bf16.msra.mxu1 %v8003_v5  ;;  %v8090_v4 = vld [vmem:[%s11585_s1 + $0x8cc] ss:$20 sps:$4 sm:$0xff]  }
  0xac   :  { %4280 = vmatprep.subr.bf16.mxu0 %v8008_v6  ;;  %4608 = vmatprep.subr.bf16.mxu1 %v8011_v7  ;;  %v8085_v5 = vld [vmem:[%s11585_s1 + $0x8c0] ss:$20 sps:$4 sm:$0xff]   ;;  %v8088_v6 = vld [vmem:[%s11585_s1 + $0x8c8] ss:$20 sps:$4 sm:$0xff]  }
  0xad   :  { %v8093_v7 = vld [vmem:[%s11585_s1 + $0x8ec] ss:$20 sps:$4 sm:$0xff]  }
  0xaf   :  { %4281 = vmatpush1.bf16.msra.mxu0 %v8006_v8  ;;  %4609 = vmatpush1.bf16.msra.mxu1 %v8009_v9  ;;  %v8096_v8 = vld [vmem:[%s11585_s1 + $0x8f4] ss:$20 sps:$4 sm:$0xff]  }
  0xb0   :  { %4282 = vmatprep.subr.bf16.mxu0 %v8014_v10  ;;  %4610 = vmatprep.subr.bf16.mxu1 %v8017_v11  ;;  %v8091_v9 = vld [vmem:[%s11585_s1 + $0x8e8] ss:$20 sps:$4 sm:$0xff]   ;;  %v8094_v10 = vld [vmem:[%s11585_s1 + $0x8f0] ss:$20 sps:$4 sm:$0xff]  }
  0xb1   :  { %v8099_v11 = vld [vmem:[%s11585_s1 + $0x914] ss:$20 sps:$4 sm:$0xff]  }
  0xb3   :  { %4283 = vmatpush1.bf16.msra.mxu0 %v8012_v12  ;;  %4611 = vmatpush1.bf16.msra.mxu1 %v8015_v14  ;;  %v8102_v12 = vld [vmem:[%s11585_s1 + $0x91c] ss:$20 sps:$4 sm:$0xff]  }
  0xb4   :  { %4284 = vmatprep.subr.bf16.mxu0 %v8020_v52  ;;  %4612 = vmatprep.subr.bf16.mxu1 %v8023_v16  ;;  %v8097_v14 = vld [vmem:[%s11585_s1 + $0x910] ss:$20 sps:$4 sm:$0xff]   ;;  %v8100_v52 = vld [vmem:[%s11585_s1 + $0x918] ss:$20 sps:$4 sm:$0xff]  }
  0xb5   :  { %v8105_v16 = vld [vmem:[%s11585_s1 + $0x93c] ss:$20 sps:$4 sm:$0xff]  }
  0xb7   :  { %4285 = vmatpush1.bf16.msra.mxu0 %v8018_v18  ;;  %4613 = vmatpush1.bf16.msra.mxu1 %v8021_v19  ;;  %v8108_v18 = vld [vmem:[%s11585_s1 + $0x944] ss:$20 sps:$4 sm:$0xff]  }
  0xb8   :  { %4286 = vmatprep.subr.bf16.mxu0 %v8026_v20  ;;  %4614 = vmatprep.subr.bf16.mxu1 %v8029_v21  ;;  %v8103_v19 = vld [vmem:[%s11585_s1 + $0x938] ss:$20 sps:$4 sm:$0xff]   ;;  %v8106_v20 = vld [vmem:[%s11585_s1 + $0x940] ss:$20 sps:$4 sm:$0xff]  }
  0xb9   :  { %v8111_v21 = vld [vmem:[%s11585_s1 + $0x964] ss:$20 sps:$4 sm:$0xff]  }
  0xbb   :  { %4287 = vmatpush1.bf16.msra.mxu0 %v8024_v22  ;;  %4615 = vmatpush1.bf16.msra.mxu1 %v8027_v24  ;;  %v8114_v22 = vld [vmem:[%s11585_s1 + $0x96c] ss:$20 sps:$4 sm:$0xff]  }
  0xbc   :  { %4288 = vmatprep.subr.bf16.mxu0 %v8032_v25  ;;  %4616 = vmatprep.subr.bf16.mxu1 %v8035_v26  ;;  %v8109_v24 = vld [vmem:[%s11585_s1 + $0x960] ss:$20 sps:$4 sm:$0xff]   ;;  %v8112_v25 = vld [vmem:[%s11585_s1 + $0x968] ss:$20 sps:$4 sm:$0xff]  }
  0xbd   :  { %v8117_v26 = vld [vmem:[%s11585_s1 + $0x98c] ss:$20 sps:$4 sm:$0xff]  }
  0xbf   :  { %4289 = vmatpush1.bf16.msra.mxu0 %v8030_v28  ;;  %4617 = vmatpush1.bf16.msra.mxu1 %v8033_v29  ;;  %v8120_v28 = vld [vmem:[%s11585_s1 + $0x994] ss:$20 sps:$4 sm:$0xff]  }
  0xc0   :  { %4299 = vmatprep.subr.bf16.mxu0 %v8039_v30  ;;  %4627 = vmatprep.subr.bf16.mxu1 %v8042_v31  ;;  %v8115_v29 = vld [vmem:[%s11585_s1 + $0x988] ss:$20 sps:$4 sm:$0xff]   ;;  %v8118_v30 = vld [vmem:[%s11585_s1 + $0x990] ss:$20 sps:$4 sm:$0xff]  }
  0xc1   :  { %v8123_v31 = vld [vmem:[%s11585_s1 + $0x9b4] ss:$20 sps:$4 sm:$0xff]  }
  0xc2   :  { %4291 = vmatmul.mubr.bf16.vlgmr.msra.gmra.mrb[0].mxu0 %v9580_v33  ;;  %4619 = vmatmul.mubr.bf16.vlgmr.msra.gmra.mrb[0].mxu1 %v9580_v33 }
  0xc3   :  { %4300 = vmatpush1.bf16.msra.mxu0 %v8037_v32  ;;  %4628 = vmatpush1.bf16.msra.mxu1 %v8040_v34  ;;  %v8126_v32 = vld [vmem:[%s11585_s1 + $0x9bc] ss:$20 sps:$4 sm:$0xff]   ;;  %v9758_v34 = vld.sshfl [vmem:[%s11584_s0 + $0x8] sm:$0xff pattern:$0x75316420] }
  0xc4   :  { %4301 = vmatprep.subr.bf16.mxu0 %v8045_v35  ;;  %4629 = vmatprep.subr.bf16.mxu1 %v8048_v36  ;;  %v8121_v35 = vld [vmem:[%s11585_s1 + $0x9b0] ss:$20 sps:$4 sm:$0xff]   ;;  %v8124_v36 = vld [vmem:[%s11585_s1 + $0x9b8] ss:$20 sps:$4 sm:$0xff]  }
  0xc5   :  { %4331 = vmatprep.mubr.bf16.mxu0 %v9593_v15  ;;  %4659 = vmatprep.mubr.bf16.mxu1 %v9593_v15 }
  0xc7   :  { %4302 = vmatpush1.bf16.msra.mxu0 %v8043_v37  ;;  %4630 = vmatpush1.bf16.msra.mxu1 %v8046_v38  ;;  %v8129_v37 = vld [vmem:[%s11585_s1 + $0x9dc] ss:$20 sps:$4 sm:$0xff]   ;;  %v8132_v38 = vld [vmem:[%s11585_s1 + $0x9e4] ss:$20 sps:$4 sm:$0xff]  }
  0xc8   :  { %4303 = vmatprep.subr.bf16.mxu0 %v8051_v39  ;;  %4631 = vmatprep.subr.bf16.mxu1 %v8054_v40  ;;  %v8127_v39 = vld [vmem:[%s11585_s1 + $0x9d8] ss:$20 sps:$4 sm:$0xff]   ;;  %v8130_v40 = vld [vmem:[%s11585_s1 + $0x9e0] ss:$20 sps:$4 sm:$0xff]  }
  0xcb   :  { %4304 = vmatpush1.bf16.msra.mxu0 %v8049_v41  ;;  %4632 = vmatpush1.bf16.msra.mxu1 %v8052_v43  ;;  %v8135_v41 = vld [vmem:[%s11585_s1 + $0xa04] ss:$20 sps:$4 sm:$0xff]   ;;  %v8138_v43 = vld [vmem:[%s11585_s1 + $0xa0c] ss:$20 sps:$4 sm:$0xff]  }
  0xcc   :  { %4305 = vmatprep.subr.bf16.mxu0 %v8057_v44  ;;  %4633 = vmatprep.subr.bf16.mxu1 %v8060_v45  ;;  %v873_v44 = vcombine.high %v9758_v34, %v9758_v34  ;;  %v9788_v45 = vcombine.high %v9580_v33, %v9580_v33 }
  0xcf   :  { %4306 = vmatpush1.bf16.msra.mxu0 %v8055_v46  ;;  %4634 = vmatpush1.bf16.msra.mxu1 %v8058_v47  ;;  %v8133_v46 = vld [vmem:[%s11585_s1 + $0xa00] ss:$20 sps:$4 sm:$0xff]   ;;  %v8136_v47 = vld [vmem:[%s11585_s1 + $0xa08] ss:$20 sps:$4 sm:$0xff]  }
  0xd0   :  { %4307 = vmatprep.subr.bf16.mxu0 %v8063_v48  ;;  %4635 = vmatprep.subr.bf16.mxu1 %v8066_v50  ;;  %v8141_v48 = vld [vmem:[%s11585_s1 + $0xa2c] ss:$20 sps:$4 sm:$0xff]   ;;  %v8144_v50 = vld [vmem:[%s11585_s1 + $0xa34] ss:$20 sps:$4 sm:$0xff]  }
  0xd3   :  { %4308 = vmatpush1.bf16.msra.mxu0 %v8061_v51  ;;  %4636 = vmatpush1.bf16.msra.mxu1 %v8064_v53  ;;  %v9803_v51 = vrot.slane %v873_v44, %v9082_v49  ;;  %v8139_v53 = vld [vmem:[%s11585_s1 + $0xa28] ss:$20 sps:$4 sm:$0xff]  }
  0xd4   :  { %4309 = vmatprep.subr.bf16.mxu0 %v8069_v54  ;;  %4637 = vmatprep.subr.bf16.mxu1 %v8072_v55  ;;  %v8142_v54 = vld [vmem:[%s11585_s1 + $0xa30] ss:$20 sps:$4 sm:$0xff]   ;;  %v8147_v55 = vld [vmem:[%s11585_s1 + $0xa54] ss:$20 sps:$4 sm:$0xff]  }
  0xd5   :  { %v8216_v44 = vld [vmem:[%s11585_s1 + $0xc14] ss:$20 sps:$4 sm:$0xff]  }
  0xd7   :  { %4310 = vmatpush1.bf16.msra.mxu0 %v8067_v56  ;;  %4638 = vmatpush1.bf16.msra.mxu1 %v8070_v57  ;;  %v8150_v56 = vld [vmem:[%s11585_s1 + $0xa5c] ss:$20 sps:$4 sm:$0xff]  }
  0xd8   :  { %4311 = vmatprep.subr.bf16.mxu0 %v8075_v58  ;;  %4639 = vmatprep.subr.bf16.mxu1 %v8078_v59  ;;  %v8145_v57 = vld [vmem:[%s11585_s1 + $0xa50] ss:$20 sps:$4 sm:$0xff]   ;;  %v8148_v58 = vld [vmem:[%s11585_s1 + $0xa58] ss:$20 sps:$4 sm:$0xff]  }
  0xd9   :  { %v8153_v59 = vld [vmem:[%s11585_s1 + $0xa7c] ss:$20 sps:$4 sm:$0xff]  }
  0xdb   :  { %4312 = vmatpush1.bf16.msra.mxu0 %v8073_v61  ;;  %4640 = vmatpush1.bf16.msra.mxu1 %v8076_v62  ;;  %v8156_v61 = vld [vmem:[%s11585_s1 + $0xa84] ss:$20 sps:$4 sm:$0xff]  }
  0xdc   :  { %4313 = vmatprep.subr.bf16.mxu0 %v8081_v63  ;;  %4641 = vmatprep.subr.bf16.mxu1 %v8084_v0  ;;  %v8151_v62 = vld [vmem:[%s11585_s1 + $0xa78] ss:$20 sps:$4 sm:$0xff]   ;;  %v8154_v63 = vld [vmem:[%s11585_s1 + $0xa80] ss:$20 sps:$4 sm:$0xff]  }
  0xdd   :  { %v8159_v0 = vld [vmem:[%s11585_s1 + $0xaa4] ss:$20 sps:$4 sm:$0xff]  }
  0xdf   :  { %4314 = vmatpush1.bf16.msra.mxu0 %v8079_v1  ;;  %4642 = vmatpush1.bf16.msra.mxu1 %v8082_v2  ;;  %v8162_v1 = vld [vmem:[%s11585_s1 + $0xaac] ss:$20 sps:$4 sm:$0xff]  }
  0xe0   :  { %4315 = vmatprep.subr.bf16.mxu0 %v8087_v3  ;;  %4643 = vmatprep.subr.bf16.mxu1 %v8090_v4  ;;  %v8157_v2 = vld [vmem:[%s11585_s1 + $0xaa0] ss:$20 sps:$4 sm:$0xff]   ;;  %v8160_v3 = vld [vmem:[%s11585_s1 + $0xaa8] ss:$20 sps:$4 sm:$0xff]  }
  0xe1   :  { %v8165_v4 = vld [vmem:[%s11585_s1 + $0xacc] ss:$20 sps:$4 sm:$0xff]  }
  0xe3   :  { %4316 = vmatpush1.bf16.msra.mxu0 %v8085_v5  ;;  %4644 = vmatpush1.bf16.msra.mxu1 %v8088_v6  ;;  %v8168_v5 = vld [vmem:[%s11585_s1 + $0xad4] ss:$20 sps:$4 sm:$0xff]  }
  0xe4   :  { %4317 = vmatprep.subr.bf16.mxu0 %v8093_v7  ;;  %4645 = vmatprep.subr.bf16.mxu1 %v8096_v8  ;;  %v8163_v6 = vld [vmem:[%s11585_s1 + $0xac8] ss:$20 sps:$4 sm:$0xff]   ;;  %v8166_v7 = vld [vmem:[%s11585_s1 + $0xad0] ss:$20 sps:$4 sm:$0xff]  }
  0xe5   :  { %v8171_v8 = vld [vmem:[%s11585_s1 + $0xaf4] ss:$20 sps:$4 sm:$0xff]  }
  0xe7   :  { %4318 = vmatpush1.bf16.msra.mxu0 %v8091_v9  ;;  %4646 = vmatpush1.bf16.msra.mxu1 %v8094_v10  ;;  %v8174_v9 = vld [vmem:[%s11585_s1 + $0xafc] ss:$20 sps:$4 sm:$0xff]  }
  0xe8   :  { %4319 = vmatprep.subr.bf16.mxu0 %v8099_v11  ;;  %4647 = vmatprep.subr.bf16.mxu1 %v8102_v12  ;;  %v8169_v10 = vld [vmem:[%s11585_s1 + $0xaf0] ss:$20 sps:$4 sm:$0xff]   ;;  %v8172_v11 = vld [vmem:[%s11585_s1 + $0xaf8] ss:$20 sps:$4 sm:$0xff]  }
  0xe9   :  { %v8177_v12 = vld [vmem:[%s11585_s1 + $0xb1c] ss:$20 sps:$4 sm:$0xff]  }
  0xeb   :  { %4320 = vmatpush1.bf16.msra.mxu0 %v8097_v14  ;;  %4648 = vmatpush1.bf16.msra.mxu1 %v8100_v52  ;;  %v8180_v14 = vld [vmem:[%s11585_s1 + $0xb24] ss:$20 sps:$4 sm:$0xff]  }
  0xec   :  { %4321 = vmatprep.subr.bf16.mxu0 %v8105_v16  ;;  %4649 = vmatprep.subr.bf16.mxu1 %v8108_v18  ;;  %v8175_v52 = vld [vmem:[%s11585_s1 + $0xb18] ss:$20 sps:$4 sm:$0xff]   ;;  %v8178_v16 = vld [vmem:[%s11585_s1 + $0xb20] ss:$20 sps:$4 sm:$0xff]  }
  0xed   :  { %v8183_v18 = vld [vmem:[%s11585_s1 + $0xb44] ss:$20 sps:$4 sm:$0xff]  }
  0xef   :  { %4322 = vmatpush1.bf16.msra.mxu0 %v8103_v19  ;;  %4650 = vmatpush1.bf16.msra.mxu1 %v8106_v20  ;;  %v8186_v19 = vld [vmem:[%s11585_s1 + $0xb4c] ss:$20 sps:$4 sm:$0xff]  }
  0xf0   :  { %4323 = vmatprep.subr.bf16.mxu0 %v8111_v21  ;;  %4651 = vmatprep.subr.bf16.mxu1 %v8114_v22  ;;  %v8181_v20 = vld [vmem:[%s11585_s1 + $0xb40] ss:$20 sps:$4 sm:$0xff]   ;;  %v8184_v21 = vld [vmem:[%s11585_s1 + $0xb48] ss:$20 sps:$4 sm:$0xff]  }
  0xf1   :  { %v8189_v22 = vld [vmem:[%s11585_s1 + $0xb6c] ss:$20 sps:$4 sm:$0xff]  }
  0xf3   :  { %4324 = vmatpush1.bf16.msra.mxu0 %v8109_v24  ;;  %4652 = vmatpush1.bf16.msra.mxu1 %v8112_v25  ;;  %v8192_v24 = vld [vmem:[%s11585_s1 + $0xb74] ss:$20 sps:$4 sm:$0xff]  }
  0xf4   :  { %4325 = vmatprep.subr.bf16.mxu0 %v8117_v26  ;;  %4653 = vmatprep.subr.bf16.mxu1 %v8120_v28  ;;  %v8187_v25 = vld [vmem:[%s11585_s1 + $0xb68] ss:$20 sps:$4 sm:$0xff]   ;;  %v8190_v26 = vld [vmem:[%s11585_s1 + $0xb70] ss:$20 sps:$4 sm:$0xff]  }
  0xf5   :  { %v8195_v28 = vld [vmem:[%s11585_s1 + $0xb94] ss:$20 sps:$4 sm:$0xff]  }
  0xf7   :  { %4326 = vmatpush1.bf16.msra.mxu0 %v8115_v29  ;;  %4654 = vmatpush1.bf16.msra.mxu1 %v8118_v30  ;;  %v8198_v29 = vld [vmem:[%s11585_s1 + $0xb9c] ss:$20 sps:$4 sm:$0xff]  }
  0xf8   :  { %4327 = vmatprep.subr.bf16.mxu0 %v8123_v31  ;;  %4655 = vmatprep.subr.bf16.mxu1 %v8126_v32  ;;  %v8193_v30 = vld [vmem:[%s11585_s1 + $0xb90] ss:$20 sps:$4 sm:$0xff]   ;;  %v8196_v31 = vld [vmem:[%s11585_s1 + $0xb98] ss:$20 sps:$4 sm:$0xff]  }
  0xf9   :  { %v8201_v32 = vld [vmem:[%s11585_s1 + $0xbbc] ss:$20 sps:$4 sm:$0xff]  }
  0xfb   :  { %4328 = vmatpush1.bf16.msra.mxu0 %v8121_v35  ;;  %4656 = vmatpush1.bf16.msra.mxu1 %v8124_v36  ;;  %v8204_v35 = vld [vmem:[%s11585_s1 + $0xbc4] ss:$20 sps:$4 sm:$0xff]  }
  0xfc   :  { %4329 = vmatprep.subr.bf16.mxu0 %v8129_v37  ;;  %4657 = vmatprep.subr.bf16.mxu1 %v8132_v38  ;;  %v8199_v36 = vld [vmem:[%s11585_s1 + $0xbb8] ss:$20 sps:$4 sm:$0xff]   ;;  %v8202_v37 = vld [vmem:[%s11585_s1 + $0xbc0] ss:$20 sps:$4 sm:$0xff]  }
  0xfd   :  { %v8207_v38 = vld [vmem:[%s11585_s1 + $0xbe4] ss:$20 sps:$4 sm:$0xff]  }
  0xff   :  { %4330 = vmatpush1.bf16.msra.mxu0 %v8127_v39  ;;  %4658 = vmatpush1.bf16.msra.mxu1 %v8130_v40  ;;  %v8210_v39 = vld [vmem:[%s11585_s1 + $0xbec] ss:$20 sps:$4 sm:$0xff]  }
 0x100   :  { %4340 = vmatprep.subr.bf16.mxu0 %v8135_v41  ;;  %4668 = vmatprep.subr.bf16.mxu1 %v8138_v43  ;;  %v8205_v40 = vld [vmem:[%s11585_s1 + $0xbe0] ss:$20 sps:$4 sm:$0xff]   ;;  %v8208_v41 = vld [vmem:[%s11585_s1 + $0xbe8] ss:$20 sps:$4 sm:$0xff]  }
 0x101   :  { %v8213_v43 = vld [vmem:[%s11585_s1 + $0xc0c] ss:$20 sps:$4 sm:$0xff]  }
 0x102   :  { %4332 = vmatmul.mubr.bf16.vlgmr.msra.gmra.mrb[0].mxu0 %v9788_v45  ;;  %4660 = vmatmul.mubr.bf16.vlgmr.msra.gmra.mrb[0].mxu1 %v9788_v45 }
 0x103   :  { %4341 = vmatpush1.bf16.msra.mxu0 %v8133_v46  ;;  %4669 = vmatpush1.bf16.msra.mxu1 %v8136_v47  ;;  %v8211_v46 = vld [vmem:[%s11585_s1 + $0xc08] ss:$20 sps:$4 sm:$0xff]   ;;  %v8214_v47 = vld [vmem:[%s11585_s1 + $0xc10] ss:$20 sps:$4 sm:$0xff]  }
 0x104   :  { %4342 = vmatprep.subr.bf16.mxu0 %v8141_v48  ;;  %4670 = vmatprep.subr.bf16.mxu1 %v8144_v50  ;;  %v8219_v48 = vld [vmem:[%s11585_s1 + $0xc34] ss:$20 sps:$4 sm:$0xff]   ;;  %v8222_v50 = vld [vmem:[%s11585_s1 + $0xc3c] ss:$20 sps:$4 sm:$0xff]  }
 0x105   :  { %4372 = vmatprep.mubr.bf16.mxu0 %v9803_v51  ;;  %4700 = vmatprep.mubr.bf16.mxu1 %v9803_v51 }
 0x107   :  { %4343 = vmatpush1.bf16.msra.mxu0 %v8139_v53  ;;  %4671 = vmatpush1.bf16.msra.mxu1 %v8142_v54  ;;  %v8217_v53 = vld [vmem:[%s11585_s1 + $0xc30] ss:$20 sps:$4 sm:$0xff]   ;;  %v8220_v54 = vld [vmem:[%s11585_s1 + $0xc38] ss:$20 sps:$4 sm:$0xff]  }
 0x108   :  { %4344 = vmatprep.subr.bf16.mxu0 %v8147_v55  ;;  %4672 = vmatprep.subr.bf16.mxu1 %v8150_v56  ;;  %v8225_v55 = vld [vmem:[%s11585_s1 + $0xc5c] ss:$20 sps:$4 sm:$0xff]   ;;  %v8228_v56 = vld [vmem:[%s11585_s1 + $0xc64] ss:$20 sps:$4 sm:$0xff]  }
 0x10b   :  { %4345 = vmatpush1.bf16.msra.mxu0 %v8145_v57  ;;  %4673 = vmatpush1.bf16.msra.mxu1 %v8148_v58  ;;  %v8223_v57 = vld [vmem:[%s11585_s1 + $0xc58] ss:$20 sps:$4 sm:$0xff]   ;;  %v8226_v58 = vld [vmem:[%s11585_s1 + $0xc60] ss:$20 sps:$4 sm:$0xff]  }
 0x10c   :  { %4346 = vmatprep.subr.bf16.mxu0 %v8153_v59  ;;  %4674 = vmatprep.subr.bf16.mxu1 %v8156_v61  ;;  %v8231_v59 = vld [vmem:[%s11585_s1 + $0xc84] ss:$20 sps:$4 sm:$0xff]   ;;  %v8234_v61 = vld [vmem:[%s11585_s1 + $0xc8c] ss:$20 sps:$4 sm:$0xff]  }
 0x10f   :  { %4347 = vmatpush1.bf16.msra.mxu0 %v8151_v62  ;;  %4675 = vmatpush1.bf16.msra.mxu1 %v8154_v63  ;;  %v9991_v62 = vrot.slane %v9758_v34, %v9082_v49  ;;  %v8229_v63 = vld [vmem:[%s11585_s1 + $0xc80] ss:$20 sps:$4 sm:$0xff]  }
 0x110   :  { %4348 = vmatprep.subr.bf16.mxu0 %v8159_v0  ;;  %4676 = vmatprep.subr.bf16.mxu1 %v8162_v1  ;;  %v8232_v0 = vld [vmem:[%s11585_s1 + $0xc88] ss:$20 sps:$4 sm:$0xff]   ;;  %v8237_v1 = vld [vmem:[%s11585_s1 + $0xcac] ss:$20 sps:$4 sm:$0xff]  }
 0x111   :  { %v8240_v34 = vld [vmem:[%s11585_s1 + $0xcb4] ss:$20 sps:$4 sm:$0xff]  }
 0x113   :  { %4349 = vmatpush1.bf16.msra.mxu0 %v8157_v2  ;;  %4677 = vmatpush1.bf16.msra.mxu1 %v8160_v3  ;;  %v10007_v2 = vcombine.high %v9803_v51, %v9803_v51  ;;  %v8235_v3 = vld [vmem:[%s11585_s1 + $0xca8] ss:$20 sps:$4 sm:$0xff]  }
 0x114   :  { %4350 = vmatprep.subr.bf16.mxu0 %v8165_v4  ;;  %4678 = vmatprep.subr.bf16.mxu1 %v8168_v5  ;;  %v8238_v4 = vld [vmem:[%s11585_s1 + $0xcb0] ss:$20 sps:$4 sm:$0xff]   ;;  %v8243_v5 = vld [vmem:[%s11585_s1 + $0xcd4] ss:$20 sps:$4 sm:$0xff]  }
 0x117   :  { %4351 = vmatpush1.bf16.msra.mxu0 %v8163_v6  ;;  %4679 = vmatpush1.bf16.msra.mxu1 %v8166_v7  ;;  %v8246_v6 = vld [vmem:[%s11585_s1 + $0xcdc] ss:$20 sps:$4 sm:$0xff]  }
 0x118   :  { %4352 = vmatprep.subr.bf16.mxu0 %v8171_v8  ;;  %4680 = vmatprep.subr.bf16.mxu1 %v8174_v9  ;;  %v8241_v7 = vld [vmem:[%s11585_s1 + $0xcd0] ss:$20 sps:$4 sm:$0xff]   ;;  %v8244_v8 = vld [vmem:[%s11585_s1 + $0xcd8] ss:$20 sps:$4 sm:$0xff]  }
 0x119   :  { %v8249_v9 = vld [vmem:[%s11585_s1 + $0xcfc] ss:$20 sps:$4 sm:$0xff]  }
 0x11b   :  { %4353 = vmatpush1.bf16.msra.mxu0 %v8169_v10  ;;  %4681 = vmatpush1.bf16.msra.mxu1 %v8172_v11  ;;  %v8252_v10 = vld [vmem:[%s11585_s1 + $0xd04] ss:$20 sps:$4 sm:$0xff]  }
 0x11c   :  { %4354 = vmatprep.subr.bf16.mxu0 %v8177_v12  ;;  %4682 = vmatprep.subr.bf16.mxu1 %v8180_v14  ;;  %v8247_v11 = vld [vmem:[%s11585_s1 + $0xcf8] ss:$20 sps:$4 sm:$0xff]   ;;  %v8250_v12 = vld [vmem:[%s11585_s1 + $0xd00] ss:$20 sps:$4 sm:$0xff]  }
 0x11d   :  { %v8255_v14 = vld [vmem:[%s11585_s1 + $0xd24] ss:$20 sps:$4 sm:$0xff]  }
 0x11f   :  { %4355 = vmatpush1.bf16.msra.mxu0 %v8175_v52  ;;  %4683 = vmatpush1.bf16.msra.mxu1 %v8178_v16  ;;  %v8258_v52 = vld [vmem:[%s11585_s1 + $0xd2c] ss:$20 sps:$4 sm:$0xff]  }
 0x120   :  { %4356 = vmatprep.subr.bf16.mxu0 %v8183_v18  ;;  %4684 = vmatprep.subr.bf16.mxu1 %v8186_v19  ;;  %v8253_v16 = vld [vmem:[%s11585_s1 + $0xd20] ss:$20 sps:$4 sm:$0xff]   ;;  %v8256_v18 = vld [vmem:[%s11585_s1 + $0xd28] ss:$20 sps:$4 sm:$0xff]  }
 0x121   :  { %v8261_v19 = vld [vmem:[%s11585_s1 + $0xd4c] ss:$20 sps:$4 sm:$0xff]  }
 0x123   :  { %4357 = vmatpush1.bf16.msra.mxu0 %v8181_v20  ;;  %4685 = vmatpush1.bf16.msra.mxu1 %v8184_v21  ;;  %v8264_v20 = vld [vmem:[%s11585_s1 + $0xd54] ss:$20 sps:$4 sm:$0xff]  }
 0x124   :  { %4358 = vmatprep.subr.bf16.mxu0 %v8189_v22  ;;  %4686 = vmatprep.subr.bf16.mxu1 %v8192_v24  ;;  %v8259_v21 = vld [vmem:[%s11585_s1 + $0xd48] ss:$20 sps:$4 sm:$0xff]   ;;  %v8262_v22 = vld [vmem:[%s11585_s1 + $0xd50] ss:$20 sps:$4 sm:$0xff]  }
 0x125   :  { %v8267_v24 = vld [vmem:[%s11585_s1 + $0xd74] ss:$20 sps:$4 sm:$0xff]  }
 0x127   :  { %4359 = vmatpush1.bf16.msra.mxu0 %v8187_v25  ;;  %4687 = vmatpush1.bf16.msra.mxu1 %v8190_v26  ;;  %v8270_v25 = vld [vmem:[%s11585_s1 + $0xd7c] ss:$20 sps:$4 sm:$0xff]  }
 0x128   :  { %4360 = vmatprep.subr.bf16.mxu0 %v8195_v28  ;;  %4688 = vmatprep.subr.bf16.mxu1 %v8198_v29  ;;  %v8265_v26 = vld [vmem:[%s11585_s1 + $0xd70] ss:$20 sps:$4 sm:$0xff]   ;;  %v8268_v28 = vld [vmem:[%s11585_s1 + $0xd78] ss:$20 sps:$4 sm:$0xff]  }
 0x129   :  { %v8273_v29 = vld [vmem:[%s11585_s1 + $0xd9c] ss:$20 sps:$4 sm:$0xff]  }
 0x12b   :  { %4361 = vmatpush1.bf16.msra.mxu0 %v8193_v30  ;;  %4689 = vmatpush1.bf16.msra.mxu1 %v8196_v31  ;;  %v8276_v30 = vld [vmem:[%s11585_s1 + $0xda4] ss:$20 sps:$4 sm:$0xff]  }
 0x12c   :  { %4362 = vmatprep.subr.bf16.mxu0 %v8201_v32  ;;  %4690 = vmatprep.subr.bf16.mxu1 %v8204_v35  ;;  %v8271_v31 = vld [vmem:[%s11585_s1 + $0xd98] ss:$20 sps:$4 sm:$0xff]   ;;  %v8274_v32 = vld [vmem:[%s11585_s1 + $0xda0] ss:$20 sps:$4 sm:$0xff]  }
 0x12d   :  { %v8279_v35 = vld [vmem:[%s11585_s1 + $0xdc4] ss:$20 sps:$4 sm:$0xff]  }
 0x12f   :  { %4363 = vmatpush1.bf16.msra.mxu0 %v8199_v36  ;;  %4691 = vmatpush1.bf16.msra.mxu1 %v8202_v37  ;;  %v8282_v36 = vld [vmem:[%s11585_s1 + $0xdcc] ss:$20 sps:$4 sm:$0xff]  }
 0x130   :  { %4364 = vmatprep.subr.bf16.mxu0 %v8207_v38  ;;  %4692 = vmatprep.subr.bf16.mxu1 %v8210_v39  ;;  %v8277_v37 = vld [vmem:[%s11585_s1 + $0xdc0] ss:$20 sps:$4 sm:$0xff]   ;;  %v8280_v38 = vld [vmem:[%s11585_s1 + $0xdc8] ss:$20 sps:$4 sm:$0xff]  }
 0x131   :  { %v8285_v39 = vld [vmem:[%s11585_s1 + $0xdec] ss:$20 sps:$4 sm:$0xff]  }
 0x133   :  { %4365 = vmatpush1.bf16.msra.mxu0 %v8205_v40  ;;  %4693 = vmatpush1.bf16.msra.mxu1 %v8208_v41  ;;  %v8288_v40 = vld [vmem:[%s11585_s1 + $0xdf4] ss:$20 sps:$4 sm:$0xff]  }
 0x134   :  { %4366 = vmatprep.subr.bf16.mxu0 %v8213_v43  ;;  %4694 = vmatprep.subr.bf16.mxu1 %v8216_v44  ;;  %v8283_v41 = vld [vmem:[%s11585_s1 + $0xde8] ss:$20 sps:$4 sm:$0xff]   ;;  %v8286_v43 = vld [vmem:[%s11585_s1 + $0xdf0] ss:$20 sps:$4 sm:$0xff]  }
 0x135   :  { %v8291_v44 = vld [vmem:[%s11585_s1 + $0xe14] ss:$20 sps:$4 sm:$0xff]  }
 0x137   :  { %4367 = vmatpush1.bf16.msra.mxu0 %v8211_v46  ;;  %4695 = vmatpush1.bf16.msra.mxu1 %v8214_v47  ;;  %v8294_v46 = vld [vmem:[%s11585_s1 + $0xe1c] ss:$20 sps:$4 sm:$0xff]  }
 0x138   :  { %4368 = vmatprep.subr.bf16.mxu0 %v8219_v48  ;;  %4696 = vmatprep.subr.bf16.mxu1 %v8222_v50  ;;  %v8289_v47 = vld [vmem:[%s11585_s1 + $0xe10] ss:$20 sps:$4 sm:$0xff]   ;;  %v8292_v48 = vld [vmem:[%s11585_s1 + $0xe18] ss:$20 sps:$4 sm:$0xff]  }
 0x139   :  { %v8297_v50 = vld [vmem:[%s11585_s1 + $0xe3c] ss:$20 sps:$4 sm:$0xff]  }
 0x13b   :  { %4369 = vmatpush1.bf16.msra.mxu0 %v8217_v53  ;;  %4697 = vmatpush1.bf16.msra.mxu1 %v8220_v54  ;;  %v8300_v53 = vld [vmem:[%s11585_s1 + $0xe44] ss:$20 sps:$4 sm:$0xff]  }
 0x13c   :  { %4370 = vmatprep.subr.bf16.mxu0 %v8225_v55  ;;  %4698 = vmatprep.subr.bf16.mxu1 %v8228_v56  ;;  %v8295_v54 = vld [vmem:[%s11585_s1 + $0xe38] ss:$20 sps:$4 sm:$0xff]   ;;  %v8298_v55 = vld [vmem:[%s11585_s1 + $0xe40] ss:$20 sps:$4 sm:$0xff]  }
 0x13d   :  { %v8303_v56 = vld [vmem:[%s11585_s1 + $0xe64] ss:$20 sps:$4 sm:$0xff]  }
 0x13f   :  { %4371 = vmatpush1.bf16.msra.mxu0 %v8223_v57  ;;  %4699 = vmatpush1.bf16.msra.mxu1 %v8226_v58  ;;  %v8306_v57 = vld [vmem:[%s11585_s1 + $0xe6c] ss:$20 sps:$4 sm:$0xff]  }
 0x140   :  { %4381 = vmatprep.subr.bf16.mxu0 %v8231_v59  ;;  %4709 = vmatprep.subr.bf16.mxu1 %v8234_v61  ;;  %v8301_v58 = vld [vmem:[%s11585_s1 + $0xe60] ss:$20 sps:$4 sm:$0xff]   ;;  %v8304_v59 = vld [vmem:[%s11585_s1 + $0xe68] ss:$20 sps:$4 sm:$0xff]  }
 0x141   :  { %v8309_v61 = vld [vmem:[%s11585_s1 + $0xe8c] ss:$20 sps:$4 sm:$0xff]  }
 0x142   :  { %4373 = vmatmul.mubr.bf16.vlgmr.msra.gmra.mrb[0].mxu0 %v9991_v62  ;;  %4701 = vmatmul.mubr.bf16.vlgmr.msra.gmra.mrb[0].mxu1 %v9991_v62 }
 0x143   :  { %4382 = vmatpush1.bf16.msra.mxu0 %v8229_v63  ;;  %4710 = vmatpush1.bf16.msra.mxu1 %v8232_v0  ;;  %v8312_v63 = vld [vmem:[%s11585_s1 + $0xe94] ss:$20 sps:$4 sm:$0xff]  }
 0x144   :  { %4383 = vmatprep.subr.bf16.mxu0 %v8237_v1  ;;  %4711 = vmatprep.subr.bf16.mxu1 %v8240_v34  ;;  %v8307_v0 = vld [vmem:[%s11585_s1 + $0xe88] ss:$20 sps:$4 sm:$0xff]   ;;  %v8310_v1 = vld [vmem:[%s11585_s1 + $0xe90] ss:$20 sps:$4 sm:$0xff]  }
 0x145   :  { %4413 = vmatprep.mubr.bf16.mxu0 %v10007_v2  ;;  %4741 = vmatprep.mubr.bf16.mxu1 %v10007_v2  ;;  %v8315_v34 = vld [vmem:[%s11585_s1 + $0xeb4] ss:$20 sps:$4 sm:$0xff]  }
 0x147   :  { %4384 = vmatpush1.bf16.msra.mxu0 %v8235_v3  ;;  %4712 = vmatpush1.bf16.msra.mxu1 %v8238_v4  ;;  %v8318_v3 = vld [vmem:[%s11585_s1 + $0xebc] ss:$20 sps:$4 sm:$0xff]  }
 0x148   :  { %4385 = vmatprep.subr.bf16.mxu0 %v8243_v5  ;;  %4713 = vmatprep.subr.bf16.mxu1 %v8246_v6  ;;  %v8313_v4 = vld [vmem:[%s11585_s1 + $0xeb0] ss:$20 sps:$4 sm:$0xff]   ;;  %v8878_v5 = vld [vmem:[%s11584_s0 + $0x8] sm:$0xff] }
 0x149   :  { %v858_v6 = vcombine.high %v8878_v5, %v8878_v5  ;;  %v8387_v5 = vld [vmem:[%s11585_s1 + $0x1094] ss:$20 sps:$4 sm:$0xff]  }
 0x14b   :  { %4386 = vmatpush1.bf16.msra.mxu0 %v8241_v7  ;;  %4714 = vmatpush1.bf16.msra.mxu1 %v8244_v8  ;;  %v8316_v7 = vld [vmem:[%s11585_s1 + $0xeb8] ss:$20 sps:$4 sm:$0xff]   ;;  %v8321_v8 = vld [vmem:[%s11585_s1 + $0xedc] ss:$20 sps:$4 sm:$0xff]  }
 0x14c   :  { %4387 = vmatprep.subr.bf16.mxu0 %v8249_v9  ;;  %4715 = vmatprep.subr.bf16.mxu1 %v8252_v10  ;;  %v8324_v9 = vld [vmem:[%s11585_s1 + $0xee4] ss:$20 sps:$4 sm:$0xff]  }
 0x14d   :  { %v8319_v10 = vld [vmem:[%s11585_s1 + $0xed8] ss:$20 sps:$4 sm:$0xff]  }
 0x14f   :  { %4388 = vmatpush1.bf16.msra.mxu0 %v8247_v11  ;;  %4716 = vmatpush1.bf16.msra.mxu1 %v8250_v12  ;;  %v10188_v11 = vrot.slane %v858_v6, %v9082_v49  ;;  %v8322_v12 = vld [vmem:[%s11585_s1 + $0xee0] ss:$20 sps:$4 sm:$0xff]   ;;  %v8390_v6 = vld [vmem:[%s11585_s1 + $0x109c] ss:$20 sps:$4 sm:$0xff]  }
 0x150   :  { %4389 = vmatprep.subr.bf16.mxu0 %v8255_v14  ;;  %4717 = vmatprep.subr.bf16.mxu1 %v8258_v52  ;;  %v8327_v14 = vld [vmem:[%s11585_s1 + $0xf04] ss:$20 sps:$4 sm:$0xff]   ;;  %v8330_v52 = vld [vmem:[%s11585_s1 + $0xf0c] ss:$20 sps:$4 sm:$0xff]  }
 0x153   :  { %4390 = vmatpush1.bf16.msra.mxu0 %v8253_v16  ;;  %4718 = vmatpush1.bf16.msra.mxu1 %v8256_v18  ;;  %v8325_v16 = vld [vmem:[%s11585_s1 + $0xf00] ss:$20 sps:$4 sm:$0xff]   ;;  %v874_v18 = vcombine.high %v10188_v11, %v10188_v11 }
 0x154   :  { %4391 = vmatprep.subr.bf16.mxu0 %v8261_v19  ;;  %4719 = vmatprep.subr.bf16.mxu1 %v8264_v20  ;;  %v10206_v19 = vcombine.high %v9991_v62, %v9991_v62  ;;  %v8328_v20 = vld [vmem:[%s11585_s1 + $0xf08] ss:$20 sps:$4 sm:$0xff]  }
 0x157   :  { %4392 = vmatpush1.bf16.msra.mxu0 %v8259_v21  ;;  %4720 = vmatpush1.bf16.msra.mxu1 %v8262_v22  ;;  %v8333_v21 = vld [vmem:[%s11585_s1 + $0xf2c] ss:$20 sps:$4 sm:$0xff]   ;;  %v8336_v22 = vld [vmem:[%s11585_s1 + $0xf34] ss:$20 sps:$4 sm:$0xff]  }
 0x158   :  { %4393 = vmatprep.subr.bf16.mxu0 %v8267_v24  ;;  %4721 = vmatprep.subr.bf16.mxu1 %v8270_v25  ;;  %v8331_v24 = vld [vmem:[%s11585_s1 + $0xf28] ss:$20 sps:$4 sm:$0xff]   ;;  %v10221_v25 = vrot.slane %v874_v18, %v9082_v49  ;;  %v8397_v18 = vld [vmem:[%s11585_s1 + $0x10e0] ss:$20 sps:$4 sm:$0xff]  }
 0x15b   :  { %4394 = vmatpush1.bf16.msra.mxu0 %v8265_v26  ;;  %4722 = vmatpush1.bf16.msra.mxu1 %v8268_v28  ;;  %v8334_v26 = vld [vmem:[%s11585_s1 + $0xf30] ss:$20 sps:$4 sm:$0xff]   ;;  %v8339_v28 = vld [vmem:[%s11585_s1 + $0xf54] ss:$20 sps:$4 sm:$0xff]  }
 0x15c   :  { %4395 = vmatprep.subr.bf16.mxu0 %v8273_v29  ;;  %4723 = vmatprep.subr.bf16.mxu1 %v8276_v30  ;;  %v8342_v29 = vld [vmem:[%s11585_s1 + $0xf5c] ss:$20 sps:$4 sm:$0xff]  }
 0x15d   :  { %v8337_v30 = vld [vmem:[%s11585_s1 + $0xf50] ss:$20 sps:$4 sm:$0xff]  }
 0x15f   :  { %4396 = vmatpush1.bf16.msra.mxu0 %v8271_v31  ;;  %4724 = vmatpush1.bf16.msra.mxu1 %v8274_v32  ;;  %v8340_v31 = vld [vmem:[%s11585_s1 + $0xf58] ss:$20 sps:$4 sm:$0xff]   ;;  %v8345_v32 = vld [vmem:[%s11585_s1 + $0xf7c] ss:$20 sps:$4 sm:$0xff]  }
 0x160   :  { %4397 = vmatprep.subr.bf16.mxu0 %v8279_v35  ;;  %4725 = vmatprep.subr.bf16.mxu1 %v8282_v36  ;;  %v8348_v35 = vld [vmem:[%s11585_s1 + $0xf84] ss:$20 sps:$4 sm:$0xff]  }
 0x161   :  { %v8343_v36 = vld [vmem:[%s11585_s1 + $0xf78] ss:$20 sps:$4 sm:$0xff]  }
 0x163   :  { %4398 = vmatpush1.bf16.msra.mxu0 %v8277_v37  ;;  %4726 = vmatpush1.bf16.msra.mxu1 %v8280_v38  ;;  %v8346_v37 = vld [vmem:[%s11585_s1 + $0xf80] ss:$20 sps:$4 sm:$0xff]   ;;  %v8351_v38 = vld [vmem:[%s11585_s1 + $0xfa4] ss:$20 sps:$4 sm:$0xff]  }
 0x164   :  { %4399 = vmatprep.subr.bf16.mxu0 %v8285_v39  ;;  %4727 = vmatprep.subr.bf16.mxu1 %v8288_v40  ;;  %v8354_v39 = vld [vmem:[%s11585_s1 + $0xfac] ss:$20 sps:$4 sm:$0xff]  }
 0x165   :  { %v8349_v40 = vld [vmem:[%s11585_s1 + $0xfa0] ss:$20 sps:$4 sm:$0xff]  }
 0x167   :  { %4400 = vmatpush1.bf16.msra.mxu0 %v8283_v41  ;;  %4728 = vmatpush1.bf16.msra.mxu1 %v8286_v43  ;;  %v8352_v41 = vld [vmem:[%s11585_s1 + $0xfa8] ss:$20 sps:$4 sm:$0xff]   ;;  %v8357_v43 = vld [vmem:[%s11585_s1 + $0xfcc] ss:$20 sps:$4 sm:$0xff]  }
 0x168   :  { %4401 = vmatprep.subr.bf16.mxu0 %v8291_v44  ;;  %4729 = vmatprep.subr.bf16.mxu1 %v8294_v46  ;;  %v8360_v44 = vld [vmem:[%s11585_s1 + $0xfd4] ss:$20 sps:$4 sm:$0xff]  }
 0x169   :  { %v8355_v46 = vld [vmem:[%s11585_s1 + $0xfc8] ss:$20 sps:$4 sm:$0xff]  }
 0x16b   :  { %4402 = vmatpush1.bf16.msra.mxu0 %v8289_v47  ;;  %4730 = vmatpush1.bf16.msra.mxu1 %v8292_v48  ;;  %v8358_v47 = vld [vmem:[%s11585_s1 + $0xfd0] ss:$20 sps:$4 sm:$0xff]   ;;  %v8363_v48 = vld [vmem:[%s11585_s1 + $0xff4] ss:$20 sps:$4 sm:$0xff]  }
 0x16c   :  { %4403 = vmatprep.subr.bf16.mxu0 %v8297_v50  ;;  %4731 = vmatprep.subr.bf16.mxu1 %v8300_v53  ;;  %v8366_v50 = vld [vmem:[%s11585_s1 + $0xffc] ss:$20 sps:$4 sm:$0xff]  }
 0x16d   :  { %v8361_v53 = vld [vmem:[%s11585_s1 + $0xff0] ss:$20 sps:$4 sm:$0xff]  }
 0x16f   :  { %4404 = vmatpush1.bf16.msra.mxu0 %v8295_v54  ;;  %4732 = vmatpush1.bf16.msra.mxu1 %v8298_v55  ;;  %v8364_v54 = vld [vmem:[%s11585_s1 + $0xff8] ss:$20 sps:$4 sm:$0xff]   ;;  %v8369_v55 = vld [vmem:[%s11585_s1 + $0x101c] ss:$20 sps:$4 sm:$0xff]  }
 0x170   :  { %4405 = vmatprep.subr.bf16.mxu0 %v8303_v56  ;;  %4733 = vmatprep.subr.bf16.mxu1 %v8306_v57  ;;  %v8372_v56 = vld [vmem:[%s11585_s1 + $0x1024] ss:$20 sps:$4 sm:$0xff]  }
 0x171   :  { %v8367_v57 = vld [vmem:[%s11585_s1 + $0x1018] ss:$20 sps:$4 sm:$0xff]  }
 0x173   :  { %4406 = vmatpush1.bf16.msra.mxu0 %v8301_v58  ;;  %4734 = vmatpush1.bf16.msra.mxu1 %v8304_v59  ;;  %v8370_v58 = vld [vmem:[%s11585_s1 + $0x1020] ss:$20 sps:$4 sm:$0xff]   ;;  %v8375_v59 = vld [vmem:[%s11585_s1 + $0x1044] ss:$20 sps:$4 sm:$0xff]  }
 0x174   :  { %4407 = vmatprep.subr.bf16.mxu0 %v8309_v61  ;;  %4735 = vmatprep.subr.bf16.mxu1 %v8312_v63  ;;  %v8378_v61 = vld [vmem:[%s11585_s1 + $0x104c] ss:$20 sps:$4 sm:$0xff]  }
 0x175   :  { %v8373_v63 = vld [vmem:[%s11585_s1 + $0x1040] ss:$20 sps:$4 sm:$0xff]  }
 0x177   :  { %4408 = vmatpush1.bf16.msra.mxu0 %v8307_v0  ;;  %4736 = vmatpush1.bf16.msra.mxu1 %v8310_v1  ;;  %v8376_v0 = vld [vmem:[%s11585_s1 + $0x1048] ss:$20 sps:$4 sm:$0xff]   ;;  %v8381_v1 = vld [vmem:[%s11585_s1 + $0x106c] ss:$20 sps:$4 sm:$0xff]  }
 0x178   :  { %4409 = vmatprep.subr.bf16.mxu0 %v8315_v34  ;;  %4737 = vmatprep.subr.bf16.mxu1 %v8318_v3  ;;  %v8384_v34 = vld [vmem:[%s11585_s1 + $0x1074] ss:$20 sps:$4 sm:$0xff]  }
 0x179   :  { %v8379_v3 = vld [vmem:[%s11585_s1 + $0x1068] ss:$20 sps:$4 sm:$0xff]  }
 0x17b   :  { %4410 = vmatpush1.bf16.msra.mxu0 %v8313_v4  ;;  %4738 = vmatpush1.bf16.msra.mxu1 %v8316_v7  ;;  %v8382_v4 = vld [vmem:[%s11585_s1 + $0x1070] ss:$20 sps:$4 sm:$0xff]  }
 0x17c   :  { %4411 = vmatprep.subr.bf16.mxu0 %v8321_v8  ;;  %4739 = vmatprep.subr.bf16.mxu1 %v8324_v9  ;;  %v8385_v7 = vld [vmem:[%s11585_s1 + $0x1090] ss:$20 sps:$4 sm:$0xff]   ;;  %v8388_v8 = vld [vmem:[%s11585_s1 + $0x1098] ss:$20 sps:$4 sm:$0xff]  }
 0x17d   :  { %v8393_v9 = vld [vmem:[%s11585_s1 + $0x10bc] ss:$20 sps:$4 sm:$0xff]  }
 0x17f   :  { %4412 = vmatpush1.bf16.msra.mxu0 %v8319_v10  ;;  %4740 = vmatpush1.bf16.msra.mxu1 %v8322_v12  ;;  %v8396_v10 = vld [vmem:[%s11585_s1 + $0x10c4] ss:$20 sps:$4 sm:$0xff]  }
 0x180   :  { %4422 = vmatprep.subr.bf16.mxu0 %v8327_v14  ;;  %4750 = vmatprep.subr.bf16.mxu1 %v8330_v52  ;;  %v8391_v12 = vld [vmem:[%s11585_s1 + $0x10b8] ss:$20 sps:$4 sm:$0xff]   ;;  %v8394_v14 = vld [vmem:[%s11585_s1 + $0x10c0] ss:$20 sps:$4 sm:$0xff]  }
 0x181   :  { %v8399_v52 = vld [vmem:[%s11585_s1 + $0x10e4] ss:$20 sps:$4 sm:$0xff]  }
 0x182   :  { %4414 = vmatmul.mubr.bf16.vlgmr.msra.gmra.mrb[0].mxu0 %v10206_v19  ;;  %4742 = vmatmul.mubr.bf16.vlgmr.msra.gmra.mrb[0].mxu1 %v10206_v19 }
 0x183   :  { %4423 = vmatpush1.bf16.msra.mxu0 %v8325_v16  ;;  %4751 = vmatpush1.bf16.msra.mxu1 %v8328_v20  ;;  %v8402_v16 = vld [vmem:[%s11585_s1 + $0x10ec] ss:$20 sps:$4 sm:$0xff]   ;;  %v8400_v20 = vld [vmem:[%s11585_s1 + $0x10e8] ss:$20 sps:$4 sm:$0xff]  }
 0x184   :  { %4424 = vmatprep.subr.bf16.mxu0 %v8333_v21  ;;  %4752 = vmatprep.subr.bf16.mxu1 %v8336_v22  ;;  %v8405_v21 = vld [vmem:[%s11585_s1 + $0x110c] ss:$20 sps:$4 sm:$0xff]   ;;  %v8408_v22 = vld [vmem:[%s11585_s1 + $0x1114] ss:$20 sps:$4 sm:$0xff]  }
 0x185   :  { %4454 = vmatprep.mubr.bf16.mxu0 %v10221_v25  ;;  %4782 = vmatprep.mubr.bf16.mxu1 %v10221_v25 }
 0x187   :  { %4425 = vmatpush1.bf16.msra.mxu0 %v8331_v24  ;;  %4753 = vmatpush1.bf16.msra.mxu1 %v8334_v26  ;;  %v8403_v24 = vld [vmem:[%s11585_s1 + $0x1108] ss:$20 sps:$4 sm:$0xff]   ;;  %v8406_v26 = vld [vmem:[%s11585_s1 + $0x1110] ss:$20 sps:$4 sm:$0xff]  }
 0x188   :  { %4426 = vmatprep.subr.bf16.mxu0 %v8339_v28  ;;  %4754 = vmatprep.subr.bf16.mxu1 %v8342_v29  ;;  %v8411_v28 = vld [vmem:[%s11585_s1 + $0x1134] ss:$20 sps:$4 sm:$0xff]   ;;  %v8414_v29 = vld [vmem:[%s11585_s1 + $0x113c] ss:$20 sps:$4 sm:$0xff]  }
 0x18b   :  { %4427 = vmatpush1.bf16.msra.mxu0 %v8337_v30  ;;  %4755 = vmatpush1.bf16.msra.mxu1 %v8340_v31  ;;  %v8409_v30 = vld [vmem:[%s11585_s1 + $0x1130] ss:$20 sps:$4 sm:$0xff]   ;;  %v8412_v31 = vld [vmem:[%s11585_s1 + $0x1138] ss:$20 sps:$4 sm:$0xff]  }
 0x18c   :  { %4428 = vmatprep.subr.bf16.mxu0 %v8345_v32  ;;  %4756 = vmatprep.subr.bf16.mxu1 %v8348_v35  ;;  %v8417_v32 = vld [vmem:[%s11585_s1 + $0x115c] ss:$20 sps:$4 sm:$0xff]   ;;  %v8420_v35 = vld [vmem:[%s11585_s1 + $0x1164] ss:$20 sps:$4 sm:$0xff]  }
 0x18f   :  { %4429 = vmatpush1.bf16.msra.mxu0 %v8343_v36  ;;  %4757 = vmatpush1.bf16.msra.mxu1 %v8346_v37  ;;  %v8415_v36 = vld [vmem:[%s11585_s1 + $0x1158] ss:$20 sps:$4 sm:$0xff]   ;;  %v8418_v37 = vld [vmem:[%s11585_s1 + $0x1160] ss:$20 sps:$4 sm:$0xff]  }
 0x190   :  { %4430 = vmatprep.subr.bf16.mxu0 %v8351_v38  ;;  %4758 = vmatprep.subr.bf16.mxu1 %v8354_v39  ;;  %v8424_v38 = vld [vmem:[%s11585_s1 + $0x1184] ss:$20 sps:$4 sm:$0xff]   ;;  %v8427_v39 = vld [vmem:[%s11585_s1 + $0x118c] ss:$20 sps:$4 sm:$0xff]  }
 0x193   :  { %4431 = vmatpush1.bf16.msra.mxu0 %v8349_v40  ;;  %4759 = vmatpush1.bf16.msra.mxu1 %v8352_v41  ;;  %v8422_v40 = vld [vmem:[%s11585_s1 + $0x1180] ss:$20 sps:$4 sm:$0xff]   ;;  %v10409_v41 = vrot.slane %v10188_v11, %v9082_v49  ;;  %v8428_v49 = vld [vmem:[%s11585_s1 + $0x11a8] ss:$20 sps:$4 sm:$0xff]   ;;  %v10425_v11 = vcombine.high %v10221_v25, %v10221_v25 }
 0x194   :  { %4432 = vmatprep.subr.bf16.mxu0 %v8357_v43  ;;  %4760 = vmatprep.subr.bf16.mxu1 %v8360_v44  ;;  %v8425_v43 = vld [vmem:[%s11585_s1 + $0x1188] ss:$20 sps:$4 sm:$0xff]   ;;  %v8430_v44 = vld [vmem:[%s11585_s1 + $0x11ac] ss:$20 sps:$4 sm:$0xff]  }
 0x197   :  { %4433 = vmatpush1.bf16.msra.mxu0 %v8355_v46  ;;  %4761 = vmatpush1.bf16.msra.mxu1 %v8358_v47  ;;  %v8433_v46 = vld [vmem:[%s11585_s1 + $0x11b4] ss:$20 sps:$4 sm:$0xff]   ;;  %v8431_v47 = vld [vmem:[%s11585_s1 + $0x11b0] ss:$20 sps:$4 sm:$0xff]  }
 0x198   :  { %4434 = vmatprep.subr.bf16.mxu0 %v8363_v48  ;;  %4762 = vmatprep.subr.bf16.mxu1 %v8366_v50  ;;  %v8436_v48 = vld [vmem:[%s11585_s1 + $0x11d4] ss:$20 sps:$4 sm:$0xff]   ;;  %v8439_v50 = vld [vmem:[%s11585_s1 + $0x11dc] ss:$20 sps:$4 sm:$0xff]  }
 0x19b   :  { %4435 = vmatpush1.bf16.msra.mxu0 %v8361_v53  ;;  %4763 = vmatpush1.bf16.msra.mxu1 %v8364_v54  ;;  %v8434_v53 = vld [vmem:[%s11585_s1 + $0x11d0] ss:$20 sps:$4 sm:$0xff]   ;;  %v8437_v54 = vld [vmem:[%s11585_s1 + $0x11d8] ss:$20 sps:$4 sm:$0xff]  }
 0x19c   :  { %4436 = vmatprep.subr.bf16.mxu0 %v8369_v55  ;;  %4764 = vmatprep.subr.bf16.mxu1 %v8372_v56  ;;  %v8442_v55 = vld [vmem:[%s11585_s1 + $0x11fc] ss:$20 sps:$4 sm:$0xff]   ;;  %v8445_v56 = vld [vmem:[%s11585_s1 + $0x1204] ss:$20 sps:$4 sm:$0xff]  }
 0x19f   :  { %4437 = vmatpush1.bf16.msra.mxu0 %v8367_v57  ;;  %4765 = vmatpush1.bf16.msra.mxu1 %v8370_v58  ;;  %v8440_v57 = vld [vmem:[%s11585_s1 + $0x11f8] ss:$20 sps:$4 sm:$0xff]   ;;  %v8443_v58 = vld [vmem:[%s11585_s1 + $0x1200] ss:$20 sps:$4 sm:$0xff]  }
 0x1a0   :  { %4438 = vmatprep.subr.bf16.mxu0 %v8375_v59  ;;  %4766 = vmatprep.subr.bf16.mxu1 %v8378_v61  ;;  %v8448_v59 = vld [vmem:[%s11585_s1 + $0x1224] ss:$20 sps:$4 sm:$0xff]   ;;  %v8451_v61 = vld [vmem:[%s11585_s1 + $0x122c] ss:$20 sps:$4 sm:$0xff]  }
 0x1a3   :  { %4439 = vmatpush1.bf16.msra.mxu0 %v8373_v63  ;;  %4767 = vmatpush1.bf16.msra.mxu1 %v8376_v0  ;;  %v8446_v63 = vld [vmem:[%s11585_s1 + $0x1220] ss:$20 sps:$4 sm:$0xff]   ;;  %v8449_v0 = vld [vmem:[%s11585_s1 + $0x1228] ss:$20 sps:$4 sm:$0xff]  }
 0x1a4   :  { %4440 = vmatprep.subr.bf16.mxu0 %v8381_v1  ;;  %4768 = vmatprep.subr.bf16.mxu1 %v8384_v34  ;;  %v8454_v1 = vld [vmem:[%s11585_s1 + $0x124c] ss:$20 sps:$4 sm:$0xff]   ;;  %v8457_v34 = vld [vmem:[%s11585_s1 + $0x1254] ss:$20 sps:$4 sm:$0xff]  }
 0x1a7   :  { %4441 = vmatpush1.bf16.msra.mxu0 %v8379_v3  ;;  %4769 = vmatpush1.bf16.msra.mxu1 %v8382_v4  ;;  %v8452_v3 = vld [vmem:[%s11585_s1 + $0x1248] ss:$20 sps:$4 sm:$0xff]   ;;  %v8455_v4 = vld [vmem:[%s11585_s1 + $0x1250] ss:$20 sps:$4 sm:$0xff]  }
 0x1a8   :  { %4442 = vmatprep.subr.bf16.mxu0 %v8387_v5  ;;  %4770 = vmatprep.subr.bf16.mxu1 %v8390_v6  ;;  %v8460_v5 = vld [vmem:[%s11585_s1 + $0x1274] ss:$20 sps:$4 sm:$0xff]   ;;  %v8463_v6 = vld [vmem:[%s11585_s1 + $0x127c] ss:$20 sps:$4 sm:$0xff]  }
 0x1ab   :  { %4443 = vmatpush1.bf16.msra.mxu0 %v8385_v7  ;;  %4771 = vmatpush1.bf16.msra.mxu1 %v8388_v8  ;;  %v8458_v7 = vld [vmem:[%s11585_s1 + $0x1270] ss:$20 sps:$4 sm:$0xff]   ;;  %v8461_v8 = vld [vmem:[%s11585_s1 + $0x1278] ss:$20 sps:$4 sm:$0xff]  }
 0x1ac   :  { %4444 = vmatprep.subr.bf16.mxu0 %v8393_v9  ;;  %4772 = vmatprep.subr.bf16.mxu1 %v8396_v10  ;;  %v8466_v9 = vld [vmem:[%s11585_s1 + $0x129c] ss:$20 sps:$4 sm:$0xff]   ;;  %v8469_v10 = vld [vmem:[%s11585_s1 + $0x12a4] ss:$20 sps:$4 sm:$0xff]  }
 0x1af   :  { %4445 = vmatpush1.bf16.msra.mxu0 %v8391_v12  ;;  %4773 = vmatpush1.bf16.msra.mxu1 %v8394_v14  ;;  %v8464_v12 = vld [vmem:[%s11585_s1 + $0x1298] ss:$20 sps:$4 sm:$0xff]   ;;  %v8467_v14 = vld [vmem:[%s11585_s1 + $0x12a0] ss:$20 sps:$4 sm:$0xff]  }
 0x1b0   :  { %4446 = vmatprep.subr.bf16.mxu0 %v8399_v52  ;;  %4774 = vmatprep.subr.bf16.mxu1 %v8402_v16  ;;  %v8472_v52 = vld [vmem:[%s11585_s1 + $0x12c4] ss:$20 sps:$4 sm:$0xff]   ;;  %v8475_v16 = vld [vmem:[%s11585_s1 + $0x12cc] ss:$20 sps:$4 sm:$0xff]  }
 0x1b3   :  { %4447 = vmatpush1.bf16.msra.mxu0 %v8397_v18  ;;  %4775 = vmatpush1.bf16.msra.mxu1 %v8400_v20  ;;  %v8470_v18 = vld [vmem:[%s11585_s1 + $0x12c0] ss:$20 sps:$4 sm:$0xff]   ;;  %v8473_v20 = vld [vmem:[%s11585_s1 + $0x12c8] ss:$20 sps:$4 sm:$0xff]  }
 0x1b4   :  { %4448 = vmatprep.subr.bf16.mxu0 %v8405_v21  ;;  %4776 = vmatprep.subr.bf16.mxu1 %v8408_v22  ;;  %v8478_v21 = vld [vmem:[%s11585_s1 + $0x12ec] ss:$20 sps:$4 sm:$0xff]   ;;  %v8481_v22 = vld [vmem:[%s11585_s1 + $0x12f4] ss:$20 sps:$4 sm:$0xff]  }
 0x1b7   :  { %4449 = vmatpush1.bf16.msra.mxu0 %v8403_v24  ;;  %4777 = vmatpush1.bf16.msra.mxu1 %v8406_v26  ;;  %v8476_v24 = vld [vmem:[%s11585_s1 + $0x12e8] ss:$20 sps:$4 sm:$0xff]   ;;  %v8479_v26 = vld [vmem:[%s11585_s1 + $0x12f0] ss:$20 sps:$4 sm:$0xff]  }
 0x1b8   :  { %4450 = vmatprep.subr.bf16.mxu0 %v8411_v28  ;;  %4778 = vmatprep.subr.bf16.mxu1 %v8414_v29  ;;  %v8484_v28 = vld [vmem:[%s11585_s1 + $0x1314] ss:$20 sps:$4 sm:$0xff]   ;;  %v8487_v29 = vld [vmem:[%s11585_s1 + $0x131c] ss:$20 sps:$4 sm:$0xff]  }
 0x1bb   :  { %4451 = vmatpush1.bf16.msra.mxu0 %v8409_v30  ;;  %4779 = vmatpush1.bf16.msra.mxu1 %v8412_v31  ;;  %v8482_v30 = vld [vmem:[%s11585_s1 + $0x1310] ss:$20 sps:$4 sm:$0xff]   ;;  %v8485_v31 = vld [vmem:[%s11585_s1 + $0x1318] ss:$20 sps:$4 sm:$0xff]  }
 0x1bc   :  { %4452 = vmatprep.subr.bf16.mxu0 %v8417_v32  ;;  %4780 = vmatprep.subr.bf16.mxu1 %v8420_v35  ;;  %v8490_v32 = vld [vmem:[%s11585_s1 + $0x133c] ss:$20 sps:$4 sm:$0xff]   ;;  %v8493_v35 = vld [vmem:[%s11585_s1 + $0x1344] ss:$20 sps:$4 sm:$0xff]  }
 0x1bf   :  { %4453 = vmatpush1.bf16.msra.mxu0 %v8415_v36  ;;  %4781 = vmatpush1.bf16.msra.mxu1 %v8418_v37  ;;  %v8488_v36 = vld [vmem:[%s11585_s1 + $0x1338] ss:$20 sps:$4 sm:$0xff]   ;;  %v8491_v37 = vld [vmem:[%s11585_s1 + $0x1340] ss:$20 sps:$4 sm:$0xff]  }
 0x1c0   :  { %4463 = vmatprep.subr.bf16.mxu0 %v8424_v38  ;;  %4791 = vmatprep.subr.bf16.mxu1 %v8427_v39  ;;  %v8496_v38 = vld [vmem:[%s11585_s1 + $0x1364] ss:$20 sps:$4 sm:$0xff]   ;;  %v8499_v39 = vld [vmem:[%s11585_s1 + $0x136c] ss:$20 sps:$4 sm:$0xff]  }
 0x1c2   :  { %4455 = vmatmul.mubr.bf16.vlgmr.msra.gmra.mrb[0].mxu0 %v10409_v41  ;;  %4783 = vmatmul.mubr.bf16.vlgmr.msra.gmra.mrb[0].mxu1 %v10409_v41 }
 0x1c3   :  { %4464 = vmatpush1.bf16.msra.mxu0 %v8422_v40  ;;  %4792 = vmatpush1.bf16.msra.mxu1 %v8425_v43  ;;  %v8494_v40 = vld [vmem:[%s11585_s1 + $0x1360] ss:$20 sps:$4 sm:$0xff]   ;;  %v8497_v43 = vld [vmem:[%s11585_s1 + $0x1368] ss:$20 sps:$4 sm:$0xff]  }
 0x1c4   :  { %4465 = vmatprep.subr.bf16.mxu0 %v8430_v44  ;;  %4793 = vmatprep.subr.bf16.mxu1 %v8433_v46  ;;  %v8500_v44 = vld [vmem:[%s11585_s1 + $0x150] ss:$20 sps:$4 sm:$0xff]  }
 0x1c5   :  { %7303 = vmatprep.mubr.msk.bf16.mxu0 %vm4172_vm0, %v10425_v11  ;;  %7304 = vmatprep.mubr.msk.bf16.mxu1 %vm4172_vm0, %v10425_v11  ;;  %v8501_v46 = vld [vmem:[%s11585_s1 + $0x3d0] ss:$20 sps:$4 sm:$0xff]  }
 0x1c7   :  { %4466 = vmatpush1.bf16.msra.mxu0 %v8428_v49  ;;  %4794 = vmatpush1.bf16.msra.mxu1 %v8431_v47  ;;  %v8502_v49 = vld [vmem:[%s11585_s1 + $0x10] ss:$20 sps:$4 sm:$0xff]  }
 0x1c8   :  { %4467 = vmatprep.subr.bf16.mxu0 %v8436_v48  ;;  %4795 = vmatprep.subr.bf16.mxu1 %v8439_v50  ;;  %v8503_v47 = vld [vmem:[%s11585_s1 + $0x290] ss:$20 sps:$4 sm:$0xff]   ;;  %v10582_v48 = vcombine.high %v10409_v41, %v10409_v41  ;;  %v8504_v50 = vld [vmem:[%s11585_s1 + $0x178] ss:$20 sps:$4 sm:$0xff]  }
 0x1cb   :  { %4468 = vmatpush1.bf16.msra.mxu0 %v8434_v53  ;;  %4796 = vmatpush1.bf16.msra.mxu1 %v8437_v54  ;;  %v8505_v53 = vld [vmem:[%s11585_s1 + $0x3f8] ss:$20 sps:$4 sm:$0xff]  }
 0x1cc   :  { %4469 = vmatprep.subr.bf16.mxu0 %v8442_v55  ;;  %4797 = vmatprep.subr.bf16.mxu1 %v8445_v56  ;;  %v8506_v54 = vld [vmem:[%s11585_s1 + $0x38] ss:$20 sps:$4 sm:$0xff]   ;;  %v8508_v56 = vld [vmem:[%s11585_s1 + $0x1a0] ss:$20 sps:$4 sm:$0xff]  }
 0x1cd   :  { %v8507_v55 = vld [vmem:[%s11585_s1 + $0x2b8] ss:$20 sps:$4 sm:$0xff]  }
 0x1cf   :  { %4470 = vmatpush1.bf16.msra.mxu0 %v8440_v57  ;;  %4798 = vmatpush1.bf16.msra.mxu1 %v8443_v58  ;;  %v8509_v57 = vld [vmem:[%s11585_s1 + $0x420] ss:$20 sps:$4 sm:$0xff]  }
 0x1d0   :  { %4471 = vmatprep.subr.bf16.mxu0 %v8448_v59  ;;  %4799 = vmatprep.subr.bf16.mxu1 %v8451_v61  ;;  %v8510_v58 = vld [vmem:[%s11585_s1 + $0x60] ss:$20 sps:$4 sm:$0xff]   ;;  %v8512_v61 = vld [vmem:[%s11585_s1 + $0x1c8] ss:$20 sps:$4 sm:$0xff]  }
 0x1d1   :  { %v8511_v59 = vld [vmem:[%s11585_s1 + $0x2e0] ss:$20 sps:$4 sm:$0xff]  }
 0x1d3   :  { %4472 = vmatpush1.bf16.msra.mxu0 %v8446_v63  ;;  %4800 = vmatpush1.bf16.msra.mxu1 %v8449_v0  ;;  %v8513_v63 = vld [vmem:[%s11585_s1 + $0x448] ss:$20 sps:$4 sm:$0xff]  }
 0x1d4   :  { %4473 = vmatprep.subr.bf16.mxu0 %v8454_v1  ;;  %4801 = vmatprep.subr.bf16.mxu1 %v8457_v34  ;;  %v8514_v0 = vld [vmem:[%s11585_s1 + $0x88] ss:$20 sps:$4 sm:$0xff]   ;;  %v8517_v1 = vld [vmem:[%s11585_s1 + $0x470] ss:$20 sps:$4 sm:$0xff]  }
 0x1d5   :  { %v8518_v34 = vld [vmem:[%s11585_s1 + $0xb0] ss:$20 sps:$4 sm:$0xff]  }
 0x1d7   :  { %4474 = vmatpush1.bf16.msra.mxu0 %v8452_v3  ;;  %4802 = vmatpush1.bf16.msra.mxu1 %v8455_v4  ;;  %v8519_v3 = vld [vmem:[%s11585_s1 + $0x330] ss:$20 sps:$4 sm:$0xff]   ;;  %v8520_v4 = vld [vmem:[%s11585_s1 + $0x218] ss:$20 sps:$4 sm:$0xff]  }
 0x1d8   :  { %4475 = vmatprep.subr.bf16.mxu0 %v8460_v5  ;;  %4803 = vmatprep.subr.bf16.mxu1 %v8463_v6  ;;  %v8521_v5 = vld [vmem:[%s11585_s1 + $0x498] ss:$20 sps:$4 sm:$0xff]  }
 0x1d9   :  { %v8522_v6 = vld [vmem:[%s11585_s1 + $0xd8] ss:$20 sps:$4 sm:$0xff]  }
 0x1db   :  { %4476 = vmatpush1.bf16.msra.mxu0 %v8458_v7  ;;  %4804 = vmatpush1.bf16.msra.mxu1 %v8461_v8  ;;  %v8523_v7 = vld [vmem:[%s11585_s1 + $0x358] ss:$20 sps:$4 sm:$0xff]   ;;  %v8524_v8 = vld [vmem:[%s11585_s1 + $0x240] ss:$20 sps:$4 sm:$0xff]  }
 0x1dc   :  { %4477 = vmatprep.subr.bf16.mxu0 %v8466_v9  ;;  %4805 = vmatprep.subr.bf16.mxu1 %v8469_v10  ;;  %v8525_v9 = vld [vmem:[%s11585_s1 + $0x4c0] ss:$20 sps:$4 sm:$0xff]  }
 0x1dd   :  { %v8526_v10 = vld [vmem:[%s11585_s1 + $0x100] ss:$20 sps:$4 sm:$0xff]  }
 0x1df   :  { %4478 = vmatpush1.bf16.msra.mxu0 %v8464_v12  ;;  %4806 = vmatpush1.bf16.msra.mxu1 %v8467_v14  ;;  %v8527_v12 = vld [vmem:[%s11585_s1 + $0x380] ss:$20 sps:$4 sm:$0xff]   ;;  %v8528_v14 = vld [vmem:[%s11585_s1 + $0x268] ss:$20 sps:$4 sm:$0xff]  }
 0x1e0   :  { %4479 = vmatprep.subr.bf16.mxu0 %v8472_v52  ;;  %4807 = vmatprep.subr.bf16.mxu1 %v8475_v16  ;;  %v8529_v52 = vld [vmem:[%s11585_s1 + $0x4e8] ss:$20 sps:$4 sm:$0xff]  }
 0x1e1   :  { %v8530_v16 = vld [vmem:[%s11585_s1 + $0x128] ss:$20 sps:$4 sm:$0xff]  }
 0x1e3   :  { %4480 = vmatpush1.bf16.msra.mxu0 %v8470_v18  ;;  %4808 = vmatpush1.bf16.msra.mxu1 %v8473_v20  ;;  %v8531_v18 = vld [vmem:[%s11585_s1 + $0x3a8] ss:$20 sps:$4 sm:$0xff]   ;;  %v8532_v20 = vld [vmem:[%s11585_s1 + $0x650] ss:$20 sps:$4 sm:$0xff]  }
 0x1e4   :  { %4481 = vmatprep.subr.bf16.mxu0 %v8478_v21  ;;  %4809 = vmatprep.subr.bf16.mxu1 %v8481_v22  ;;  %v8533_v21 = vld [vmem:[%s11585_s1 + $0x8d0] ss:$20 sps:$4 sm:$0xff]  }
 0x1e7   :  { %4482 = vmatpush1.bf16.msra.mxu0 %v8476_v24  ;;  %4810 = vmatpush1.bf16.msra.mxu1 %v8479_v26 }
 0x1e8   :  { %4483 = vmatprep.subr.bf16.mxu0 %v8484_v28  ;;  %4811 = vmatprep.subr.bf16.mxu1 %v8487_v29 }
 0x1eb   :  { %4484 = vmatpush1.bf16.msra.mxu0 %v8482_v30  ;;  %4812 = vmatpush1.bf16.msra.mxu1 %v8485_v31 }
 0x1ec   :  { %4485 = vmatprep.subr.bf16.mxu0 %v8490_v32  ;;  %4813 = vmatprep.subr.bf16.mxu1 %v8493_v35 }
 0x1ef   :  { %4486 = vmatpush1.bf16.msra.mxu0 %v8488_v36  ;;  %4814 = vmatpush1.bf16.msra.mxu1 %v8491_v37 }
 0x1f0   :  { %4487 = vmatprep.subr.bf16.mxu0 %v8496_v38  ;;  %4815 = vmatprep.subr.bf16.mxu1 %v8499_v39 }
 0x1f3   :  { %4488 = vmatpush1.bf16.msra.mxu0 %v8494_v40  ;;  %4816 = vmatpush1.bf16.msra.mxu1 %v8497_v43 }
 0x1f4   :  { %7491 = vmatprep.subr.bf16.mxu0 %v8500_v44  ;;  %7513 = vmatprep.subr.bf16.mxu1 %v8501_v46 }
 0x1f6   :  { %4496 = vmatmul.mubr.bf16.vlgmr.msra.gmra.mrb[0].mxu0 %v10582_v48  ;;  %4824 = vmatmul.mubr.bf16.vlgmr.msra.gmra.mrb[0].mxu1 %v10582_v48 }
 0x1f7   :  { %7492 = vmatpush3.bf16.msra.mxu0 %v8502_v49  ;;  %7514 = vmatpush3.bf16.msra.mxu1 %v8503_v47 }
 0x1f8   :  { %7493 = vmatprep.subr.bf16.mxu0 %v8504_v50  ;;  %7515 = vmatprep.subr.bf16.mxu1 %v8505_v53 }
 0x1f9   :  { %4864 = vmatprep.mubr.bf16.mxu0 %v9113_v60  ;;  %4904 = vmatprep.mubr.bf16.mxu1 %v9179_v17  ;;  %v8515_v60 = vld [vmem:[%s11585_s1 + $0x308] ss:$20 sps:$4 sm:$0xff]   ;;  %v8516_v17 = vld [vmem:[%s11585_s1 + $0x1f0] ss:$20 sps:$4 sm:$0xff]  }
 0x1fb   :  { %7494 = vmatpush3.bf16.msra.mxu0 %v8506_v54  ;;  %7516 = vmatpush3.bf16.msra.mxu1 %v8507_v55 }
 0x1fc   :  { %7495 = vmatprep.subr.bf16.mxu0 %v8508_v56  ;;  %7517 = vmatprep.subr.bf16.mxu1 %v8509_v57 }
 0x1ff   :  { %7496 = vmatpush3.bf16.msra.mxu0 %v8510_v58  ;;  %7518 = vmatpush3.bf16.msra.mxu1 %v8511_v59 }
 0x200   :  { %7497 = vmatprep.subr.bf16.mxu0 %v8512_v61  ;;  %7519 = vmatprep.subr.bf16.mxu1 %v8513_v63 }
 0x203   :  { %7498 = vmatpush3.bf16.msra.mxu0 %v8514_v0  ;;  %7520 = vmatpush3.bf16.msra.mxu1 %v8515_v60 }
 0x204   :  { %7499 = vmatprep.subr.bf16.mxu0 %v8516_v17  ;;  %7521 = vmatprep.subr.bf16.mxu1 %v8517_v1 }
 0x207   :  { %7500 = vmatpush3.bf16.msra.mxu0 %v8518_v34  ;;  %7522 = vmatpush3.bf16.msra.mxu1 %v8519_v3 }
 0x208   :  { %7501 = vmatprep.subr.bf16.mxu0 %v8520_v4  ;;  %7523 = vmatprep.subr.bf16.mxu1 %v8521_v5 }
 0x20b   :  { %7502 = vmatpush3.bf16.msra.mxu0 %v8522_v6  ;;  %7524 = vmatpush3.bf16.msra.mxu1 %v8523_v7 }
 0x20c   :  { %7503 = vmatprep.subr.bf16.mxu0 %v8524_v8  ;;  %7525 = vmatprep.subr.bf16.mxu1 %v8525_v9 }
 0x20f   :  { %7504 = vmatpush3.bf16.msra.mxu0 %v8526_v10  ;;  %7526 = vmatpush3.bf16.msra.mxu1 %v8527_v12 }
 0x210   :  { %7505 = vmatprep.subr.bf16.mxu0 %v8528_v14  ;;  %7527 = vmatprep.subr.bf16.mxu1 %v8529_v52 }
 0x211   :  { %12 = vsyncpa [#allocation3], 0  ;;  %v8534_v22 = vld [vmem:[%s11585_s1 + $0x510] ss:$20 sps:$4 sm:$0xff]   ;;  %v8536_v26 = vld [vmem:[%s11585_s1 + $0x678] ss:$20 sps:$4 sm:$0xff]  }
 0x212   :  { %v8535_v24 = vld [vmem:[%s11585_s1 + $0x790] ss:$20 sps:$4 sm:$0xff]   ;;  %v8537_v28 = vld [vmem:[%s11585_s1 + $0x8f8] ss:$20 sps:$4 sm:$0xff]   ;;  %v8540_v31 = vld [vmem:[%s11585_s1 + $0x6a0] ss:$20 sps:$4 sm:$0xff]  }
 0x213   :  { %7506 = vmatpush3.bf16.msra.mxu0 %v8530_v16  ;;  %7528 = vmatpush3.bf16.msra.mxu1 %v8531_v18  ;;  %v8538_v29 = vld [vmem:[%s11585_s1 + $0x538] ss:$20 sps:$4 sm:$0xff]   ;;  %v8543_v32 = vld [vmem:[%s11585_s1 + $0x7e0] ss:$20 sps:$4 sm:$0xff]   ;;  %v8544_v35 = vld [vmem:[%s11585_s1 + $0x6c8] ss:$20 sps:$4 sm:$0xff]  }
 0x214   :  { %7535 = vmatprep.subr.bf16.mxu0 %v8532_v20  ;;  %7557 = vmatprep.subr.bf16.mxu1 %v8533_v21  ;;  %v8539_v30 = vld [vmem:[%s11585_s1 + $0x7b8] ss:$20 sps:$4 sm:$0xff]   ;;  %v8547_v36 = vld [vmem:[%s11585_s1 + $0x808] ss:$20 sps:$4 sm:$0xff]   ;;  %v8548_v37 = vld [vmem:[%s11585_s1 + $0x6f0] ss:$20 sps:$4 sm:$0xff]  }
 0x215   :  { %v8549_v38 = vld [vmem:[%s11585_s1 + $0x970] ss:$20 sps:$4 sm:$0xff]   ;;  %v8552_v43 = vld [vmem:[%s11585_s1 + $0x718] ss:$20 sps:$4 sm:$0xff]   ;;  %v8556_v47 = vld [vmem:[%s11585_s1 + $0x740] ss:$20 sps:$4 sm:$0xff]  }
 0x216   :  { %4865 = vmatmul.mubr.bf16.vlgmr.msra.gmra.mrb[4].mxu0 %v9166_v13  ;;  %4905 = vmatmul.mubr.bf16.vlgmr.msra.gmra.mrb[4].mxu1 %v9377_v23  ;;  %v8541_v13 = vld [vmem:[%s11585_s1 + $0x920] ss:$20 sps:$4 sm:$0xff]   ;;  %v8550_v39 = vld [vmem:[%s11585_s1 + $0x5b0] ss:$20 sps:$4 sm:$0xff]   ;;  %v8553_v44 = vld [vmem:[%s11585_s1 + $0x998] ss:$20 sps:$4 sm:$0xff]  }
 0x217   :  { %7536 = vmatpush3.bf16.msra.mxu0 %v8534_v22  ;;  %7558 = vmatpush3.bf16.msra.mxu1 %v8535_v24  ;;  %v8542_v23 = vld [vmem:[%s11585_s1 + $0x560] ss:$20 sps:$4 sm:$0xff]   ;;  %v8551_v40 = vld [vmem:[%s11585_s1 + $0x830] ss:$20 sps:$4 sm:$0xff]   ;;  %v8554_v46 = vld [vmem:[%s11585_s1 + $0x5d8] ss:$20 sps:$4 sm:$0xff]  }
 0x218   :  { %7537 = vmatprep.subr.bf16.mxu0 %v8536_v26  ;;  %7559 = vmatprep.subr.bf16.mxu1 %v8537_v28  ;;  %v8555_v49 = vld [vmem:[%s11585_s1 + $0x858] ss:$20 sps:$4 sm:$0xff]   ;;  %v8557_v50 = vld [vmem:[%s11585_s1 + $0x9c0] ss:$20 sps:$4 sm:$0xff]   ;;  %v8560_v55 = vld [vmem:[%s11585_s1 + $0x768] ss:$20 sps:$4 sm:$0xff]  }
 0x219   :  { %4944 = vmatprep.mubr.bf16.mxu0 %v9389_v27  ;;  %4984 = vmatprep.mubr.bf16.mxu1 %v9593_v15  ;;  %v8545_v27 = vld [vmem:[%s11585_s1 + $0x948] ss:$20 sps:$4 sm:$0xff]   ;;  %v8558_v53 = vld [vmem:[%s11585_s1 + $0x600] ss:$20 sps:$4 sm:$0xff]   ;;  %v8564_v59 = vld [vmem:[%s11585_s1 + $0xb50] ss:$20 sps:$4 sm:$0xff]  }
 0x21a   :  { %v8546_v15 = vld [vmem:[%s11585_s1 + $0x588] ss:$20 sps:$4 sm:$0xff]   ;;  %v8559_v54 = vld [vmem:[%s11585_s1 + $0x880] ss:$20 sps:$4 sm:$0xff]   ;;  %v8565_v61 = vld [vmem:[%s11585_s1 + $0xdd0] ss:$20 sps:$4 sm:$0xff]  }
 0x21b   :  { %7538 = vmatpush3.bf16.msra.mxu0 %v8538_v29  ;;  %7560 = vmatpush3.bf16.msra.mxu1 %v8539_v30  ;;  %v8561_v56 = vld [vmem:[%s11585_s1 + $0x9e8] ss:$20 sps:$4 sm:$0xff]   ;;  %v8566_v63 = vld [vmem:[%s11585_s1 + $0xa10] ss:$20 sps:$4 sm:$0xff]   ;;  %v8568_v60 = vld [vmem:[%s11585_s1 + $0xb78] ss:$20 sps:$4 sm:$0xff]  }
 0x21c   :  { %7539 = vmatprep.subr.bf16.mxu0 %v8540_v31  ;;  %7561 = vmatprep.subr.bf16.mxu1 %v8541_v13  ;;  %v8562_v57 = vld [vmem:[%s11585_s1 + $0x628] ss:$20 sps:$4 sm:$0xff]   ;;  %v8567_v0 = vld [vmem:[%s11585_s1 + $0xc90] ss:$20 sps:$4 sm:$0xff]   ;;  %v8569_v17 = vld [vmem:[%s11585_s1 + $0xdf8] ss:$20 sps:$4 sm:$0xff]  }
 0x21d   :  { %v8563_v58 = vld [vmem:[%s11585_s1 + $0x8a8] ss:$20 sps:$4 sm:$0xff]   ;;  %v8570_v1 = vld [vmem:[%s11585_s1 + $0xa38] ss:$20 sps:$4 sm:$0xff]   ;;  %v8572_v3 = vld [vmem:[%s11585_s1 + $0xba0] ss:$20 sps:$4 sm:$0xff]  }
 0x21e   :  { %v8571_v34 = vld [vmem:[%s11585_s1 + $0xcb8] ss:$20 sps:$4 sm:$0xff]   ;;  %v8575_v4 = vld [vmem:[%s11585_s1 + $0xce0] ss:$20 sps:$4 sm:$0xff]   ;;  %v8576_v5 = vld [vmem:[%s11585_s1 + $0xbc8] ss:$20 sps:$4 sm:$0xff]  }
 0x21f   :  { %7540 = vmatpush3.bf16.msra.mxu0 %v8542_v23  ;;  %7562 = vmatpush3.bf16.msra.mxu1 %v8543_v32  ;;  %v8579_v6 = vld [vmem:[%s11585_s1 + $0xd08] ss:$20 sps:$4 sm:$0xff]   ;;  %v8580_v7 = vld [vmem:[%s11585_s1 + $0xbf0] ss:$20 sps:$4 sm:$0xff]   ;;  %v8584_v12 = vld [vmem:[%s11585_s1 + $0xc18] ss:$20 sps:$4 sm:$0xff]  }
 0x220   :  { %7541 = vmatprep.subr.bf16.mxu0 %v8544_v35  ;;  %7563 = vmatprep.subr.bf16.mxu1 %v8545_v27  ;;  %v8581_v8 = vld [vmem:[%s11585_s1 + $0xe70] ss:$20 sps:$4 sm:$0xff]   ;;  %v8585_v14 = vld [vmem:[%s11585_s1 + $0xe98] ss:$20 sps:$4 sm:$0xff]   ;;  %v8588_v18 = vld [vmem:[%s11585_s1 + $0xc40] ss:$20 sps:$4 sm:$0xff]  }
 0x221   :  { %v8582_v9 = vld [vmem:[%s11585_s1 + $0xab0] ss:$20 sps:$4 sm:$0xff]   ;;  %v8586_v52 = vld [vmem:[%s11585_s1 + $0xad8] ss:$20 sps:$4 sm:$0xff]   ;;  %v8589_v20 = vld [vmem:[%s11585_s1 + $0xec0] ss:$20 sps:$4 sm:$0xff]  }
 0x222   :  { %v8583_v10 = vld [vmem:[%s11585_s1 + $0xd30] ss:$20 sps:$4 sm:$0xff]   ;;  %v8587_v16 = vld [vmem:[%s11585_s1 + $0xd58] ss:$20 sps:$4 sm:$0xff]   ;;  %v8590_v21 = vld [vmem:[%s11585_s1 + $0xb00] ss:$20 sps:$4 sm:$0xff]  }
 0x223   :  { %7542 = vmatpush3.bf16.msra.mxu0 %v8546_v15  ;;  %7564 = vmatpush3.bf16.msra.mxu1 %v8547_v36  ;;  %v8591_v22 = vld [vmem:[%s11585_s1 + $0xd80] ss:$20 sps:$4 sm:$0xff]   ;;  %v8592_v24 = vld [vmem:[%s11585_s1 + $0xc68] ss:$20 sps:$4 sm:$0xff]   ;;  %v8596_v30 = vld [vmem:[%s11585_s1 + $0x1050] ss:$20 sps:$4 sm:$0xff]  }
 0x224   :  { %7543 = vmatprep.subr.bf16.mxu0 %v8548_v37  ;;  %7565 = vmatprep.subr.bf16.mxu1 %v8549_v38  ;;  %v8593_v26 = vld [vmem:[%s11585_s1 + $0xee8] ss:$20 sps:$4 sm:$0xff]   ;;  %v8597_v31 = vld [vmem:[%s11585_s1 + $0xf10] ss:$20 sps:$4 sm:$0xff]   ;;  %v8905_v23 = vmov 0   ;;  %vm6088_vm1 = vcmask 1043456  }
 0x225   :  { %v8594_v28 = vld [vmem:[%s11585_s1 + $0xb28] ss:$20 sps:$4 sm:$0xff]   ;;  %v8598_v13 = vld [vmem:[%s11585_s1 + $0x1190] ss:$20 sps:$4 sm:$0xff]   ;;  %v8599_v32 = vld [vmem:[%s11585_s1 + $0x1078] ss:$20 sps:$4 sm:$0xff]  }
 0x226   :  { %v8595_v29 = vld [vmem:[%s11585_s1 + $0xda8] ss:$20 sps:$4 sm:$0xff]   ;;  %v8600_v35 = vld [vmem:[%s11585_s1 + $0xf38] ss:$20 sps:$4 sm:$0xff]   ;;  %v8602_v15 = vld [vmem:[%s11585_s1 + $0x10a0] ss:$20 sps:$4 sm:$0xff]  }
 0x227   :  { %7544 = vmatpush3.bf16.msra.mxu0 %v8550_v39  ;;  %7566 = vmatpush3.bf16.msra.mxu1 %v8551_v40  ;;  %v8601_v27 = vld [vmem:[%s11585_s1 + $0x11b8] ss:$20 sps:$4 sm:$0xff]   ;;  %v8607_v36 = vld [vmem:[%s11585_s1 + $0x1208] ss:$20 sps:$4 sm:$0xff]   ;;  %v8608_v37 = vld [vmem:[%s11585_s1 + $0x10f0] ss:$20 sps:$4 sm:$0xff]  }
 0x228   :  { %7545 = vmatprep.subr.bf16.mxu0 %v8552_v43  ;;  %7567 = vmatprep.subr.bf16.mxu1 %v8553_v44  ;;  %v8609_v38 = vld [vmem:[%s11585_s1 + $0xfb0] ss:$20 sps:$4 sm:$0xff]   ;;  %v8611_v40 = vld [vmem:[%s11585_s1 + $0x1118] ss:$20 sps:$4 sm:$0xff]   ;;  %vm6084_vm2 = vcmask 719872   ;;  %vm6578_vm3 = vcmask 1041408  }
 0x229   :  { %v8610_v39 = vld [vmem:[%s11585_s1 + $0x1230] ss:$20 sps:$4 sm:$0xff]   ;;  %v8612_v43 = vld [vmem:[%s11585_s1 + $0xfd8] ss:$20 sps:$4 sm:$0xff]   ;;  %vm6574_vm4 = vcmask 293888   ;;  %s8906_s15 = smov [#allocation2]  }
 0x22a   :  { %v8613_v44 = vld [vmem:[%s11585_s1 + $0x1258] ss:$20 sps:$4 sm:$0xff]   ;;  %s6670_s16 = sshll.u32 %s8906_s15, 4  ;;  %vm6662_vm5 = vcmask 74752   ;;  %s6671_s16 = int_to_ptr.vmem [resolvable:$true] %s6670_s16 }
 0x22b   :  { %7546 = vmatpush3.bf16.msra.mxu0 %v8554_v46  ;;  %7568 = vmatpush3.bf16.msra.mxu1 %v8555_v49  ;;  %v8614_v46 = vld [vmem:[%s11585_s1 + $0x1140] ss:$20 sps:$4 sm:$0xff]   ;;  %s8880_s17 = scalar_lea.vmem %s6671_s16, 32  ;;  %p8885_p1 = scmp.lt.s32.totalorder %s6671_s16, %s6671_s16 }
 0x22c   :  { %7547 = vmatprep.subr.bf16.mxu0 %v8556_v47  ;;  %7569 = vmatprep.subr.bf16.mxu1 %v8557_v50  ;;  %v8615_v49 = vld [vmem:[%s11585_s1 + $0x1000] ss:$20 sps:$4 sm:$0xff]   ;;  %v8617_v50 = vld [vmem:[%s11585_s1 + $0x1168] ss:$20 sps:$4 sm:$0xff]   ;;  %p8881_p0 = scmp.ne.s32.totalorder %s6671_s16, %s8880_s17  ;;  %p8886_p2 = scmp.lt.s32.totalorder %s8880_s17, %s8880_s17 }
 0x22d   :  { %v8616_v47 = vld [vmem:[%s11585_s1 + $0x1280] ss:$20 sps:$4 sm:$0xff]  }
 0x22e   :  { %p8887_p3 = por %p8886_p2, %p8885_p1 }
 0x22f   :  { %7548 = vmatpush3.bf16.msra.mxu0 %v8558_v53  ;;  %7570 = vmatpush3.bf16.msra.mxu1 %v8559_v54  ;;  %v8618_v53 = vld [vmem:[%s11585_s1 + $0x1028] ss:$20 sps:$4 sm:$0xff]  }
 0x230   :  { %7549 = vmatprep.subr.bf16.mxu0 %v8560_v55  ;;  %7571 = vmatprep.subr.bf16.mxu1 %v8561_v56  ;;  %v8619_v54 = vld [vmem:[%s11585_s1 + $0x12a8] ss:$20 sps:$4 sm:$0xff]   ;;  %v8627_v55 = vld [vmem:[%s11587_s3 + $0x4] ss:$16 sps:$4 sm:$0xff]   ;;  %p8888_p4 = pnand %p8887_p3, %p8881_p0 }
 0x231   :  { %v8620_v56 = vld [vmem:[%s11585_s1 + $0x12d0] ss:$20 sps:$4 sm:$0xff]  }
 0x233   :  { %7550 = vmatpush3.bf16.msra.mxu0 %v8562_v57  ;;  %7572 = vmatpush3.bf16.msra.mxu1 %v8563_v58  ;;  %v8625_v57 = vld [vmem:[%s11587_s3] ss:$16 sps:$4 sm:$0xff]   ;;  %v8633_v58 = vld [vmem:[%s11587_s3 + $0x24] ss:$16 sps:$4 sm:$0xff]  }
 0x234   :  { %7579 = vmatprep.subr.bf16.mxu0 %v8564_v59  ;;  %7601 = vmatprep.subr.bf16.mxu1 %v8565_v61  ;;  %v8621_v59 = vld [vmem:[%s11585_s1 + $0x12f8] ss:$20 sps:$4 sm:$0xff]   ;;  %v8631_v61 = vld [vmem:[%s11587_s3 + $0x20] ss:$16 sps:$4 sm:$0xff]  }
 0x236   :  { %4945 = vmatmul.mubr.bf16.vlgmr.msra.gmra.mrb[8].mxu0 %v9580_v33  ;;  %4985 = vmatmul.mubr.bf16.vlgmr.msra.gmra.mrb[8].mxu1 %v9788_v45  ;;  %v8573_v33 = vld [vmem:[%s11585_s1 + $0xe20] ss:$20 sps:$4 sm:$0xff]  }
 0x237   :  { %7580 = vmatpush3.bf16.msra.mxu0 %v8566_v63  ;;  %7602 = vmatpush3.bf16.msra.mxu1 %v8567_v0  ;;  %v8574_v45 = vld [vmem:[%s11585_s1 + $0xa60] ss:$20 sps:$4 sm:$0xff]  }
 0x238   :  { %7581 = vmatprep.subr.bf16.mxu0 %v8568_v60  ;;  %7603 = vmatprep.subr.bf16.mxu1 %v8569_v17  ;;  %v8639_v63 = vld [vmem:[%s11587_s3 + $0x44] ss:$16 sps:$4 sm:$0xff]   ;;  %v8637_v0 = vld [vmem:[%s11587_s3 + $0x40] ss:$16 sps:$4 sm:$0xff]   ;;  %v8623_v17 = vld [vmem:[%s11585_s1 + $0x1348] ss:$20 sps:$4 sm:$0xff]  }
 0x239   :  { %5024 = vmatprep.mubr.bf16.mxu0 %v9803_v51  ;;  %5064 = vmatprep.mubr.bf16.mxu1 %v10007_v2  ;;  %v8577_v51 = vld [vmem:[%s11585_s1 + $0xe48] ss:$20 sps:$4 sm:$0xff]   ;;  %v8645_v60 = vld [vmem:[%s11587_s3 + $0x64] ss:$16 sps:$4 sm:$0xff]  }
 0x23a   :  { %v8578_v2 = vld [vmem:[%s11585_s1 + $0xa88] ss:$20 sps:$4 sm:$0xff]  }
 0x23b   :  { %7582 = vmatpush3.bf16.msra.mxu0 %v8570_v1  ;;  %7604 = vmatpush3.bf16.msra.mxu1 %v8571_v34  ;;  %v8643_v1 = vld [vmem:[%s11587_s3 + $0x60] ss:$16 sps:$4 sm:$0xff]   ;;  %v8651_v34 = vld [vmem:[%s11587_s3 + $0x84] ss:$16 sps:$4 sm:$0xff]  }
 0x23c   :  { %7583 = vmatprep.subr.bf16.mxu0 %v8572_v3  ;;  %7605 = vmatprep.subr.bf16.mxu1 %v8573_v33  ;;  %v8624_v3 = vld [vmem:[%s11585_s1 + $0x1370] ss:$20 sps:$4 sm:$0xff]  }
 0x23d   :  { %v8649_v33 = vld [vmem:[%s11587_s3 + $0x80] ss:$16 sps:$4 sm:$0xff]  }
 0x23f   :  { %7584 = vmatpush3.bf16.msra.mxu0 %v8574_v45  ;;  %7606 = vmatpush3.bf16.msra.mxu1 %v8575_v4  ;;  %v8630_v45 = vld [vmem:[%s11587_s3 + $0xc] ss:$16 sps:$4 sm:$0xff]   ;;  %v8657_v4 = vld [vmem:[%s11587_s3 + $0xa4] ss:$16 sps:$4 sm:$0xff]  }
 0x240   :  { %7585 = vmatprep.subr.bf16.mxu0 %v8576_v5  ;;  %7607 = vmatprep.subr.bf16.mxu1 %v8577_v51  ;;  %v8628_v5 = vld [vmem:[%s11587_s3 + $0x8] ss:$16 sps:$4 sm:$0xff]   ;;  %v8655_v51 = vld [vmem:[%s11587_s3 + $0xa0] ss:$16 sps:$4 sm:$0xff]  }
 0x243   :  { %7586 = vmatpush3.bf16.msra.mxu0 %v8578_v2  ;;  %7608 = vmatpush3.bf16.msra.mxu1 %v8579_v6  ;;  %v8636_v2 = vld [vmem:[%s11587_s3 + $0x2c] ss:$16 sps:$4 sm:$0xff]   ;;  %v8663_v6 = vld [vmem:[%s11587_s3 + $0xc4] ss:$16 sps:$4 sm:$0xff]  }
 0x244   :  { %7587 = vmatprep.subr.bf16.mxu0 %v8580_v7  ;;  %7609 = vmatprep.subr.bf16.mxu1 %v8581_v8  ;;  %v8634_v7 = vld [vmem:[%s11587_s3 + $0x28] ss:$16 sps:$4 sm:$0xff]   ;;  %v8661_v8 = vld [vmem:[%s11587_s3 + $0xc0] ss:$16 sps:$4 sm:$0xff]  }
 0x247   :  { %7588 = vmatpush3.bf16.msra.mxu0 %v8582_v9  ;;  %7610 = vmatpush3.bf16.msra.mxu1 %v8583_v10  ;;  %v8642_v9 = vld [vmem:[%s11587_s3 + $0x4c] ss:$16 sps:$4 sm:$0xff]   ;;  %v8640_v10 = vld [vmem:[%s11587_s3 + $0x48] ss:$16 sps:$4 sm:$0xff]  }
 0x248   :  { %7589 = vmatprep.subr.bf16.mxu0 %v8584_v12  ;;  %7611 = vmatprep.subr.bf16.mxu1 %v8585_v14  ;;  %v8667_v12 = vld [vmem:[%s11587_s3 + $0xe0] ss:$16 sps:$4 sm:$0xff]   ;;  %v8648_v14 = vld [vmem:[%s11587_s3 + $0x6c] ss:$16 sps:$4 sm:$0xff]  }
 0x24b   :  { %7590 = vmatpush3.bf16.msra.mxu0 %v8586_v52  ;;  %7612 = vmatpush3.bf16.msra.mxu1 %v8587_v16  ;;  %v8675_v52 = vld [vmem:[%s11587_s3 + $0x104] ss:$16 sps:$4 sm:$0xff]   ;;  %v8646_v16 = vld [vmem:[%s11587_s3 + $0x68] ss:$16 sps:$4 sm:$0xff]  }
 0x24c   :  { %7591 = vmatprep.subr.bf16.mxu0 %v8588_v18  ;;  %7613 = vmatprep.subr.bf16.mxu1 %v8589_v20  ;;  %v8673_v18 = vld [vmem:[%s11587_s3 + $0x100] ss:$16 sps:$4 sm:$0xff]   ;;  %v8654_v20 = vld [vmem:[%s11587_s3 + $0x8c] ss:$16 sps:$4 sm:$0xff]  }
 0x24f   :  { %7592 = vmatpush3.bf16.msra.mxu0 %v8590_v21  ;;  %7614 = vmatpush3.bf16.msra.mxu1 %v8591_v22  ;;  %v8681_v21 = vld [vmem:[%s11587_s3 + $0x124] ss:$16 sps:$4 sm:$0xff]   ;;  %v8652_v22 = vld [vmem:[%s11587_s3 + $0x88] ss:$16 sps:$4 sm:$0xff]  }
 0x250   :  { %7593 = vmatprep.subr.bf16.mxu0 %v8592_v24  ;;  %7615 = vmatprep.subr.bf16.mxu1 %v8593_v26  ;;  %v8679_v24 = vld [vmem:[%s11587_s3 + $0x120] ss:$16 sps:$4 sm:$0xff]   ;;  %v8660_v26 = vld [vmem:[%s11587_s3 + $0xac] ss:$16 sps:$4 sm:$0xff]  }
 0x253   :  { %7594 = vmatpush3.bf16.msra.mxu0 %v8594_v28  ;;  %7616 = vmatpush3.bf16.msra.mxu1 %v8595_v29  ;;  %v8687_v28 = vld [vmem:[%s11587_s3 + $0x144] ss:$16 sps:$4 sm:$0xff]   ;;  %v8658_v29 = vld [vmem:[%s11587_s3 + $0xa8] ss:$16 sps:$4 sm:$0xff]  }
 0x254   :  { %7623 = vmatprep.subr.bf16.mxu0 %v8596_v30  ;;  %5112 = vmatprep.subr.bf16.mxu1 %v8905_v23  ;;  %v8685_v30 = vld [vmem:[%s11587_s3 + $0x140] ss:$16 sps:$4 sm:$0xff]  }
 0x256   :  { %5025 = vmatmul.mubr.bf16.vlgmr.msra.gmra.mrb[12].mxu0 %v9991_v62  ;;  %5065 = vmatmul.mubr.bf16.vlgmr.msra.gmra.mrb[12].mxu1 %v10206_v19  ;;  %v8603_v62 = vld [vmem:[%s11585_s1 + $0xf60] ss:$20 sps:$4 sm:$0xff]  }
 0x257   :  { %7624 = vmatpush3.bf16.msra.mxu0 %v8597_v31  ;;  %5113 = vmatpush1.bf16.msra.mxu1 %v8598_v13  ;;  %v8604_v19 = vld [vmem:[%s11585_s1 + $0x11e0] ss:$20 sps:$4 sm:$0xff]   ;;  %v8666_v31 = vld [vmem:[%s11587_s3 + $0xcc] ss:$16 sps:$4 sm:$0xff]  }
 0x258   :  { %7625 = vmatprep.subr.bf16.mxu0 %v8599_v32  ;;  %5114 = vmatprep.subr.bf16.mxu1 %v8905_v23  ;;  %v8693_v13 = vld [vmem:[%s11587_s3 + $0x164] ss:$16 sps:$4 sm:$0xff]   ;;  %v8664_v32 = vld [vmem:[%s11587_s3 + $0xc8] ss:$16 sps:$4 sm:$0xff]  }
 0x259   :  { %5104 = vmatprep.mubr.bf16.mxu0 %v10221_v25  ;;  %7305 = vmatprep.mubr.msk.bf16.mxu1 %vm4172_vm0, %v10425_v11  ;;  %v8605_v25 = vld [vmem:[%s11585_s1 + $0x10c8] ss:$20 sps:$4 sm:$0xff]  }
 0x25a   :  { %v8606_v11 = vld [vmem:[%s11585_s1 + $0xf88] ss:$20 sps:$4 sm:$0xff]  }
 0x25b   :  { %7626 = vmatpush3.bf16.msra.mxu0 %v8600_v35  ;;  %5115 = vmatpush1.bf16.msra.mxu1 %v8601_v27  ;;  %v8691_v35 = vld [vmem:[%s11587_s3 + $0x160] ss:$16 sps:$4 sm:$0xff]   ;;  %v8672_v27 = vld [vmem:[%s11587_s3 + $0xec] ss:$16 sps:$4 sm:$0xff]  }
 0x25c   :  { %7627 = vmatprep.subr.bf16.mxu0 %v8602_v15  ;;  %5116 = vmatprep.subr.bf16.mxu1 %v8905_v23  ;;  %v8699_v15 = vld [vmem:[%s11587_s3 + $0x184] ss:$16 sps:$4 sm:$0xff]  }
 0x25f   :  { %7628 = vmatpush3.bf16.msra.mxu0 %v8603_v62  ;;  %5117 = vmatpush1.bf16.msra.mxu1 %v8604_v19  ;;  %v8670_v62 = vld [vmem:[%s11587_s3 + $0xe8] ss:$16 sps:$4 sm:$0xff]   ;;  %v8697_v19 = vld [vmem:[%s11587_s3 + $0x180] ss:$16 sps:$4 sm:$0xff]  }
 0x260   :  { %7629 = vmatprep.subr.bf16.mxu0 %v8605_v25  ;;  %5118 = vmatprep.subr.bf16.mxu1 %v8905_v23  ;;  %v8678_v25 = vld [vmem:[%s11587_s3 + $0x10c] ss:$16 sps:$4 sm:$0xff]  }
 0x263   :  { %7630 = vmatpush3.bf16.msra.mxu0 %v8606_v11  ;;  %5119 = vmatpush1.bf16.msra.mxu1 %v8607_v36  ;;  %v8705_v11 = vld [vmem:[%s11587_s3 + $0x1a4] ss:$16 sps:$4 sm:$0xff]   ;;  %v8676_v36 = vld [vmem:[%s11587_s3 + $0x108] ss:$16 sps:$4 sm:$0xff]  }
 0x264   :  { %7631 = vmatprep.subr.bf16.mxu0 %v8608_v37  ;;  %5120 = vmatprep.subr.bf16.mxu1 %v8905_v23  ;;  %v8703_v37 = vld [vmem:[%s11587_s3 + $0x1a0] ss:$16 sps:$4 sm:$0xff]  }
 0x267   :  { %7632 = vmatpush3.bf16.msra.mxu0 %v8609_v38  ;;  %5121 = vmatpush1.bf16.msra.mxu1 %v8610_v39  ;;  %v8684_v38 = vld [vmem:[%s11587_s3 + $0x12c] ss:$16 sps:$4 sm:$0xff]   ;;  %v8711_v39 = vld [vmem:[%s11587_s3 + $0x1c4] ss:$16 sps:$4 sm:$0xff]  }
 0x268   :  { %7633 = vmatprep.subr.bf16.mxu0 %v8611_v40  ;;  %5122 = vmatprep.subr.bf16.mxu1 %v8905_v23  ;;  %v8682_v40 = vld [vmem:[%s11587_s3 + $0x128] ss:$16 sps:$4 sm:$0xff]  }
 0x26b   :  { %7634 = vmatpush3.bf16.msra.mxu0 %v8612_v43  ;;  %5123 = vmatpush1.bf16.msra.mxu1 %v8613_v44  ;;  %v8709_v43 = vld [vmem:[%s11587_s3 + $0x1c0] ss:$16 sps:$4 sm:$0xff]   ;;  %v8690_v44 = vld [vmem:[%s11587_s3 + $0x14c] ss:$16 sps:$4 sm:$0xff]  }
 0x26c   :  { %7635 = vmatprep.subr.bf16.mxu0 %v8614_v46  ;;  %5124 = vmatprep.subr.bf16.mxu1 %v8905_v23  ;;  %v8717_v46 = vld [vmem:[%s11587_s3 + $0x1e4] ss:$16 sps:$4 sm:$0xff]  }
 0x26f   :  { %7636 = vmatpush3.bf16.msra.mxu0 %v8615_v49  ;;  %5125 = vmatpush1.bf16.msra.mxu1 %v8616_v47  ;;  %v8688_v49 = vld [vmem:[%s11587_s3 + $0x148] ss:$16 sps:$4 sm:$0xff]   ;;  %v8715_v47 = vld [vmem:[%s11587_s3 + $0x1e0] ss:$16 sps:$4 sm:$0xff]  }
 0x270   :  { %7637 = vmatprep.subr.bf16.mxu0 %v8617_v50  ;;  %5126 = vmatprep.subr.bf16.mxu1 %v8905_v23  ;;  %v8696_v50 = vld [vmem:[%s11587_s3 + $0x16c] ss:$16 sps:$4 sm:$0xff]  }
 0x273   :  { %7638 = vmatpush3.bf16.msra.mxu0 %v8618_v53  ;;  %5127 = vmatpush1.bf16.msra.mxu1 %v8619_v54  ;;  %v8723_v53 = vld [vmem:[%s11587_s3 + $0x204] ss:$16 sps:$4 sm:$0xff]   ;;  %v8694_v54 = vld [vmem:[%s11587_s3 + $0x168] ss:$16 sps:$4 sm:$0xff]  }
 0x274   :  { %5128 = vmatprep.subr.bf16.mxu1 %v8905_v23  ;;  %6101 = vmatprep.subr.bf16.mxu0 %v8627_v55  ;;  %v8702_v55 = vld [vmem:[%s11587_s3 + $0x18c] ss:$16 sps:$4 sm:$0xff]  }
 0x276   :  { %5105 = vmatmul.mubr.bf16.vlgmr.msra.gmra.mrb[16].mxu0 %v10409_v41  ;;  %v8622_v41 = vld [vmem:[%s11585_s1 + $0x1320] ss:$20 sps:$4 sm:$0xff]  }
 0x277   :  { %5129 = vmatpush1.bf16.msra.mxu1 %v8620_v56  ;;  %6102 = vmatpush1.bf16.msra.mxu0 %v8625_v57  ;;  %v8700_v56 = vld [vmem:[%s11587_s3 + $0x188] ss:$16 sps:$4 sm:$0xff]   ;;  %v8708_v57 = vld [vmem:[%s11587_s3 + $0x1ac] ss:$16 sps:$4 sm:$0xff]  }
 0x278   :  { %5130 = vmatprep.subr.bf16.mxu1 %v8905_v23  ;;  %6103 = vmatprep.subr.bf16.mxu0 %v8633_v58  ;;  %v8706_v58 = vld [vmem:[%s11587_s3 + $0x1a8] ss:$16 sps:$4 sm:$0xff]  }
 0x27b   :  { %5131 = vmatpush1.bf16.msra.mxu1 %v8621_v59  ;;  %6104 = vmatpush1.bf16.msra.mxu0 %v8631_v61  ;;  %v8714_v59 = vld [vmem:[%s11587_s3 + $0x1cc] ss:$16 sps:$4 sm:$0xff]   ;;  %v8712_v61 = vld [vmem:[%s11587_s3 + $0x1c8] ss:$16 sps:$4 sm:$0xff]  }
 0x27c   :  { %5132 = vmatprep.subr.bf16.mxu1 %v8905_v23  ;;  %6105 = vmatprep.subr.bf16.mxu0 %v8639_v63  ;;  %v8720_v63 = vld [vmem:[%s11587_s3 + $0x1ec] ss:$16 sps:$4 sm:$0xff]  }
 0x27f   :  { %5133 = vmatpush1.bf16.msra.mxu1 %v8622_v41  ;;  %6106 = vmatpush1.bf16.msra.mxu0 %v8637_v0  ;;  %v784_v41 = vsub.s32 0, %v9064_v42  ;;  %v792_v0 = vsub.s32 2, %v9064_v42 }
 0x280   :  { %5134 = vmatprep.subr.bf16.mxu1 %v8905_v23  ;;  %6107 = vmatprep.subr.bf16.mxu0 %v8645_v60  ;;  %v11176_v60 = vld [vmem:[%s11586_s2] sm:$0x1f] }
 0x283   :  { %5135 = vmatpush1.bf16.msra.mxu1 %v8623_v17  ;;  %6108 = vmatpush1.bf16.msra.mxu0 %v8643_v1  ;;  %v788_v17 = vsub.s32 1, %v9064_v42  ;;  %v796_v1 = vsub.s32 3, %v9064_v42 }
 0x284   :  { %5136 = vmatprep.subr.bf16.mxu1 %v8905_v23  ;;  %6109 = vmatprep.subr.bf16.mxu0 %v8651_v34  ;;  %v8718_v34 = vld [vmem:[%s11587_s3 + $0x1e8] ss:$16 sps:$4 sm:$0xff]  }
 0x287   :  { %5137 = vmatpush1.bf16.msra.mxu1 %v8624_v3  ;;  %6110 = vmatpush1.bf16.msra.mxu0 %v8649_v33  ;;  %v8726_v3 = vld [vmem:[%s11587_s3 + $0x20c] ss:$16 sps:$4 sm:$0xff]   ;;  %v785_v33 = vrot.slane %v11176_v60, %v784_v41 }
 0x288   :  { %6224 = vmatprep.subr.bf16.mxu1 %v8630_v45  ;;  %6111 = vmatprep.subr.bf16.mxu0 %v8657_v4  ;;  %v793_v45 = vrot.slane %v11176_v60, %v792_v0  ;;  %v789_v4 = vrot.slane %v11176_v60, %v788_v17 }
 0x28a   :  { %5145 = vmatmul.mubr.bf16.vlgmr.msra.gmra.mrb[16].mxu1 %v10582_v48  ;;  %v8669_v48 = vld [vmem:[%s11587_s3 + $0xe4] ss:$16 sps:$4 sm:$0xff]  }
 0x28b   :  { %6225 = vmatpush1.bf16.msra.mxu1 %v8628_v5  ;;  %6112 = vmatpush1.bf16.msra.mxu0 %v8655_v51  ;;  %v797_v5 = vrot.slane %v11176_v60, %v796_v1 }
 0x28c   :  { %6226 = vmatprep.subr.bf16.mxu1 %v8636_v2  ;;  %6113 = vmatprep.subr.bf16.mxu0 %v8663_v6 }
 0x28f   :  { %6227 = vmatpush1.bf16.msra.mxu1 %v8634_v7  ;;  %6114 = vmatpush1.bf16.msra.mxu0 %v8661_v8 }
 0x290   :  { %6228 = vmatprep.subr.bf16.mxu1 %v8642_v9  ;;  %6115 = vmatprep.subr.bf16.mxu0 %v8669_v48 }
 0x293   :  { %6229 = vmatpush1.bf16.msra.mxu1 %v8640_v10  ;;  %6116 = vmatpush1.bf16.msra.mxu0 %v8667_v12 }
 0x294   :  { %6230 = vmatprep.subr.bf16.mxu1 %v8648_v14  ;;  %6117 = vmatprep.subr.bf16.mxu0 %v8675_v52 }
 0x297   :  { %6231 = vmatpush1.bf16.msra.mxu1 %v8646_v16  ;;  %6118 = vmatpush1.bf16.msra.mxu0 %v8673_v18 }
 0x298   :  { %6232 = vmatprep.subr.bf16.mxu1 %v8654_v20  ;;  %6119 = vmatprep.subr.bf16.mxu0 %v8681_v21 }
 0x29b   :  { %6233 = vmatpush1.bf16.msra.mxu1 %v8652_v22  ;;  %6120 = vmatpush1.bf16.msra.mxu0 %v8679_v24  ;;  %v8721_v24 = vld [vmem:[%s11587_s3 + $0x200] ss:$16 sps:$4 sm:$0xff]  }
 0x29c   :  { %6234 = vmatprep.subr.bf16.mxu1 %v8660_v26  ;;  %6121 = vmatprep.subr.bf16.mxu0 %v8687_v28  ;;  %v8724_v26 = vld [vmem:[%s11587_s3 + $0x208] ss:$16 sps:$4 sm:$0xff]  }
 0x29f   :  { %6235 = vmatpush1.bf16.msra.mxu1 %v8658_v29  ;;  %6122 = vmatpush1.bf16.msra.mxu0 %v8685_v30  ;;  %v8729_v29 = vld [vmem:[%s11587_s3 + $0x224] ss:$16 sps:$4 sm:$0xff]   ;;  %v8732_v30 = vld [vmem:[%s11587_s3 + $0x22c] ss:$16 sps:$4 sm:$0xff]  }
 0x2a0   :  { %6236 = vmatprep.subr.bf16.mxu1 %v8666_v31  ;;  %6123 = vmatprep.subr.bf16.mxu0 %v8693_v13  ;;  %v8727_v13 = vld [vmem:[%s11587_s3 + $0x220] ss:$16 sps:$4 sm:$0xff]  }
 0x2a3   :  { %6237 = vmatpush1.bf16.msra.mxu1 %v8664_v32  ;;  %6124 = vmatpush1.bf16.msra.mxu0 %v8691_v35  ;;  %v8730_v32 = vld [vmem:[%s11587_s3 + $0x228] ss:$16 sps:$4 sm:$0xff]   ;;  %v8735_v35 = vld [vmem:[%s11587_s3 + $0x244] ss:$16 sps:$4 sm:$0xff]  }
 0x2a4   :  { %6238 = vmatprep.subr.bf16.mxu1 %v8672_v27  ;;  %6125 = vmatprep.subr.bf16.mxu0 %v8699_v15  ;;  %v8738_v27 = vld [vmem:[%s11587_s3 + $0x24c] ss:$16 sps:$4 sm:$0xff]   ;;  %v8733_v15 = vld [vmem:[%s11587_s3 + $0x240] ss:$16 sps:$4 sm:$0xff]  }
 0x2a7   :  { %6239 = vmatpush1.bf16.msra.mxu1 %v8670_v62  ;;  %6126 = vmatpush1.bf16.msra.mxu0 %v8697_v19  ;;  %v8736_v62 = vld [vmem:[%s11587_s3 + $0x248] ss:$16 sps:$4 sm:$0xff]   ;;  %v8741_v19 = vld [vmem:[%s11587_s3 + $0x264] ss:$16 sps:$4 sm:$0xff]  }
 0x2a8   :  { %6240 = vmatprep.subr.bf16.mxu1 %v8678_v25  ;;  %6127 = vmatprep.subr.bf16.mxu0 %v8705_v11  ;;  %v8744_v25 = vld [vmem:[%s11587_s3 + $0x26c] ss:$16 sps:$4 sm:$0xff]   ;;  %v8739_v11 = vld [vmem:[%s11587_s3 + $0x260] ss:$16 sps:$4 sm:$0xff]  }
 0x2ab   :  { %6241 = vmatpush1.bf16.msra.mxu1 %v8676_v36  ;;  %6128 = vmatpush1.bf16.msra.mxu0 %v8703_v37  ;;  %v8742_v36 = vld [vmem:[%s11587_s3 + $0x268] ss:$16 sps:$4 sm:$0xff]   ;;  %v8747_v37 = vld [vmem:[%s11587_s3 + $0x284] ss:$16 sps:$4 sm:$0xff]  }
 0x2ac   :  { %6242 = vmatprep.subr.bf16.mxu1 %v8684_v38  ;;  %6129 = vmatprep.subr.bf16.mxu0 %v8711_v39  ;;  %v8750_v38 = vld [vmem:[%s11587_s3 + $0x28c] ss:$16 sps:$4 sm:$0xff]   ;;  %v8745_v39 = vld [vmem:[%s11587_s3 + $0x280] ss:$16 sps:$4 sm:$0xff]  }
 0x2af   :  { %6243 = vmatpush1.bf16.msra.mxu1 %v8682_v40  ;;  %6130 = vmatpush1.bf16.msra.mxu0 %v8709_v43  ;;  %v8748_v40 = vld [vmem:[%s11587_s3 + $0x288] ss:$16 sps:$4 sm:$0xff]   ;;  %v8753_v43 = vld [vmem:[%s11587_s3 + $0x2a4] ss:$16 sps:$4 sm:$0xff]  }
 0x2b0   :  { %6244 = vmatprep.subr.bf16.mxu1 %v8690_v44  ;;  %6131 = vmatprep.subr.bf16.mxu0 %v8717_v46  ;;  %v8756_v44 = vld [vmem:[%s11587_s3 + $0x2ac] ss:$16 sps:$4 sm:$0xff]   ;;  %v8751_v46 = vld [vmem:[%s11587_s3 + $0x2a0] ss:$16 sps:$4 sm:$0xff]  }
 0x2b3   :  { %6245 = vmatpush1.bf16.msra.mxu1 %v8688_v49  ;;  %6132 = vmatpush1.bf16.msra.mxu0 %v8715_v47  ;;  %v8754_v49 = vld [vmem:[%s11587_s3 + $0x2a8] ss:$16 sps:$4 sm:$0xff]   ;;  %v8759_v47 = vld [vmem:[%s11587_s3 + $0x2c4] ss:$16 sps:$4 sm:$0xff]  }
 0x2b4   :  { %6246 = vmatprep.subr.bf16.mxu1 %v8696_v50  ;;  %6142 = vmatprep.subr.bf16.mxu0 %v8723_v53  ;;  %v8762_v50 = vld [vmem:[%s11587_s3 + $0x2cc] ss:$16 sps:$4 sm:$0xff]   ;;  %v800_v53 = vsub.s32 4, %v9064_v42 }
 0x2b7   :  { %6247 = vmatpush1.bf16.msra.mxu1 %v8694_v54  ;;  %v8757_v54 = vld [vmem:[%s11587_s3 + $0x2c0] ss:$16 sps:$4 sm:$0xff]  }
 0x2b8   :  { %6248 = vmatprep.subr.bf16.mxu1 %v8702_v55  ;;  %v8760_v55 = vld [vmem:[%s11587_s3 + $0x2c8] ss:$16 sps:$4 sm:$0xff]  }
 0x2bb   :  { %6249 = vmatpush1.bf16.msra.mxu1 %v8700_v56  ;;  %v8765_v56 = vld [vmem:[%s11587_s3 + $0x2e4] ss:$16 sps:$4 sm:$0xff]  }
 0x2bc   :  { %6250 = vmatprep.subr.bf16.mxu1 %v8708_v57  ;;  %v8768_v57 = vld [vmem:[%s11587_s3 + $0x2ec] ss:$16 sps:$4 sm:$0xff]  }
 0x2bf   :  { %6251 = vmatpush1.bf16.msra.mxu1 %v8706_v58 }
 0x2c0   :  { %6252 = vmatprep.subr.bf16.mxu1 %v8714_v59 }
 0x2c3   :  { %6253 = vmatpush1.bf16.msra.mxu1 %v8712_v61  ;;  %v801_v61 = vrot.slane %v11176_v60, %v800_v53  ;;  %v8771_v60 = vld [vmem:[%s11587_s3 + $0x304] ss:$16 sps:$4 sm:$0xff]   ;;  %v8811_v53 = vld [vmem:[%s11587_s3 + $0x3e0] ss:$16 sps:$4 sm:$0xff]  }
 0x2c4   :  { %6254 = vmatprep.subr.bf16.mxu1 %v8720_v63 }
 0x2c7   :  { %6255 = vmatpush1.bf16.msra.mxu1 %v8718_v34 }
 0x2c8   :  { %6265 = vmatprep.subr.bf16.mxu1 %v8726_v3 }
 0x2c9   :  { %v4497_v51 = vpop.f32.mrb[0].mxu0  ;;  %v4825_v2 = vpop.f32.mrb[0].mxu1 }
 0x2ca   :  { %v7667_v6 = vadd.f32 %v4497_v51, %v785_v33  ;;  %v11198_v7 = vadd.f32 %v4825_v2, %v793_v45  ;;  %v4499_v8 = vpop.f32.mrb[1].mxu0  ;;  %v4827_v9 = vpop.f32.mrb[1].mxu1 }
 0x2cb   :  { %v7668_v48 = vadd.f32 %v4499_v8, %v789_v4  ;;  %v7670_v10 = vadd.f32 %v4827_v9, %v797_v5  ;;  %v4501_v12 = vpop.f32.mrb[2].mxu0  ;;  %v4829_v14 = vpop.f32.mrb[2].mxu1  ;;  %v8763_v4 = vld [vmem:[%s11587_s3 + $0x2e0] ss:$16 sps:$4 sm:$0xff]   ;;  %v8766_v5 = vld [vmem:[%s11587_s3 + $0x2e8] ss:$16 sps:$4 sm:$0xff]  }
 0x2cc   :  { %v5152_v52 = vmax.f32 %v7667_v6, 0.0  ;;  %v4502_v16 = vpop.f32.mrb[3].mxu0  ;;  %v4830_v18 = vpop.f32.mrb[3].mxu1  ;;  %v8774_v6 = vld [vmem:[%s11587_s3 + $0x30c] ss:$16 sps:$4 sm:$0xff]  }
 0x2cd   :  { %v5153_v20 = vmax.f32 %v7668_v48, 0.0  ;;  %v5155_v21 = vmax.f32 %v7670_v10, 0.0  ;;  %v8769_v10 = vld [vmem:[%s11587_s3 + $0x300] ss:$16 sps:$4 sm:$0xff]   ;;  %v8772_v12 = vld [vmem:[%s11587_s3 + $0x308] ss:$16 sps:$4 sm:$0xff]  }
 0x2ce   :  { %v5157_v28 = vpack.c.bf16 %v5152_v52, %v5152_v52  ;;  %v8777_v14 = vld [vmem:[%s11587_s3 + $0x324] ss:$16 sps:$4 sm:$0xff]   ;;  %v8780_v52 = vld [vmem:[%s11587_s3 + $0x32c] ss:$16 sps:$4 sm:$0xff]   ;;  %v8775_v16 = vld [vmem:[%s11587_s3 + $0x320] ss:$16 sps:$4 sm:$0xff]  }
 0x2cf   :  { %v5158_v22 = vpack.c.bf16 %v5153_v20, %v5153_v20  ;;  %v5160_v31 = vpack.c.bf16 %v5155_v21, %v5155_v21  ;;  %v8778_v18 = vld [vmem:[%s11587_s3 + $0x328] ss:$16 sps:$4 sm:$0xff]   ;;  %v8783_v20 = vld [vmem:[%s11587_s3 + $0x344] ss:$16 sps:$4 sm:$0xff]   ;;  %v8786_v21 = vld [vmem:[%s11587_s3 + $0x34c] ss:$16 sps:$4 sm:$0xff]  }
 0x2d1   :  { %6133 = vmatprep.mubr.bf16.mxu0 %v5158_v22  ;;  %6256 = vmatprep.mubr.bf16.mxu1 %v5158_v22  ;;  %v8781_v22 = vld [vmem:[%s11587_s3 + $0x340] ss:$16 sps:$4 sm:$0xff]  }
 0x2d2   :  { %6134 = vmatmul.mubr.bf16.vlgmr.msra.gmra.mrb[20].mxu0 %v5157_v28  ;;  %6257 = vmatmul.mubr.bf16.vlgmr.msra.gmra.mrb[20].mxu1 %v5157_v28  ;;  %v8792_v28 = vld [vmem:[%s11587_s3 + $0x36c] ss:$16 sps:$4 sm:$0xff]  }
 0x2d3   :  { %6143 = vmatpush1.bf16.msra.mxu0 %v8721_v24  ;;  %6266 = vmatpush1.bf16.msra.mxu1 %v8724_v26  ;;  %v8784_v24 = vld [vmem:[%s11587_s3 + $0x348] ss:$16 sps:$4 sm:$0xff]   ;;  %v8789_v26 = vld [vmem:[%s11587_s3 + $0x364] ss:$16 sps:$4 sm:$0xff]  }
 0x2d4   :  { %6174 = vmatprep.mubr.bf16.mxu0 %v5160_v31  ;;  %6297 = vmatprep.mubr.bf16.mxu1 %v5160_v31  ;;  %v8795_v31 = vld [vmem:[%s11587_s3 + $0x384] ss:$16 sps:$4 sm:$0xff]  }
 0x2d5   :  { %6144 = vmatprep.subr.bf16.mxu0 %v8729_v29  ;;  %6267 = vmatprep.subr.bf16.mxu1 %v8732_v30  ;;  %v8787_v29 = vld [vmem:[%s11587_s3 + $0x360] ss:$16 sps:$4 sm:$0xff]   ;;  %v8790_v30 = vld [vmem:[%s11587_s3 + $0x368] ss:$16 sps:$4 sm:$0xff]  }
 0x2d7   :  { %6145 = vmatpush1.bf16.msra.mxu0 %v8727_v13  ;;  %6268 = vmatpush1.bf16.msra.mxu1 %v8730_v32  ;;  %v8798_v13 = vld [vmem:[%s11587_s3 + $0x38c] ss:$16 sps:$4 sm:$0xff]   ;;  %v8793_v32 = vld [vmem:[%s11587_s3 + $0x380] ss:$16 sps:$4 sm:$0xff]  }
 0x2d8   :  { %6146 = vmatprep.subr.bf16.mxu0 %v8735_v35  ;;  %6269 = vmatprep.subr.bf16.mxu1 %v8738_v27  ;;  %v8796_v35 = vld [vmem:[%s11587_s3 + $0x388] ss:$16 sps:$4 sm:$0xff]   ;;  %v8801_v27 = vld [vmem:[%s11587_s3 + $0x3a4] ss:$16 sps:$4 sm:$0xff]  }
 0x2db   :  { %6147 = vmatpush1.bf16.msra.mxu0 %v8733_v15  ;;  %6270 = vmatpush1.bf16.msra.mxu1 %v8736_v62  ;;  %v8804_v15 = vld [vmem:[%s11587_s3 + $0x3ac] ss:$16 sps:$4 sm:$0xff]   ;;  %v8799_v62 = vld [vmem:[%s11587_s3 + $0x3a0] ss:$16 sps:$4 sm:$0xff]  }
 0x2dc   :  { %6148 = vmatprep.subr.bf16.mxu0 %v8741_v19  ;;  %6271 = vmatprep.subr.bf16.mxu1 %v8744_v25  ;;  %v8802_v19 = vld [vmem:[%s11587_s3 + $0x3a8] ss:$16 sps:$4 sm:$0xff]   ;;  %v8807_v25 = vld [vmem:[%s11587_s3 + $0x3c4] ss:$16 sps:$4 sm:$0xff]  }
 0x2df   :  { %6149 = vmatpush1.bf16.msra.mxu0 %v8739_v11  ;;  %6272 = vmatpush1.bf16.msra.mxu1 %v8742_v36  ;;  %v8810_v11 = vld [vmem:[%s11587_s3 + $0x3cc] ss:$16 sps:$4 sm:$0xff]   ;;  %v8805_v36 = vld [vmem:[%s11587_s3 + $0x3c0] ss:$16 sps:$4 sm:$0xff]  }
 0x2e0   :  { %6150 = vmatprep.subr.bf16.mxu0 %v8747_v37  ;;  %6273 = vmatprep.subr.bf16.mxu1 %v8750_v38  ;;  %v8808_v37 = vld [vmem:[%s11587_s3 + $0x3c8] ss:$16 sps:$4 sm:$0xff]   ;;  %v8813_v38 = vld [vmem:[%s11587_s3 + $0x3e4] ss:$16 sps:$4 sm:$0xff]  }
 0x2e3   :  { %6151 = vmatpush1.bf16.msra.mxu0 %v8745_v39  ;;  %6274 = vmatpush1.bf16.msra.mxu1 %v8748_v40  ;;  %v8816_v39 = vld [vmem:[%s11587_s3 + $0x3ec] ss:$16 sps:$4 sm:$0xff]  }
 0x2e4   :  { %6152 = vmatprep.subr.bf16.mxu0 %v8753_v43  ;;  %6275 = vmatprep.subr.bf16.mxu1 %v8756_v44 }
 0x2e7   :  { %6153 = vmatpush1.bf16.msra.mxu0 %v8751_v46  ;;  %6276 = vmatpush1.bf16.msra.mxu1 %v8754_v49 }
 0x2e8   :  { %6154 = vmatprep.subr.bf16.mxu0 %v8759_v47  ;;  %6277 = vmatprep.subr.bf16.mxu1 %v8762_v50 }
 0x2e9   :  { %v7507_v58 = vpop.f32.mrb[4].mxu0  ;;  %v7529_v59 = vpop.f32.mrb[4].mxu1 }
 0x2ea   :  { %v7508_v63 = vpop.f32.mrb[5].mxu0  ;;  %v7530_v34 = vpop.f32.mrb[5].mxu1 }
 0x2eb   :  { %v7509_v3 = vadd.f32 %v7508_v63, %v7507_v58  ;;  %v7531_v33 = vadd.f32 %v7530_v34, %v7529_v59  ;;  %6155 = vmatpush1.bf16.msra.mxu0 %v8757_v54  ;;  %6278 = vmatpush1.bf16.msra.mxu1 %v8760_v55  ;;  %v7532_v45 = vpop.f32.mrb[6].mxu1  ;;  %v7510_v51 = vpop.f32.mrb[6].mxu0  ;;  %v8814_v54 = vld [vmem:[%s11587_s3 + $0x3e8] ss:$16 sps:$4 sm:$0xff]   ;;  %v8819_v59 = vld [vmem:[%s11587_s3 + $0x404] ss:$16 sps:$4 sm:$0xff]  }
 0x2ec   :  { %v7533_v2 = vpop.f32.mrb[7].mxu1  ;;  %6156 = vmatprep.subr.bf16.mxu0 %v8765_v56  ;;  %6279 = vmatprep.subr.bf16.mxu1 %v8768_v57  ;;  %v7511_v8 = vpop.f32.mrb[7].mxu0  ;;  %v5154_v56 = vmax.f32 %v11198_v7, 0.0  ;;  %v8817_v34 = vld [vmem:[%s11587_s3 + $0x400] ss:$16 sps:$4 sm:$0xff]  }
 0x2ed   :  { %v4867_v9 = vadd.f32 %v7509_v3, %v801_v61  ;;  %v8822_v7 = vld [vmem:[%s11587_s3 + $0x424] ss:$16 sps:$4 sm:$0xff]   ;;  %v8826_v51 = vld [vmem:[%s11587_s3 + $0x460] ss:$16 sps:$4 sm:$0xff]  }
 0x2ee   :  { %v5159_v3 = vpack.c.bf16 %v5154_v56, %v5154_v56  ;;  %v8825_v45 = vld [vmem:[%s11587_s3 + $0x444] ss:$16 sps:$4 sm:$0xff]   ;;  %v8846_v56 = vld [vmem:[%s11587_s3 + $0x488] ss:$16 sps:$4 sm:$0xff]  }
 0x2ef   :  { %v11298_v48 = vadd.f32 %v7531_v33, %v4867_v9  ;;  %6157 = vmatpush1.bf16.msra.mxu0 %v8763_v4  ;;  %6280 = vmatpush1.bf16.msra.mxu1 %v8766_v5  ;;  %v8820_v33 = vld [vmem:[%s11587_s3 + $0x420] ss:$16 sps:$4 sm:$0xff]   ;;  %v8828_v5 = vld [vmem:[%s11587_s3 + $0x464] ss:$16 sps:$4 sm:$0xff]  }
 0x2f0   :  { %6158 = vmatprep.subr.bf16.mxu0 %v8771_v60  ;;  %6281 = vmatprep.subr.bf16.mxu1 %v8774_v6  ;;  %v8823_v4 = vld [vmem:[%s11587_s3 + $0x440] ss:$16 sps:$4 sm:$0xff]   ;;  %v8831_v2 = vld [vmem:[%s11587_s3 + $0x484] ss:$16 sps:$4 sm:$0xff]  }
 0x2f1   :  { %v5310_v60 = vld [vmem:[%s11587_s3 + $0x4a0] sm:$0xff] }
 0x2f2   :  { %v8829_v6 = vld [vmem:[%s11587_s3 + $0x480] ss:$16 sps:$4 sm:$0xff]   ;;  %v7455_v8 = vcombine.high %v5310_v60, %v5310_v60  ;;  %v7454_v9 = vcombine.low %v5310_v60, %v5310_v60  ;;  %v8865_v60 = vld [vmem:[%s11589_s5 + $0x28] sm:$0xff]  }
 0x2f3   :  { %6159 = vmatpush1.bf16.msra.mxu0 %v8769_v10  ;;  %6282 = vmatpush1.bf16.msra.mxu1 %v8772_v12  ;;  %v8836_v10 = vld [vmem:[%s11587_s3 + $0x40c] ss:$16 sps:$4 sm:$0xff]  }
 0x2f4   :  { %6160 = vmatprep.subr.bf16.mxu0 %v8777_v14  ;;  %6283 = vmatprep.subr.bf16.mxu1 %v8780_v52 }
 0x2f7   :  { %6161 = vmatpush1.bf16.msra.mxu0 %v8775_v16  ;;  %6284 = vmatpush1.bf16.msra.mxu1 %v8778_v18 }
 0x2f8   :  { %6162 = vmatprep.subr.bf16.mxu0 %v8783_v20  ;;  %6285 = vmatprep.subr.bf16.mxu1 %v8786_v21 }
 0x2fb   :  { %6163 = vmatpush1.bf16.msra.mxu0 %v8781_v22  ;;  %6286 = vmatpush1.bf16.msra.mxu1 %v8784_v24 }
 0x2fc   :  { %6164 = vmatprep.subr.bf16.mxu0 %v8789_v26  ;;  %6287 = vmatprep.subr.bf16.mxu1 %v8792_v28 }
 0x2ff   :  { %6165 = vmatpush1.bf16.msra.mxu0 %v8787_v29  ;;  %6288 = vmatpush1.bf16.msra.mxu1 %v8790_v30 }
 0x300   :  { %6166 = vmatprep.subr.bf16.mxu0 %v8795_v31  ;;  %6289 = vmatprep.subr.bf16.mxu1 %v8798_v13 }
 0x303   :  { %6167 = vmatpush1.bf16.msra.mxu0 %v8793_v32  ;;  %6290 = vmatpush1.bf16.msra.mxu1 %v8796_v35 }
 0x304   :  { %6168 = vmatprep.subr.bf16.mxu0 %v8801_v27  ;;  %6291 = vmatprep.subr.bf16.mxu1 %v8804_v15 }
 0x307   :  { %6169 = vmatpush1.bf16.msra.mxu0 %v8799_v62  ;;  %6292 = vmatpush1.bf16.msra.mxu1 %v8802_v19 }
 0x308   :  { %6170 = vmatprep.subr.bf16.mxu0 %v8807_v25  ;;  %6293 = vmatprep.subr.bf16.mxu1 %v8810_v11 }
 0x309   :  { %v7551_v40 = vpop.f32.mrb[8].mxu0  ;;  %v7573_v43 = vpop.f32.mrb[8].mxu1 }
 0x30a   :  { %v7552_v44 = vpop.f32.mrb[9].mxu0  ;;  %v7574_v46 = vpop.f32.mrb[9].mxu1 }
 0x30b   :  { %v7553_v49 = vadd.f32 %v7552_v44, %v7551_v40  ;;  %v7575_v47 = vadd.f32 %v7574_v46, %v7573_v43  ;;  %6171 = vmatpush1.bf16.msra.mxu0 %v8805_v36  ;;  %6294 = vmatpush1.bf16.msra.mxu1 %v8808_v37  ;;  %v7576_v50 = vpop.f32.mrb[10].mxu1  ;;  %v7554_v55 = vpop.f32.mrb[10].mxu0  ;;  %v8834_v37 = vld [vmem:[%s11587_s3 + $0x408] ss:$16 sps:$4 sm:$0xff]   ;;  %v8842_v43 = vld [vmem:[%s11587_s3 + $0x44c] ss:$16 sps:$4 sm:$0xff]  }
 0x30c   :  { %v7577_v57 = vpop.f32.mrb[11].mxu1  ;;  %6172 = vmatprep.subr.bf16.mxu0 %v8813_v38  ;;  %6295 = vmatprep.subr.bf16.mxu1 %v8816_v39  ;;  %v7555_v58 = vpop.f32.mrb[11].mxu0  ;;  %v8839_v39 = vld [vmem:[%s11587_s3 + $0x42c] ss:$16 sps:$4 sm:$0xff]   ;;  %v8837_v40 = vld [vmem:[%s11587_s3 + $0x428] ss:$16 sps:$4 sm:$0xff]  }
 0x30d   :  { %v4947_v61 = vadd.f32 %v7553_v49, %v11298_v48  ;;  %v6090_v48 = vsel %vm6088_vm1, %v7454_v9, 0  ;;  %v8840_v44 = vld [vmem:[%s11587_s3 + $0x448] ss:$16 sps:$4 sm:$0xff]   ;;  %v8845_v46 = vld [vmem:[%s11587_s3 + $0x46c] ss:$16 sps:$4 sm:$0xff]   ;;  %v8858_v49 = vld [vmem:[%s11589_s5 + $0x80] sm:$0xff]  }
 0x30e   :  { %v8843_v50 = vld [vmem:[%s11587_s3 + $0x468] ss:$16 sps:$4 sm:$0xff]   ;;  %v8864_v55 = vld [vmem:[%s11589_s5 + $0x90] sm:$0xff]  }
 0x30f   :  { %v4987_v63 = vadd.f32 %v7575_v47, %v4947_v61  ;;  %6173 = vmatpush1.bf16.msra.mxu0 %v8811_v53  ;;  %6296 = vmatpush1.bf16.msra.mxu1 %v8814_v54  ;;  %v8861_v47 = vld [vmem:[%s11589_s5 + $0x88] sm:$0xff]   ;;  %v8851_v61 = vld [vmem:[%s11589_s5 + $0x40] sm:$0xff]   ;;  %v8868_v9 = vld [vmem:[%s11589_s5 + $0x30] sm:$0xff]  }
 0x310   :  { %6183 = vmatprep.subr.bf16.mxu0 %v8819_v59  ;;  %6622 = vmatprep.subr.bf16.mxu1 %v8905_v23  ;;  %v8848_v53 = vld [vmem:[%s11587_s3 + $0x48c] ss:$16 sps:$4 sm:$0xff]  }
 0x311   :  { %v5311_v54 = vld [vmem:[%s11587_s3 + $0x4a8] sm:$0xff] }
 0x312   :  { %6175 = vmatmul.mubr.bf16.vlgmr.msra.gmra.mrb[20].mxu0 %v5159_v3  ;;  %6298 = vmatmul.mubr.bf16.vlgmr.msra.gmra.mrb[20].mxu1 %v5159_v3  ;;  %v7457_v57 = vcombine.high %v5311_v54, %v5311_v54  ;;  %v7456_v58 = vcombine.low %v5311_v54, %v5311_v54  ;;  %v8854_v3 = vld [vmem:[%s11589_s5 + $0x8] sm:$0xff]  }
 0x313   :  { %6184 = vmatpush1.bf16.msra.mxu0 %v8817_v34  ;;  %6215 = vmatprep.mubr.bf16.mxu0 %v8905_v23  ;;  %v8853_v34 = vld [vmem:[%s11589_s5 + $0x48] sm:$0xff]  }
 0x314   :  { %6185 = vmatprep.subr.bf16.mxu0 %v8822_v7  ;;  %6623 = vmatpush1.bf16.msra.mxu1 %v8858_v49  ;;  %v6096_v59 = vsel %vm6088_vm1, %v7456_v58, 0  ;;  %v8855_v7 = vld [vmem:[%s11589_s5 + $0x50] sm:$0xff]  }
 0x315   :  { %6624 = vmatprep.subr.bf16.mxu1 %v8905_v23 }
 0x317   :  { %6186 = vmatpush1.bf16.msra.mxu0 %v8820_v33  ;;  %v8856_v33 = vld [vmem:[%s11589_s5 + $0x10] sm:$0xff]  }
 0x318   :  { %6187 = vmatprep.subr.bf16.mxu0 %v8825_v45  ;;  %6625 = vmatpush1.bf16.msra.mxu1 %v8861_v47  ;;  %v8857_v45 = vld [vmem:[%s11589_s5 + $0x58] sm:$0xff]  }
 0x319   :  { %6626 = vmatprep.subr.bf16.mxu1 %v8905_v23 }
 0x31b   :  { %6188 = vmatpush1.bf16.msra.mxu0 %v8823_v4  ;;  %v8859_v4 = vld [vmem:[%s11589_s5 + $0x18] sm:$0xff]  }
 0x31c   :  { %6189 = vmatprep.subr.bf16.mxu0 %v8828_v5  ;;  %6627 = vmatpush1.bf16.msra.mxu1 %v8864_v55  ;;  %v8860_v5 = vld [vmem:[%s11589_s5 + $0x60] sm:$0xff]  }
 0x31d   :  { %6628 = vmatprep.subr.bf16.mxu1 %v8905_v23 }
 0x31f   :  { %6190 = vmatpush1.bf16.msra.mxu0 %v8826_v51  ;;  %v8862_v51 = vld [vmem:[%s11589_s5 + $0x20] sm:$0xff]  }
 0x320   :  { %6191 = vmatprep.subr.bf16.mxu0 %v8831_v2  ;;  %v8863_v2 = vld [vmem:[%s11589_s5 + $0x68] sm:$0xff]  }
 0x323   :  { %6192 = vmatpush1.bf16.msra.mxu0 %v8829_v6  ;;  %v8866_v6 = vld [vmem:[%s11589_s5 + $0x70] sm:$0xff]  }
 0x324   :  { %7458 = vmatprep.subr.msk.bf16.mxu0 %vm6088_vm1, %v7455_v8  ;;  %v8867_v8 = vld [vmem:[%s11589_s5 + $0x98] sm:$0xff]  }
 0x325   :  { %6629 = vmatpush1.bf16.msra.mxu1 %v8867_v8 }
 0x326   :  { %6630 = vmatprep.subr.bf16.mxu1 %v8905_v23 }
 0x327   :  { %6194 = vmatpush1.bf16.msra.mxu0 %v6090_v48  ;;  %v8869_v48 = vld [vmem:[%s11589_s5 + $0x78] sm:$0xff]  }
 0x328   :  { %6306 = vmatprep.subr.bf16.mxu0 %v8836_v10  ;;  %v8870_v10 = vld [vmem:[%s11589_s5 + $0xa0] sm:$0xff]  }
 0x329   :  { %v7595_v12 = vpop.f32.mrb[12].mxu0  ;;  %v7617_v14 = vpop.f32.mrb[12].mxu1  ;;  %6631 = vmatpush1.bf16.msra.mxu1 %v8870_v10 }
 0x32a   :  { %v7596_v52 = vpop.f32.mrb[13].mxu0  ;;  %v7618_v16 = vpop.f32.mrb[13].mxu1  ;;  %6632 = vmatprep.subr.bf16.mxu1 %v8905_v23 }
 0x32b   :  { %v7597_v18 = vadd.f32 %v7596_v52, %v7595_v12  ;;  %v7619_v20 = vadd.f32 %v7618_v16, %v7617_v14  ;;  %v7620_v21 = vpop.f32.mrb[14].mxu1  ;;  %v7598_v22 = vpop.f32.mrb[14].mxu0  ;;  %v8871_v12 = vld [vmem:[%s11589_s5 + $0x38] sm:$0xff]   ;;  %v8872_v14 = vld [vmem:[%s11589_s5 + $0xa8] sm:$0xff]   ;;  %v8873_v52 = vld [vmem:[%s11589_s5 + $0xb0] sm:$0xff]  }
 0x32c   :  { %v7621_v24 = vpop.f32.mrb[15].mxu1  ;;  %v7599_v26 = vpop.f32.mrb[15].mxu0  ;;  %v8874_v16 = vld [vmem:[%s11589_s5 + $0xb8] sm:$0xff]   ;;  %v8877_v21 = vld [vmem:[%s11589_s5 + $0xd0] ss:$0 sps:$4 sm:$0x33]  }
 0x32d   :  { %v5027_v28 = vadd.f32 %v7597_v18, %v4987_v63  ;;  %v8852_v63 = vld [vmem:[%s11589_s5] sm:$0xff]   ;;  %6633 = vmatpush1.bf16.msra.mxu1 %v8872_v14  ;;  %v6580_v22 = vsel %vm6578_vm3, %v8877_v21, 0 }
 0x32e   :  { %6634 = vmatprep.subr.bf16.mxu1 %v8905_v23  ;;  %v8875_v18 = vld [vmem:[%s11589_s5 + $0xc0] sm:$0xff]  }
 0x32f   :  { %v5067_v29 = vadd.f32 %v7619_v20, %v5027_v28  ;;  %v8876_v20 = vld [vmem:[%s11589_s5 + $0xc8] sm:$0xff]  }
 0x331   :  { %6635 = vmatpush1.bf16.msra.mxu1 %v8873_v52 }
 0x332   :  { %6636 = vmatprep.subr.bf16.mxu1 %v8905_v23 }
 0x335   :  { %6637 = vmatpush1.bf16.msra.mxu1 %v8874_v16 }
 0x336   :  { %6638 = vmatprep.subr.bf16.mxu1 %v8905_v23 }
 0x339   :  { %6639 = vmatpush1.bf16.msra.mxu1 %v8875_v18 }
 0x33a   :  { %6640 = vmatprep.subr.bf16.mxu1 %v8905_v23 }
 0x33d   :  { %6641 = vmatpush1.bf16.msra.mxu1 %v8876_v20 }
 0x33e   :  { %6642 = vmatprep.subr.bf16.mxu1 %v8905_v23 }
 0x341   :  { %6643 = vmatpush1.bf16.msra.mxu1 %v6580_v22 }
 0x349   :  { %v7639_v30 = vpop.f32.mrb[16].mxu0 }
 0x34a   :  { %v7640_v31 = vpop.f32.mrb[17].mxu0 }
 0x34b   :  { %v7641_v13 = vadd.f32 %v7640_v31, %v7639_v30  ;;  %v7642_v32 = vpop.f32.mrb[18].mxu0  ;;  %v5312_v30 = vld [vmem:[%s11588_s4] sm:$0xf] }
 0x34c   :  { %v7643_v35 = vpop.f32.mrb[19].mxu0  ;;  %v5317_v31 = vrot.slane %v5312_v30, %v784_v41  ;;  %v5329_v41 = vrot.slane %v5312_v30, %v796_v1 }
 0x34d   :  { %v5107_v27 = vadd.f32 %v7641_v13, %v5067_v29 }
 0x35d   :  { %v5146_v15 = vpop.f32.mrb[16].mxu1 }
 0x35e   :  { %v5147_v62 = vadd.f32 %v5146_v15, %v5107_v27  ;;  %v5148_v19 = vpop.f32.mrb[17].mxu1 }
 0x35f   :  { %v5149_v25 = vpop.f32.mrb[18].mxu1 }
 0x360   :  { %v5156_v11 = vmax.f32 %v5147_v62, 0.0  ;;  %v5150_v36 = vpop.f32.mrb[19].mxu1 }
 0x362   :  { %v5161_v38 = vpack.c.bf16 %v5156_v11, %v5156_v11 }
 0x364   :  { %7459 = vmatmul.mubr.msk.bf16.vlgmr.msra.gmra.mrb[20].mxu0 %vm6084_vm2, %v5161_v38 }
 0x365   :  { %6307 = vmatpush1.bf16.msra.mxu0 %v8834_v37  ;;  %6338 = vmatprep.mubr.bf16.mxu0 %v8905_v23  ;;  %v5321_v23 = vrot.slane %v5312_v30, %v788_v17  ;;  %v5325_v37 = vrot.slane %v5312_v30, %v792_v0 }
 0x366   :  { %6308 = vmatprep.subr.bf16.mxu0 %v8839_v39 }
 0x369   :  { %6309 = vmatpush1.bf16.msra.mxu0 %v8837_v40 }
 0x36a   :  { %6310 = vmatprep.subr.bf16.mxu0 %v8842_v43 }
 0x36d   :  { %6311 = vmatpush1.bf16.msra.mxu0 %v8840_v44 }
 0x36e   :  { %6312 = vmatprep.subr.bf16.mxu0 %v8845_v46 }
 0x371   :  { %6313 = vmatpush1.bf16.msra.mxu0 %v8843_v50 }
 0x372   :  { %6314 = vmatprep.subr.bf16.mxu0 %v8848_v53 }
 0x375   :  { %6315 = vmatpush1.bf16.msra.mxu0 %v8846_v56 }
 0x376   :  { %7460 = vmatprep.subr.msk.bf16.mxu0 %vm6088_vm1, %v7457_v57  ;;  %v7462_v57 = vld [vmem:[%s11590_s6] ss:$0 sm:$0xff] }
 0x379   :  { %6317 = vmatpush1.bf16.msra.mxu0 %v6096_v59 }
 0x37a   :  { %7645 = vmatprep.subr.bf16.mxu0 %v8851_v61 }
 0x37c   :  { %7461 = vmatmul.mubr.msk.bf16.vlgmr.msra.gmra.mrb[24].mxu0 %vm6084_vm2, %v5161_v38 }
 0x37d   :  { %7646 = vmatpush3.bf16.msra.mxu0 %v8852_v63 }
 0x37e   :  { %7647 = vmatprep.subr.bf16.mxu0 %v8853_v34 }
 0x381   :  { %7648 = vmatpush3.bf16.msra.mxu0 %v8854_v3 }
 0x382   :  { %7649 = vmatprep.subr.bf16.mxu0 %v8855_v7 }
 0x385   :  { %7650 = vmatpush3.bf16.msra.mxu0 %v8856_v33 }
 0x386   :  { %7651 = vmatprep.subr.bf16.mxu0 %v8857_v45 }
 0x389   :  { %7652 = vmatpush3.bf16.msra.mxu0 %v8859_v4 }
 0x38a   :  { %7653 = vmatprep.subr.bf16.mxu0 %v8860_v5 }
 0x38d   :  { %7654 = vmatpush3.bf16.msra.mxu0 %v8862_v51 }
 0x38e   :  { %7655 = vmatprep.subr.bf16.mxu0 %v8863_v2 }
 0x391   :  { %7656 = vmatpush3.bf16.msra.mxu0 %v8865_v60 }
 0x392   :  { %7657 = vmatprep.subr.bf16.mxu0 %v8866_v6 }
 0x395   :  { %7658 = vmatpush3.bf16.msra.mxu0 %v8868_v9 }
 0x396   :  { %7659 = vmatprep.subr.bf16.mxu0 %v8869_v48 }
 0x399   :  { %7660 = vmatpush3.bf16.msra.mxu0 %v8871_v12 }
 0x3e5   :  { %v6299_v24 = vpop.f32.mrb[20].mxu1 }
 0x3e6   :  { %v6301_v26 = vpop.f32.mrb[21].mxu1  ;;  %v7673_v38 = vadd.f32 %v6299_v24, %v5325_v37 }
 0x3e7   :  { %v6303_v28 = vpop.f32.mrb[22].mxu1  ;;  %v7675_v17 = vadd.f32 %v6301_v26, %v5329_v41 }
 0x3e8   :  { %v6304_v29 = vpop.f32.mrb[23].mxu1 }
 0x437   :  { %v6217_v13 = vpop.f32.mrb[20].mxu0 }
 0x438   :  { %v7671_v32 = vadd.f32 %v6217_v13, %v5317_v31  ;;  %v6219_v35 = vpop.f32.mrb[21].mxu0 }
 0x439   :  { %v7672_v27 = vadd.f32 %v6219_v35, %v5321_v23  ;;  %v6221_v15 = vpop.f32.mrb[22].mxu0 }
 0x43a   :  { %v6347_v62 = vmax.f32 %v7671_v32, 0.0  ;;  %v6222_v19 = vpop.f32.mrb[23].mxu0 }
 0x43b   :  { %v6348_v25 = vmax.f32 %v7672_v27, 0.0 }
 0x43c   :  { %v6351_v36 = vpack.c.bf16 %v6347_v62, %v6347_v62 }
 0x43d   :  { %v6352_v11 = vpack.c.bf16 %v6348_v25, %v6348_v25 }
 0x43f   :  { %6614 = vmatprep.mubr.bf16.mxu0 %v6352_v11 }
 0x440   :  { %6615 = vmatmul.mubr.bf16.vlgmr.msra.gmra.mrb[28].mxu0 %v6351_v36 }
 0x44f   :  { %v6340_v39 = vpop.f32.mrb[24].mxu0 }
 0x450   :  { %v7674_v40 = vadd.f32 %v7673_v38, %v6340_v39  ;;  %v6342_v43 = vpop.f32.mrb[25].mxu0 }
 0x451   :  { %v7676_v44 = vadd.f32 %v7675_v17, %v6342_v43  ;;  %v6344_v46 = vpop.f32.mrb[26].mxu0 }
 0x452   :  { %v6349_v49 = vmax.f32 %v7674_v40, 0.0  ;;  %v6345_v47 = vpop.f32.mrb[27].mxu0 }
 0x453   :  { %v6350_v50 = vmax.f32 %v7676_v44, 0.0 }
 0x454   :  { %v6353_v54 = vpack.c.bf16 %v6349_v49, %v6349_v49 }
 0x455   :  { %v6354_v53 = vpack.c.bf16 %v6350_v50, %v6350_v50 }
 0x457   :  { %7490 = vmatprep.mubr.msk.bf16.mxu1 %vm6574_vm4, %v6354_v53 }
 0x458   :  { %6655 = vmatmul.mubr.bf16.vlgmr.msra.gmra.mrb[24].mxu1 %v6353_v54 }
 0x513   :  { %v7661_v55 = vpop.f32.mrb[28].mxu0 }
 0x514   :  { %v7662_v0 = vpop.f32.mrb[29].mxu0 }
 0x515   :  { %v7663_v56 = vadd.f32 %v7662_v0, %v7661_v55  ;;  %v7664_v42 = vpop.f32.mrb[30].mxu0 }
 0x516   :  { %v7665_v1 = vpop.f32.mrb[31].mxu0 }
 0x517   :  { %v6617_v58 = vadd.f32 %v7663_v56, %v7462_v57 }
 0x52b   :  { %v6656_v59 = vpop.f32.mrb[24].mxu1 }
 0x52c   :  { %v6657_v61 = vadd.f32 %v6656_v59, %v6617_v58  ;;  %v6658_v63 = vpop.f32.mrb[25].mxu1 }
 0x52d   :  { %v6659_v34 = vpop.f32.mrb[26].mxu1 }
 0x52e   :  { %v6660_v3 = vpop.f32.mrb[27].mxu1  ;;  %6663 = vst.msk [vmem:[#allocation2] sm:$0x3] %vm6662_vm5, %v6657_v61 }
 0x52f   :  { %8891 = shalt.err (!%p8888_p4)
}
 0x530   :  { %s8892_s1 = scalar_lea.hbm %s11591_s7, 32 }
 0x531   :  { %p8893_p5 = scmp.ne.s32.totalorder %s11591_s7, %s8892_s1  ;;  %p8896_p6 = scmp.lt.u32.totalorder %s8892_s1, %s11591_s7 }
 0x533   :  { %p8898_p7 = pnand %p8896_p6, %p8893_p5 }
 0x535   :  { %8901 = shalt.err (!%p8898_p7)
}
 0x536   :  { %6673 = dma.vmem_to_hbm [thread:$0]  %s6671_s16, 32, %s11591_s7, [#allocation3]  }
 0x537   :  { %8902 = dma.done.wait [#allocation3], 32  }
 0x538   :  { %8903 = vsyncadd [#allocation3], 4294967264 }
 0x539   :  { %6677 = vsyncpa [#allocation3], 1 }

</bundles_post_ra>
